<compile_context>
chip_gen: v7x
topology: tpu7x:2x2x1
jax: 0.10.0
libtpu: 0.0.40
codegen_flags: <defaults>
</compile_context>

<pallas_src>
import functools
import math

import jax
import jax.numpy as jnp
from jax import lax
from jax.experimental import pallas as pl
from jax.experimental.pallas import tpu as pltpu


# ----------------------------- shared math helpers ---------------------------
def _layernorm(x, gamma, beta, eps=1e-5):
    mean = jnp.mean(x, axis=-1, keepdims=True)
    var = jnp.mean((x - mean) ** 2, axis=-1, keepdims=True)
    return (x - mean) * lax.rsqrt(var + eps) * gamma + beta


def _gelu_tanh(x):
    # tanh-approx GELU (single EUP tanh per element); matches the exact
    # erf GELU to <1e-4 abs in the activation range seen here (|x| < ~1).
    c = 0.7978845608028654  # sqrt(2/pi)
    return 0.5 * x * (1.0 + jnp.tanh(c * (x + 0.044715 * x * x * x)))


def _gelu_exact(x):
    # Exact erf GELU (torch.nn.GELU default) — used only by the JAX reference.
    return 0.5 * x * (1.0 + jax.scipy.special.erf(x / math.sqrt(2.0)))


# ------------------------------- fused Pallas kernel --------------------------
def gpt_kernel(x_ref,
               wq_ref, wk_ref, wv_ref, bq_ref, bk_ref, bv_ref,
               wo_ref, bo_ref,
               w1_ref, b1_ref, w2_ref, b2_ref,
               g1_ref, be1_ref, g2_ref, be2_ref,
               wout_ref, bout_ref,
               logits_ref, *, H, L):
    """One batch element (grid axis b): L transformer blocks + output head.

    x_ref:   (S, E) f32 hidden states for this batch element.
    wq/wk/wv_ref: (L, H, E, D) bf16 per-head projection weights (Q pre-scaled
                  by 1/sqrt(D)); bq/bk/bv_ref: (L, H, 1, D) f32 biases.
    wo_ref:  (L, H, D, E) bf16 — head reassembly folded into the out-proj.
    wout_ref: (E, Vp) bf16, vocab padded to a 128 multiple (lane-dense store).
    """
    bf16 = jnp.bfloat16
    x = x_ref[...]                                            # (S, E) f32

    for l in range(L):  # static unroll: L is small & fixed (see header note)
        # ---------------- multi-head self-attention -------------------------
        x_bf = x.astype(bf16)
        attn = None
        for h in range(H):
            # Per-head Q/K/V: plain (S,E)x(E,D) matmuls, no lane-offset slicing.
            q = jnp.dot(x_bf, wq_ref[l, h],
                        preferred_element_type=jnp.float32) + bq_ref[l, h]
            k = jnp.dot(x_bf, wk_ref[l, h],
                        preferred_element_type=jnp.float32) + bk_ref[l, h]
            v = jnp.dot(x_bf, wv_ref[l, h],
                        preferred_element_type=jnp.float32) + bv_ref[l, h]

            # scores = q @ k^T via dot_general (contract last dims; no
            # materialized transpose).  1/sqrt(D) already folded into Q.
            scores = lax.dot_general(
                q.astype(bf16), k.astype(bf16),
                (((1,), (1,)), ((), ())),
                preferred_element_type=jnp.float32)           # (S, S)

            # Softmax with deferred (flash-style) normalization.
            # NOTE: the key reduction spans only S=8 lanes at this toy size;
            # at real sizes S would be a multiple of 128 (lane-dense reduce).
            m = jnp.max(scores, axis=-1, keepdims=True)
            e = jnp.exp(scores - m)
            denom = jnp.sum(e, axis=-1, keepdims=True)
            av = jnp.dot(e.astype(bf16), v.astype(bf16),
                         preferred_element_type=jnp.float32)  # (S, D) unnormalized
            av = av * pl.reciprocal(denom, approx=True)       # normalize over D
            # (dropout on attention weights: identity in eval mode)

            # Head reassembly folded into the output projection: accumulate
            # per-head (S,D)x(D,E) contributions (no concatenate / masked store).
            contrib = jnp.dot(av.astype(bf16), wo_ref[l, h],
                              preferred_element_type=jnp.float32)   # (S, E)
            attn = contrib if attn is None else attn + contrib

        attn = attn + bo_ref[l]
        h1 = _layernorm(x + attn, g1_ref[l], be1_ref[l])

        # ---------------- feed-forward ---------------------------------------
        ffh = _gelu_tanh(jnp.dot(h1.astype(bf16), w1_ref[l],
                                 preferred_element_type=jnp.float32) + b1_ref[l])
        ff = jnp.dot(ffh.astype(bf16), w2_ref[l],
                     preferred_element_type=jnp.float32) + b2_ref[l]
        x = _layernorm(h1 + ff, g2_ref[l], be2_ref[l])

    # ---------------- output head (lane-dense: Vp multiple of 128) -----------
    logits_ref[...] = jnp.dot(x.astype(bf16), wout_ref[...],
                              preferred_element_type=jnp.float32) + bout_ref[...]


# ------------------------------- wrappers --------------------------------------
def prepare_params(tok_emb, pos_emb, blocks, w_out, b_out, *, H):
    """One-time host-side parameter prep:
    - split the QKV / out projections per head: (L,H,E,D) and (L,H,D,E),
    - fold the 1/sqrt(head_dim) attention scale into the Q projection,
    - cast matmul weights to bf16 (biases / LN params stay f32),
    - pad the output head to a 128-multiple vocab (lane-dense store)."""
    E = tok_emb.shape[1]
    D = E // H
    scale = 1.0 / math.sqrt(D)
    bf16 = jnp.bfloat16

    def per_head_w(w_full):   # (E, E) -> (H, E, D)
        return w_full.reshape(E, H, D).transpose(1, 0, 2)

    def per_head_b(b_full):   # (1, E) -> (H, 1, D)
        return b_full.reshape(H, D)[:, None, :]

    wq, wk, wv, bq, bk, bv, wo = [], [], [], [], [], [], []
    for p in blocks:
        wq.append(per_head_w(p['wqkv'][:, 0 * E:1 * E]) * scale)
        wk.append(per_head_w(p['wqkv'][:, 1 * E:2 * E]))
        wv.append(per_head_w(p['wqkv'][:, 2 * E:3 * E]))
        bq.append(per_head_b(p['bqkv'][:, 0 * E:1 * E]) * scale)
        bk.append(per_head_b(p['bqkv'][:, 1 * E:2 * E]))
        bv.append(per_head_b(p['bqkv'][:, 2 * E:3 * E]))
        wo.append(p['wo'].reshape(H, D, E))

    stackl = lambda xs: jnp.stack(xs, axis=0)
    stack = lambda name: jnp.stack([p[name] for p in blocks], axis=0)

    V = w_out.shape[1]
    Vp = ((V + 127) // 128) * 128
    w_out_p = jnp.zeros((E, Vp), jnp.float32).at[:, :V].set(w_out)
    b_out_p = jnp.zeros((1, Vp), jnp.float32).at[:, :V].set(b_out)

    return dict(
        tok_emb=tok_emb, pos_emb=pos_emb,
        wq=stackl(wq).astype(bf16), wk=stackl(wk).astype(bf16),
        wv=stackl(wv).astype(bf16),
        bq=stackl(bq), bk=stackl(bk), bv=stackl(bv),
        wo=stackl(wo).astype(bf16), bo=stack('bo'),
        w1=stack('w1').astype(bf16), b1=stack('b1'),
        w2=stack('w2').astype(bf16), b2=stack('b2'),
        g1=stack('g1'), be1=stack('be1'),
        g2=stack('g2'), be2=stack('be2'),
        w_out=w_out_p.astype(bf16), b_out=b_out_p,
        vocab=V)


def gpt_forward(input_ids, prep, *, H):
    B, S = input_ids.shape
    E = prep['tok_emb'].shape[1]
    L = prep['wq'].shape[0]
    Vp = prep['w_out'].shape[1]
    V = prep['vocab']

    # Embedding lookup (data-dependent gather) stays in plain JAX.
    x = prep['tok_emb'][input_ids] + prep['pos_emb'][jnp.arange(S)][None, :, :]
    x = x.astype(jnp.float32)                                   # (B, S, E)

    weight_keys = ('wq', 'wk', 'wv', 'bq', 'bk', 'bv', 'wo', 'bo',
                   'w1', 'b1', 'w2', 'b2', 'g1', 'be1', 'g2', 'be2',
                   'w_out', 'b_out')
    weight_args = [prep[k] for k in weight_keys]

    def full_spec(a):
        nd = a.ndim
        return pl.BlockSpec(a.shape, lambda b, nd=nd: (0,) * nd)

    in_specs = ([pl.BlockSpec((None, S, E), lambda b: (b, 0, 0))]
                + [full_spec(a) for a in weight_args])

    # Grid over the batch dimension ('parallel'): shards across both
    # TensorCores on v7x; weights use constant block indices so they are
    # loaded into VMEM once and reused across grid steps.
    logits_p = pl.pallas_call(
        functools.partial(gpt_kernel, H=H, L=L),
        grid=(B,),
        in_specs=in_specs,
        out_specs=pl.BlockSpec((None, S, Vp), lambda b: (b, 0, 0)),
        out_shape=jax.ShapeDtypeStruct((B, S, Vp), jnp.float32),
        compiler_params=pltpu.CompilerParams(
            dimension_semantics=("parallel",),
            vmem_limit_bytes=32 * 1024 * 1024),
    )(x, *weight_args)

    return logits_p[..., :V]


# ------------------------------ pure-JAX reference ----------------------------
def _block_ref(x, p, H):
    B, S, E = x.shape
    D = E // H
    qkv = x @ p['wqkv'] + p['bqkv'][0]
    q, k, v = jnp.split(qkv, 3, axis=-1)

    def to_heads(t):
        return t.reshape(B, S, H, D).transpose(0, 2, 1, 3)

    q, k, v = to_heads(q), to_heads(k), to_heads(v)
    scores = jnp.einsum('bhqd,bhkd->bhqk', q, k) / math.sqrt(D)
    w = jax.nn.softmax(scores, axis=-1)
    a = jnp.einsum('bhqk,bhkd->bhqd', w, v).transpose(0, 2, 1, 3).reshape(B, S, E)
    a = a @ p['wo'] + p['bo'][0]
    h1 = _layernorm(x + a, p['g1'], p['be1'])
    ff = _gelu_exact(h1 @ p['w1'] + p['b1'][0]) @ p['w2'] + p['b2'][0]
    return _layernorm(h1 + ff, p['g2'], p['be2'])


def gpt_forward_ref(input_ids, tok_emb, pos_emb, blocks, w_out, b_out, *, H):
    B, S = input_ids.shape
    x = tok_emb[input_ids] + pos_emb[jnp.arange(S)][None, :, :]
    for p in blocks:
        x = _block_ref(x, p, H)
    return x @ w_out + b_out[0]


# --------------------------------- param init ---------------------------------
def init_params(key, vocab, E, max_pos, n_layers):
    keys = jax.random.split(key, 3 + n_layers)
    tok_emb = jax.random.normal(keys[0], (vocab, E), jnp.float32) * 0.02
    pos_emb = jax.random.normal(keys[1], (max_pos, E), jnp.float32) * 0.02
    blocks = []
    for l in range(n_layers):
        ks = jax.random.split(keys[2 + l], 8)
        blocks.append(dict(
            wqkv=jax.random.normal(ks[0], (E, 3 * E), jnp.float32) * 0.02,
            bqkv=jax.random.normal(ks[1], (1, 3 * E), jnp.float32) * 0.02,
            wo=jax.random.normal(ks[2], (E, E), jnp.float32) * 0.02,
            bo=jax.random.normal(ks[3], (1, E), jnp.float32) * 0.02,
            w1=jax.random.normal(ks[4], (E, 4 * E), jnp.float32) * 0.02,
            b1=jax.random.normal(ks[5], (1, 4 * E), jnp.float32) * 0.02,
            w2=jax.random.normal(ks[6], (4 * E, E), jnp.float32) * 0.02,
            b2=jax.random.normal(ks[7], (1, E), jnp.float32) * 0.02,
            g1=jnp.ones((1, E), jnp.float32), be1=jnp.zeros((1, E), jnp.float32),
            g2=jnp.ones((1, E), jnp.float32), be2=jnp.zeros((1, E), jnp.float32),
        ))
    ko = jax.random.split(keys[2 + n_layers], 2)
    w_out = jax.random.normal(ko[0], (E, vocab), jnp.float32) * 0.02
    b_out = jax.random.normal(ko[1], (1, vocab), jnp.float32) * 0.02
    return tok_emb, pos_emb, blocks, w_out, b_out


# ------------------------------------ main -------------------------------------
if __name__ == "__main__":
    vocab_size = 64
    embedding_dim = 32
    max_position_embeddings = 16
    n_layers = 2
    n_head = 4
    B, S = 2, 8

    key = jax.random.PRNGKey(0)
    k_params, k_ids = jax.random.split(key)
    tok_emb, pos_emb, blocks, w_out, b_out = init_params(
        k_params, vocab_size, embedding_dim, max_position_embeddings, n_layers)
    input_ids = jax.random.randint(k_ids, (B, S), 0, vocab_size, dtype=jnp.int32)

    # One-time weight prep (per-head split, fold attention scale, bf16, pad head).
    prep = prepare_params(tok_emb, pos_emb, blocks, w_out, b_out, H=n_head)

    logits = gpt_forward(input_ids, prep, H=n_head)
    logits = jax.block_until_ready(logits)

    # Exact-f32 reference (scoped 'highest' matmul precision; original
    # un-split / un-padded f32 parameters, exact erf GELU, exact softmax).
    with jax.default_matmul_precision("highest"):
        ref = gpt_forward_ref(input_ids, tok_emb, pos_emb, blocks, w_out, b_out,
                              H=n_head)
        ref = jax.block_until_ready(ref)

    max_diff = float(jnp.max(jnp.abs(logits - ref)))
    assert logits.shape == (B, S, vocab_size), logits.shape
    assert bool(jnp.all(jnp.isfinite(logits)))
    # bf16 MXU operands (f32 accumulate), approx reciprocal and tanh GELU in
    # the kernel vs. an exact-f32 reference -> tolerance accounts for bf16.
    assert max_diff < 2e-2, f"max abs diff vs reference: {max_diff}"

    print("KERNEL_OK")
</pallas_src>

<mosaic_0001>
module attributes {stable_mosaic.version = 11 : i64} {
  func.func @gpt_kernel(%arg0: i32, %arg1: memref<1x8x32xf32, #tpu.memory_space<vmem>>, %arg2: memref<2x4x32x8xbf16, #tpu.memory_space<vmem>>, %arg3: memref<2x4x32x8xbf16, #tpu.memory_space<vmem>>, %arg4: memref<2x4x32x8xbf16, #tpu.memory_space<vmem>>, %arg5: memref<2x4x1x8xf32, #tpu.memory_space<vmem>>, %arg6: memref<2x4x1x8xf32, #tpu.memory_space<vmem>>, %arg7: memref<2x4x1x8xf32, #tpu.memory_space<vmem>>, %arg8: memref<2x4x8x32xbf16, #tpu.memory_space<vmem>>, %arg9: memref<2x1x32xf32, #tpu.memory_space<vmem>>, %arg10: memref<2x32x128xbf16, #tpu.memory_space<vmem>>, %arg11: memref<2x1x128xf32, #tpu.memory_space<vmem>>, %arg12: memref<2x128x32xbf16, #tpu.memory_space<vmem>>, %arg13: memref<2x1x32xf32, #tpu.memory_space<vmem>>, %arg14: memref<2x1x32xf32, #tpu.memory_space<vmem>>, %arg15: memref<2x1x32xf32, #tpu.memory_space<vmem>>, %arg16: memref<2x1x32xf32, #tpu.memory_space<vmem>>, %arg17: memref<2x1x32xf32, #tpu.memory_space<vmem>>, %arg18: memref<32x128xbf16, #tpu.memory_space<vmem>>, %arg19: memref<1x128xf32, #tpu.memory_space<vmem>>, %arg20: memref<1x8x128xf32, #tpu.memory_space<vmem>>) attributes {dimension_semantics = [#tpu.dimension_semantics<parallel>], iteration_bounds = array<i64: 2>, scalar_prefetch = 0 : i64, scratch_operands = 0 : i64, tpu.core_type = #tpu.core_type<tc>, window_params = [{transform_indices = @transform_0, window_bounds = array<i64: 1, 8, 32>}, {pipeline_mode = #tpu.pipeline_mode<synchronous>, transform_indices = @transform_1, window_bounds = array<i64: 2, 4, 32, 8>}, {pipeline_mode = #tpu.pipeline_mode<synchronous>, transform_indices = @transform_2, window_bounds = array<i64: 2, 4, 32, 8>}, {pipeline_mode = #tpu.pipeline_mode<synchronous>, transform_indices = @transform_3, window_bounds = array<i64: 2, 4, 32, 8>}, {pipeline_mode = #tpu.pipeline_mode<synchronous>, transform_indices = @transform_4, window_bounds = array<i64: 2, 4, 1, 8>}, {pipeline_mode = #tpu.pipeline_mode<synchronous>, transform_indices = @transform_5, window_bounds = array<i64: 2, 4, 1, 8>}, {pipeline_mode = #tpu.pipeline_mode<synchronous>, transform_indices = @transform_6, window_bounds = array<i64: 2, 4, 1, 8>}, {pipeline_mode = #tpu.pipeline_mode<synchronous>, transform_indices = @transform_7, window_bounds = array<i64: 2, 4, 8, 32>}, {pipeline_mode = #tpu.pipeline_mode<synchronous>, transform_indices = @transform_8, window_bounds = array<i64: 2, 1, 32>}, {pipeline_mode = #tpu.pipeline_mode<synchronous>, transform_indices = @transform_9, window_bounds = array<i64: 2, 32, 128>}, {pipeline_mode = #tpu.pipeline_mode<synchronous>, transform_indices = @transform_10, window_bounds = array<i64: 2, 1, 128>}, {pipeline_mode = #tpu.pipeline_mode<synchronous>, transform_indices = @transform_11, window_bounds = array<i64: 2, 128, 32>}, {pipeline_mode = #tpu.pipeline_mode<synchronous>, transform_indices = @transform_12, window_bounds = array<i64: 2, 1, 32>}, {pipeline_mode = #tpu.pipeline_mode<synchronous>, transform_indices = @transform_13, window_bounds = array<i64: 2, 1, 32>}, {pipeline_mode = #tpu.pipeline_mode<synchronous>, transform_indices = @transform_14, window_bounds = array<i64: 2, 1, 32>}, {pipeline_mode = #tpu.pipeline_mode<synchronous>, transform_indices = @transform_15, window_bounds = array<i64: 2, 1, 32>}, {pipeline_mode = #tpu.pipeline_mode<synchronous>, transform_indices = @transform_16, window_bounds = array<i64: 2, 1, 32>}, {pipeline_mode = #tpu.pipeline_mode<synchronous>, transform_indices = @transform_17, window_bounds = array<i64: 32, 128>}, {pipeline_mode = #tpu.pipeline_mode<synchronous>, transform_indices = @transform_18, window_bounds = array<i64: 1, 128>}, {transform_indices = @transform_19, window_bounds = array<i64: 1, 8, 128>}]} {
    %c0 = arith.constant 0 : index
    %c0_0 = arith.constant 0 : index
    %c0_1 = arith.constant 0 : index
    %0 = vector.load %arg1[%c0, %c0_0, %c0_1] : memref<1x8x32xf32, #tpu.memory_space<vmem>>, vector<1x8x32xf32>
    %1 = vector.shape_cast %0 : vector<1x8x32xf32> to vector<8x32xf32>
    %2 = arith.truncf %1 : vector<8x32xf32> to vector<8x32xbf16>
    %c0_2 = arith.constant 0 : index
    %c0_3 = arith.constant 0 : index
    %c0_4 = arith.constant 0 : index
    %c0_5 = arith.constant 0 : index
    %3 = vector.load %arg2[%c0_2, %c0_3, %c0_4, %c0_5] : memref<2x4x32x8xbf16, #tpu.memory_space<vmem>>, vector<1x1x32x8xbf16>
    %4 = vector.shape_cast %3 : vector<1x1x32x8xbf16> to vector<32x8xbf16>
    %cst = arith.constant dense<0.000000e+00> : vector<8x8xf32>
    %5 = tpu.matmul %2, %4, %cst {dimension_numbers = #tpu.dot_dimension_numbers<[1], [0], [0], [1], [0, 0, 1, 1], [], []>} : vector<8x32xbf16>, vector<32x8xbf16>, vector<8x8xf32> -> vector<8x8xf32>
    %c0_6 = arith.constant 0 : index
    %c0_7 = arith.constant 0 : index
    %c0_8 = arith.constant 0 : index
    %c0_9 = arith.constant 0 : index
    %6 = vector.load %arg5[%c0_6, %c0_7, %c0_8, %c0_9] : memref<2x4x1x8xf32, #tpu.memory_space<vmem>>, vector<1x1x1x8xf32>
    %7 = vector.shape_cast %6 : vector<1x1x1x8xf32> to vector<1x8xf32>
    %8 = vector.broadcast %7 : vector<1x8xf32> to vector<8x8xf32>
    %9 = arith.addf %5, %8 : vector<8x8xf32>
    %c0_10 = arith.constant 0 : index
    %c0_11 = arith.constant 0 : index
    %c0_12 = arith.constant 0 : index
    %c0_13 = arith.constant 0 : index
    %10 = vector.load %arg3[%c0_10, %c0_11, %c0_12, %c0_13] : memref<2x4x32x8xbf16, #tpu.memory_space<vmem>>, vector<1x1x32x8xbf16>
    %11 = vector.shape_cast %10 : vector<1x1x32x8xbf16> to vector<32x8xbf16>
    %cst_14 = arith.constant dense<0.000000e+00> : vector<8x8xf32>
    %12 = tpu.matmul %2, %11, %cst_14 {dimension_numbers = #tpu.dot_dimension_numbers<[1], [0], [0], [1], [0, 0, 1, 1], [], []>} : vector<8x32xbf16>, vector<32x8xbf16>, vector<8x8xf32> -> vector<8x8xf32>
    %c0_15 = arith.constant 0 : index
    %c0_16 = arith.constant 0 : index
    %c0_17 = arith.constant 0 : index
    %c0_18 = arith.constant 0 : index
    %13 = vector.load %arg6[%c0_15, %c0_16, %c0_17, %c0_18] : memref<2x4x1x8xf32, #tpu.memory_space<vmem>>, vector<1x1x1x8xf32>
    %14 = vector.shape_cast %13 : vector<1x1x1x8xf32> to vector<1x8xf32>
    %15 = vector.broadcast %14 : vector<1x8xf32> to vector<8x8xf32>
    %16 = arith.addf %12, %15 : vector<8x8xf32>
    %c0_19 = arith.constant 0 : index
    %c0_20 = arith.constant 0 : index
    %c0_21 = arith.constant 0 : index
    %c0_22 = arith.constant 0 : index
    %17 = vector.load %arg4[%c0_19, %c0_20, %c0_21, %c0_22] : memref<2x4x32x8xbf16, #tpu.memory_space<vmem>>, vector<1x1x32x8xbf16>
    %18 = vector.shape_cast %17 : vector<1x1x32x8xbf16> to vector<32x8xbf16>
    %cst_23 = arith.constant dense<0.000000e+00> : vector<8x8xf32>
    %19 = tpu.matmul %2, %18, %cst_23 {dimension_numbers = #tpu.dot_dimension_numbers<[1], [0], [0], [1], [0, 0, 1, 1], [], []>} : vector<8x32xbf16>, vector<32x8xbf16>, vector<8x8xf32> -> vector<8x8xf32>
    %c0_24 = arith.constant 0 : index
    %c0_25 = arith.constant 0 : index
    %c0_26 = arith.constant 0 : index
    %c0_27 = arith.constant 0 : index
    %20 = vector.load %arg7[%c0_24, %c0_25, %c0_26, %c0_27] : memref<2x4x1x8xf32, #tpu.memory_space<vmem>>, vector<1x1x1x8xf32>
    %21 = vector.shape_cast %20 : vector<1x1x1x8xf32> to vector<1x8xf32>
    %22 = vector.broadcast %21 : vector<1x8xf32> to vector<8x8xf32>
    %23 = arith.addf %19, %22 : vector<8x8xf32>
    %24 = arith.truncf %9 : vector<8x8xf32> to vector<8x8xbf16>
    %25 = arith.truncf %16 : vector<8x8xf32> to vector<8x8xbf16>
    %cst_28 = arith.constant dense<0.000000e+00> : vector<8x8xf32>
    %26 = tpu.matmul %24, %25, %cst_28 {dimension_numbers = #tpu.dot_dimension_numbers<[1], [1], [0], [0], [0, 0, 1, 0], [], []>} : vector<8x8xbf16>, vector<8x8xbf16>, vector<8x8xf32> -> vector<8x8xf32>
    %cst_29 = arith.constant dense<0xFF800000> : vector<8xf32>
    %27 = vector.multi_reduction <maximumf>, %26, %cst_29 [1] : vector<8x8xf32> to vector<8xf32>
    %28 = vector.shape_cast %27 : vector<8xf32> to vector<8x1xf32>
    %29 = vector.broadcast %28 : vector<8x1xf32> to vector<8x8xf32>
    %30 = arith.subf %26, %29 : vector<8x8xf32>
    %31 = math.exp %30 : vector<8x8xf32>
    %cst_30 = arith.constant dense<0.000000e+00> : vector<8xf32>
    %32 = vector.multi_reduction <add>, %31, %cst_30 [1] : vector<8x8xf32> to vector<8xf32>
    %33 = vector.shape_cast %32 : vector<8xf32> to vector<8x1xf32>
    %34 = arith.truncf %31 : vector<8x8xf32> to vector<8x8xbf16>
    %35 = arith.truncf %23 : vector<8x8xf32> to vector<8x8xbf16>
    %cst_31 = arith.constant dense<0.000000e+00> : vector<8x8xf32>
    %36 = tpu.matmul %34, %35, %cst_31 {dimension_numbers = #tpu.dot_dimension_numbers<[1], [0], [0], [1], [0, 0, 1, 1], [], []>} : vector<8x8xbf16>, vector<8x8xbf16>, vector<8x8xf32> -> vector<8x8xf32>
    %37 = tpu.reciprocal %33 {approx = true} : vector<8x1xf32> -> vector<8x1xf32>
    %38 = vector.broadcast %37 : vector<8x1xf32> to vector<8x8xf32>
    %39 = arith.mulf %36, %38 : vector<8x8xf32>
    %40 = arith.truncf %39 : vector<8x8xf32> to vector<8x8xbf16>
    %c0_32 = arith.constant 0 : index
    %c0_33 = arith.constant 0 : index
    %c0_34 = arith.constant 0 : index
    %c0_35 = arith.constant 0 : index
    %41 = vector.load %arg8[%c0_32, %c0_33, %c0_34, %c0_35] : memref<2x4x8x32xbf16, #tpu.memory_space<vmem>>, vector<1x1x8x32xbf16>
    %42 = vector.shape_cast %41 : vector<1x1x8x32xbf16> to vector<8x32xbf16>
    %cst_36 = arith.constant dense<0.000000e+00> : vector<8x32xf32>
    %43 = tpu.matmul %40, %42, %cst_36 {dimension_numbers = #tpu.dot_dimension_numbers<[1], [0], [0], [1], [0, 0, 1, 1], [], []>} : vector<8x8xbf16>, vector<8x32xbf16>, vector<8x32xf32> -> vector<8x32xf32>
    %c0_37 = arith.constant 0 : index
    %c1 = arith.constant 1 : index
    %c0_38 = arith.constant 0 : index
    %c0_39 = arith.constant 0 : index
    %44 = vector.load %arg2[%c0_37, %c1, %c0_38, %c0_39] : memref<2x4x32x8xbf16, #tpu.memory_space<vmem>>, vector<1x1x32x8xbf16>
    %45 = vector.shape_cast %44 : vector<1x1x32x8xbf16> to vector<32x8xbf16>
    %cst_40 = arith.constant dense<0.000000e+00> : vector<8x8xf32>
    %46 = tpu.matmul %2, %45, %cst_40 {dimension_numbers = #tpu.dot_dimension_numbers<[1], [0], [0], [1], [0, 0, 1, 1], [], []>} : vector<8x32xbf16>, vector<32x8xbf16>, vector<8x8xf32> -> vector<8x8xf32>
    %c0_41 = arith.constant 0 : index
    %c1_42 = arith.constant 1 : index
    %c0_43 = arith.constant 0 : index
    %c0_44 = arith.constant 0 : index
    %47 = vector.load %arg5[%c0_41, %c1_42, %c0_43, %c0_44] : memref<2x4x1x8xf32, #tpu.memory_space<vmem>>, vector<1x1x1x8xf32>
    %48 = vector.shape_cast %47 : vector<1x1x1x8xf32> to vector<1x8xf32>
    %49 = vector.broadcast %48 : vector<1x8xf32> to vector<8x8xf32>
    %50 = arith.addf %46, %49 : vector<8x8xf32>
    %c0_45 = arith.constant 0 : index
    %c1_46 = arith.constant 1 : index
    %c0_47 = arith.constant 0 : index
    %c0_48 = arith.constant 0 : index
    %51 = vector.load %arg3[%c0_45, %c1_46, %c0_47, %c0_48] : memref<2x4x32x8xbf16, #tpu.memory_space<vmem>>, vector<1x1x32x8xbf16>
    %52 = vector.shape_cast %51 : vector<1x1x32x8xbf16> to vector<32x8xbf16>
    %cst_49 = arith.constant dense<0.000000e+00> : vector<8x8xf32>
    %53 = tpu.matmul %2, %52, %cst_49 {dimension_numbers = #tpu.dot_dimension_numbers<[1], [0], [0], [1], [0, 0, 1, 1], [], []>} : vector<8x32xbf16>, vector<32x8xbf16>, vector<8x8xf32> -> vector<8x8xf32>
    %c0_50 = arith.constant 0 : index
    %c1_51 = arith.constant 1 : index
    %c0_52 = arith.constant 0 : index
    %c0_53 = arith.constant 0 : index
    %54 = vector.load %arg6[%c0_50, %c1_51, %c0_52, %c0_53] : memref<2x4x1x8xf32, #tpu.memory_space<vmem>>, vector<1x1x1x8xf32>
    %55 = vector.shape_cast %54 : vector<1x1x1x8xf32> to vector<1x8xf32>
    %56 = vector.broadcast %55 : vector<1x8xf32> to vector<8x8xf32>
    %57 = arith.addf %53, %56 : vector<8x8xf32>
    %c0_54 = arith.constant 0 : index
    %c1_55 = arith.constant 1 : index
    %c0_56 = arith.constant 0 : index
    %c0_57 = arith.constant 0 : index
    %58 = vector.load %arg4[%c0_54, %c1_55, %c0_56, %c0_57] : memref<2x4x32x8xbf16, #tpu.memory_space<vmem>>, vector<1x1x32x8xbf16>
    %59 = vector.shape_cast %58 : vector<1x1x32x8xbf16> to vector<32x8xbf16>
    %cst_58 = arith.constant dense<0.000000e+00> : vector<8x8xf32>
    %60 = tpu.matmul %2, %59, %cst_58 {dimension_numbers = #tpu.dot_dimension_numbers<[1], [0], [0], [1], [0, 0, 1, 1], [], []>} : vector<8x32xbf16>, vector<32x8xbf16>, vector<8x8xf32> -> vector<8x8xf32>
    %c0_59 = arith.constant 0 : index
    %c1_60 = arith.constant 1 : index
    %c0_61 = arith.constant 0 : index
    %c0_62 = arith.constant 0 : index
    %61 = vector.load %arg7[%c0_59, %c1_60, %c0_61, %c0_62] : memref<2x4x1x8xf32, #tpu.memory_space<vmem>>, vector<1x1x1x8xf32>
    %62 = vector.shape_cast %61 : vector<1x1x1x8xf32> to vector<1x8xf32>
    %63 = vector.broadcast %62 : vector<1x8xf32> to vector<8x8xf32>
    %64 = arith.addf %60, %63 : vector<8x8xf32>
    %65 = arith.truncf %50 : vector<8x8xf32> to vector<8x8xbf16>
    %66 = arith.truncf %57 : vector<8x8xf32> to vector<8x8xbf16>
    %cst_63 = arith.constant dense<0.000000e+00> : vector<8x8xf32>
    %67 = tpu.matmul %65, %66, %cst_63 {dimension_numbers = #tpu.dot_dimension_numbers<[1], [1], [0], [0], [0, 0, 1, 0], [], []>} : vector<8x8xbf16>, vector<8x8xbf16>, vector<8x8xf32> -> vector<8x8xf32>
    %cst_64 = arith.constant dense<0xFF800000> : vector<8xf32>
    %68 = vector.multi_reduction <maximumf>, %67, %cst_64 [1] : vector<8x8xf32> to vector<8xf32>
    %69 = vector.shape_cast %68 : vector<8xf32> to vector<8x1xf32>
    %70 = vector.broadcast %69 : vector<8x1xf32> to vector<8x8xf32>
    %71 = arith.subf %67, %70 : vector<8x8xf32>
    %72 = math.exp %71 : vector<8x8xf32>
    %cst_65 = arith.constant dense<0.000000e+00> : vector<8xf32>
    %73 = vector.multi_reduction <add>, %72, %cst_65 [1] : vector<8x8xf32> to vector<8xf32>
    %74 = vector.shape_cast %73 : vector<8xf32> to vector<8x1xf32>
    %75 = arith.truncf %72 : vector<8x8xf32> to vector<8x8xbf16>
    %76 = arith.truncf %64 : vector<8x8xf32> to vector<8x8xbf16>
    %cst_66 = arith.constant dense<0.000000e+00> : vector<8x8xf32>
    %77 = tpu.matmul %75, %76, %cst_66 {dimension_numbers = #tpu.dot_dimension_numbers<[1], [0], [0], [1], [0, 0, 1, 1], [], []>} : vector<8x8xbf16>, vector<8x8xbf16>, vector<8x8xf32> -> vector<8x8xf32>
    %78 = tpu.reciprocal %74 {approx = true} : vector<8x1xf32> -> vector<8x1xf32>
    %79 = vector.broadcast %78 : vector<8x1xf32> to vector<8x8xf32>
    %80 = arith.mulf %77, %79 : vector<8x8xf32>
    %81 = arith.truncf %80 : vector<8x8xf32> to vector<8x8xbf16>
    %c0_67 = arith.constant 0 : index
    %c1_68 = arith.constant 1 : index
    %c0_69 = arith.constant 0 : index
    %c0_70 = arith.constant 0 : index
    %82 = vector.load %arg8[%c0_67, %c1_68, %c0_69, %c0_70] : memref<2x4x8x32xbf16, #tpu.memory_space<vmem>>, vector<1x1x8x32xbf16>
    %83 = vector.shape_cast %82 : vector<1x1x8x32xbf16> to vector<8x32xbf16>
    %cst_71 = arith.constant dense<0.000000e+00> : vector<8x32xf32>
    %84 = tpu.matmul %81, %83, %cst_71 {dimension_numbers = #tpu.dot_dimension_numbers<[1], [0], [0], [1], [0, 0, 1, 1], [], []>} : vector<8x8xbf16>, vector<8x32xbf16>, vector<8x32xf32> -> vector<8x32xf32>
    %85 = arith.addf %43, %84 : vector<8x32xf32>
    %c0_72 = arith.constant 0 : index
    %c2 = arith.constant 2 : index
    %c0_73 = arith.constant 0 : index
    %c0_74 = arith.constant 0 : index
    %86 = vector.load %arg2[%c0_72, %c2, %c0_73, %c0_74] : memref<2x4x32x8xbf16, #tpu.memory_space<vmem>>, vector<1x1x32x8xbf16>
    %87 = vector.shape_cast %86 : vector<1x1x32x8xbf16> to vector<32x8xbf16>
    %cst_75 = arith.constant dense<0.000000e+00> : vector<8x8xf32>
    %88 = tpu.matmul %2, %87, %cst_75 {dimension_numbers = #tpu.dot_dimension_numbers<[1], [0], [0], [1], [0, 0, 1, 1], [], []>} : vector<8x32xbf16>, vector<32x8xbf16>, vector<8x8xf32> -> vector<8x8xf32>
    %c0_76 = arith.constant 0 : index
    %c2_77 = arith.constant 2 : index
    %c0_78 = arith.constant 0 : index
    %c0_79 = arith.constant 0 : index
    %89 = vector.load %arg5[%c0_76, %c2_77, %c0_78, %c0_79] : memref<2x4x1x8xf32, #tpu.memory_space<vmem>>, vector<1x1x1x8xf32>
    %90 = vector.shape_cast %89 : vector<1x1x1x8xf32> to vector<1x8xf32>
    %91 = vector.broadcast %90 : vector<1x8xf32> to vector<8x8xf32>
    %92 = arith.addf %88, %91 : vector<8x8xf32>
    %c0_80 = arith.constant 0 : index
    %c2_81 = arith.constant 2 : index
    %c0_82 = arith.constant 0 : index
    %c0_83 = arith.constant 0 : index
    %93 = vector.load %arg3[%c0_80, %c2_81, %c0_82, %c0_83] : memref<2x4x32x8xbf16, #tpu.memory_space<vmem>>, vector<1x1x32x8xbf16>
    %94 = vector.shape_cast %93 : vector<1x1x32x8xbf16> to vector<32x8xbf16>
    %cst_84 = arith.constant dense<0.000000e+00> : vector<8x8xf32>
    %95 = tpu.matmul %2, %94, %cst_84 {dimension_numbers = #tpu.dot_dimension_numbers<[1], [0], [0], [1], [0, 0, 1, 1], [], []>} : vector<8x32xbf16>, vector<32x8xbf16>, vector<8x8xf32> -> vector<8x8xf32>
    %c0_85 = arith.constant 0 : index
    %c2_86 = arith.constant 2 : index
    %c0_87 = arith.constant 0 : index
    %c0_88 = arith.constant 0 : index
    %96 = vector.load %arg6[%c0_85, %c2_86, %c0_87, %c0_88] : memref<2x4x1x8xf32, #tpu.memory_space<vmem>>, vector<1x1x1x8xf32>
    %97 = vector.shape_cast %96 : vector<1x1x1x8xf32> to vector<1x8xf32>
    %98 = vector.broadcast %97 : vector<1x8xf32> to vector<8x8xf32>
    %99 = arith.addf %95, %98 : vector<8x8xf32>
    %c0_89 = arith.constant 0 : index
    %c2_90 = arith.constant 2 : index
    %c0_91 = arith.constant 0 : index
    %c0_92 = arith.constant 0 : index
    %100 = vector.load %arg4[%c0_89, %c2_90, %c0_91, %c0_92] : memref<2x4x32x8xbf16, #tpu.memory_space<vmem>>, vector<1x1x32x8xbf16>
    %101 = vector.shape_cast %100 : vector<1x1x32x8xbf16> to vector<32x8xbf16>
    %cst_93 = arith.constant dense<0.000000e+00> : vector<8x8xf32>
    %102 = tpu.matmul %2, %101, %cst_93 {dimension_numbers = #tpu.dot_dimension_numbers<[1], [0], [0], [1], [0, 0, 1, 1], [], []>} : vector<8x32xbf16>, vector<32x8xbf16>, vector<8x8xf32> -> vector<8x8xf32>
    %c0_94 = arith.constant 0 : index
    %c2_95 = arith.constant 2 : index
    %c0_96 = arith.constant 0 : index
    %c0_97 = arith.constant 0 : index
    %103 = vector.load %arg7[%c0_94, %c2_95, %c0_96, %c0_97] : memref<2x4x1x8xf32, #tpu.memory_space<vmem>>, vector<1x1x1x8xf32>
    %104 = vector.shape_cast %103 : vector<1x1x1x8xf32> to vector<1x8xf32>
    %105 = vector.broadcast %104 : vector<1x8xf32> to vector<8x8xf32>
    %106 = arith.addf %102, %105 : vector<8x8xf32>
    %107 = arith.truncf %92 : vector<8x8xf32> to vector<8x8xbf16>
    %108 = arith.truncf %99 : vector<8x8xf32> to vector<8x8xbf16>
    %cst_98 = arith.constant dense<0.000000e+00> : vector<8x8xf32>
    %109 = tpu.matmul %107, %108, %cst_98 {dimension_numbers = #tpu.dot_dimension_numbers<[1], [1], [0], [0], [0, 0, 1, 0], [], []>} : vector<8x8xbf16>, vector<8x8xbf16>, vector<8x8xf32> -> vector<8x8xf32>
    %cst_99 = arith.constant dense<0xFF800000> : vector<8xf32>
    %110 = vector.multi_reduction <maximumf>, %109, %cst_99 [1] : vector<8x8xf32> to vector<8xf32>
    %111 = vector.shape_cast %110 : vector<8xf32> to vector<8x1xf32>
    %112 = vector.broadcast %111 : vector<8x1xf32> to vector<8x8xf32>
    %113 = arith.subf %109, %112 : vector<8x8xf32>
    %114 = math.exp %113 : vector<8x8xf32>
    %cst_100 = arith.constant dense<0.000000e+00> : vector<8xf32>
    %115 = vector.multi_reduction <add>, %114, %cst_100 [1] : vector<8x8xf32> to vector<8xf32>
    %116 = vector.shape_cast %115 : vector<8xf32> to vector<8x1xf32>
    %117 = arith.truncf %114 : vector<8x8xf32> to vector<8x8xbf16>
    %118 = arith.truncf %106 : vector<8x8xf32> to vector<8x8xbf16>
    %cst_101 = arith.constant dense<0.000000e+00> : vector<8x8xf32>
    %119 = tpu.matmul %117, %118, %cst_101 {dimension_numbers = #tpu.dot_dimension_numbers<[1], [0], [0], [1], [0, 0, 1, 1], [], []>} : vector<8x8xbf16>, vector<8x8xbf16>, vector<8x8xf32> -> vector<8x8xf32>
    %120 = tpu.reciprocal %116 {approx = true} : vector<8x1xf32> -> vector<8x1xf32>
    %121 = vector.broadcast %120 : vector<8x1xf32> to vector<8x8xf32>
    %122 = arith.mulf %119, %121 : vector<8x8xf32>
    %123 = arith.truncf %122 : vector<8x8xf32> to vector<8x8xbf16>
    %c0_102 = arith.constant 0 : index
    %c2_103 = arith.constant 2 : index
    %c0_104 = arith.constant 0 : index
    %c0_105 = arith.constant 0 : index
    %124 = vector.load %arg8[%c0_102, %c2_103, %c0_104, %c0_105] : memref<2x4x8x32xbf16, #tpu.memory_space<vmem>>, vector<1x1x8x32xbf16>
    %125 = vector.shape_cast %124 : vector<1x1x8x32xbf16> to vector<8x32xbf16>
    %cst_106 = arith.constant dense<0.000000e+00> : vector<8x32xf32>
    %126 = tpu.matmul %123, %125, %cst_106 {dimension_numbers = #tpu.dot_dimension_numbers<[1], [0], [0], [1], [0, 0, 1, 1], [], []>} : vector<8x8xbf16>, vector<8x32xbf16>, vector<8x32xf32> -> vector<8x32xf32>
    %127 = arith.addf %85, %126 : vector<8x32xf32>
    %c0_107 = arith.constant 0 : index
    %c3 = arith.constant 3 : index
    %c0_108 = arith.constant 0 : index
    %c0_109 = arith.constant 0 : index
    %128 = vector.load %arg2[%c0_107, %c3, %c0_108, %c0_109] : memref<2x4x32x8xbf16, #tpu.memory_space<vmem>>, vector<1x1x32x8xbf16>
    %129 = vector.shape_cast %128 : vector<1x1x32x8xbf16> to vector<32x8xbf16>
    %cst_110 = arith.constant dense<0.000000e+00> : vector<8x8xf32>
    %130 = tpu.matmul %2, %129, %cst_110 {dimension_numbers = #tpu.dot_dimension_numbers<[1], [0], [0], [1], [0, 0, 1, 1], [], []>} : vector<8x32xbf16>, vector<32x8xbf16>, vector<8x8xf32> -> vector<8x8xf32>
    %c0_111 = arith.constant 0 : index
    %c3_112 = arith.constant 3 : index
    %c0_113 = arith.constant 0 : index
    %c0_114 = arith.constant 0 : index
    %131 = vector.load %arg5[%c0_111, %c3_112, %c0_113, %c0_114] : memref<2x4x1x8xf32, #tpu.memory_space<vmem>>, vector<1x1x1x8xf32>
    %132 = vector.shape_cast %131 : vector<1x1x1x8xf32> to vector<1x8xf32>
    %133 = vector.broadcast %132 : vector<1x8xf32> to vector<8x8xf32>
    %134 = arith.addf %130, %133 : vector<8x8xf32>
    %c0_115 = arith.constant 0 : index
    %c3_116 = arith.constant 3 : index
    %c0_117 = arith.constant 0 : index
    %c0_118 = arith.constant 0 : index
    %135 = vector.load %arg3[%c0_115, %c3_116, %c0_117, %c0_118] : memref<2x4x32x8xbf16, #tpu.memory_space<vmem>>, vector<1x1x32x8xbf16>
    %136 = vector.shape_cast %135 : vector<1x1x32x8xbf16> to vector<32x8xbf16>
    %cst_119 = arith.constant dense<0.000000e+00> : vector<8x8xf32>
    %137 = tpu.matmul %2, %136, %cst_119 {dimension_numbers = #tpu.dot_dimension_numbers<[1], [0], [0], [1], [0, 0, 1, 1], [], []>} : vector<8x32xbf16>, vector<32x8xbf16>, vector<8x8xf32> -> vector<8x8xf32>
    %c0_120 = arith.constant 0 : index
    %c3_121 = arith.constant 3 : index
    %c0_122 = arith.constant 0 : index
    %c0_123 = arith.constant 0 : index
    %138 = vector.load %arg6[%c0_120, %c3_121, %c0_122, %c0_123] : memref<2x4x1x8xf32, #tpu.memory_space<vmem>>, vector<1x1x1x8xf32>
    %139 = vector.shape_cast %138 : vector<1x1x1x8xf32> to vector<1x8xf32>
    %140 = vector.broadcast %139 : vector<1x8xf32> to vector<8x8xf32>
    %141 = arith.addf %137, %140 : vector<8x8xf32>
    %c0_124 = arith.constant 0 : index
    %c3_125 = arith.constant 3 : index
    %c0_126 = arith.constant 0 : index
    %c0_127 = arith.constant 0 : index
    %142 = vector.load %arg4[%c0_124, %c3_125, %c0_126, %c0_127] : memref<2x4x32x8xbf16, #tpu.memory_space<vmem>>, vector<1x1x32x8xbf16>
    %143 = vector.shape_cast %142 : vector<1x1x32x8xbf16> to vector<32x8xbf16>
    %cst_128 = arith.constant dense<0.000000e+00> : vector<8x8xf32>
    %144 = tpu.matmul %2, %143, %cst_128 {dimension_numbers = #tpu.dot_dimension_numbers<[1], [0], [0], [1], [0, 0, 1, 1], [], []>} : vector<8x32xbf16>, vector<32x8xbf16>, vector<8x8xf32> -> vector<8x8xf32>
    %c0_129 = arith.constant 0 : index
    %c3_130 = arith.constant 3 : index
    %c0_131 = arith.constant 0 : index
    %c0_132 = arith.constant 0 : index
    %145 = vector.load %arg7[%c0_129, %c3_130, %c0_131, %c0_132] : memref<2x4x1x8xf32, #tpu.memory_space<vmem>>, vector<1x1x1x8xf32>
    %146 = vector.shape_cast %145 : vector<1x1x1x8xf32> to vector<1x8xf32>
    %147 = vector.broadcast %146 : vector<1x8xf32> to vector<8x8xf32>
    %148 = arith.addf %144, %147 : vector<8x8xf32>
    %149 = arith.truncf %134 : vector<8x8xf32> to vector<8x8xbf16>
    %150 = arith.truncf %141 : vector<8x8xf32> to vector<8x8xbf16>
    %cst_133 = arith.constant dense<0.000000e+00> : vector<8x8xf32>
    %151 = tpu.matmul %149, %150, %cst_133 {dimension_numbers = #tpu.dot_dimension_numbers<[1], [1], [0], [0], [0, 0, 1, 0], [], []>} : vector<8x8xbf16>, vector<8x8xbf16>, vector<8x8xf32> -> vector<8x8xf32>
    %cst_134 = arith.constant dense<0xFF800000> : vector<8xf32>
    %152 = vector.multi_reduction <maximumf>, %151, %cst_134 [1] : vector<8x8xf32> to vector<8xf32>
    %153 = vector.shape_cast %152 : vector<8xf32> to vector<8x1xf32>
    %154 = vector.broadcast %153 : vector<8x1xf32> to vector<8x8xf32>
    %155 = arith.subf %151, %154 : vector<8x8xf32>
    %156 = math.exp %155 : vector<8x8xf32>
    %cst_135 = arith.constant dense<0.000000e+00> : vector<8xf32>
    %157 = vector.multi_reduction <add>, %156, %cst_135 [1] : vector<8x8xf32> to vector<8xf32>
    %158 = vector.shape_cast %157 : vector<8xf32> to vector<8x1xf32>
    %159 = arith.truncf %156 : vector<8x8xf32> to vector<8x8xbf16>
    %160 = arith.truncf %148 : vector<8x8xf32> to vector<8x8xbf16>
    %cst_136 = arith.constant dense<0.000000e+00> : vector<8x8xf32>
    %161 = tpu.matmul %159, %160, %cst_136 {dimension_numbers = #tpu.dot_dimension_numbers<[1], [0], [0], [1], [0, 0, 1, 1], [], []>} : vector<8x8xbf16>, vector<8x8xbf16>, vector<8x8xf32> -> vector<8x8xf32>
    %162 = tpu.reciprocal %158 {approx = true} : vector<8x1xf32> -> vector<8x1xf32>
    %163 = vector.broadcast %162 : vector<8x1xf32> to vector<8x8xf32>
    %164 = arith.mulf %161, %163 : vector<8x8xf32>
    %165 = arith.truncf %164 : vector<8x8xf32> to vector<8x8xbf16>
    %c0_137 = arith.constant 0 : index
    %c3_138 = arith.constant 3 : index
    %c0_139 = arith.constant 0 : index
    %c0_140 = arith.constant 0 : index
    %166 = vector.load %arg8[%c0_137, %c3_138, %c0_139, %c0_140] : memref<2x4x8x32xbf16, #tpu.memory_space<vmem>>, vector<1x1x8x32xbf16>
    %167 = vector.shape_cast %166 : vector<1x1x8x32xbf16> to vector<8x32xbf16>
    %cst_141 = arith.constant dense<0.000000e+00> : vector<8x32xf32>
    %168 = tpu.matmul %165, %167, %cst_141 {dimension_numbers = #tpu.dot_dimension_numbers<[1], [0], [0], [1], [0, 0, 1, 1], [], []>} : vector<8x8xbf16>, vector<8x32xbf16>, vector<8x32xf32> -> vector<8x32xf32>
    %169 = arith.addf %127, %168 : vector<8x32xf32>
    %c0_142 = arith.constant 0 : index
    %c0_143 = arith.constant 0 : index
    %c0_144 = arith.constant 0 : index
    %170 = vector.load %arg9[%c0_142, %c0_143, %c0_144] : memref<2x1x32xf32, #tpu.memory_space<vmem>>, vector<1x1x32xf32>
    %171 = vector.shape_cast %170 : vector<1x1x32xf32> to vector<1x32xf32>
    %172 = vector.broadcast %171 : vector<1x32xf32> to vector<8x32xf32>
    %173 = arith.addf %169, %172 : vector<8x32xf32>
    %174 = arith.addf %1, %173 : vector<8x32xf32>
    %c0_145 = arith.constant 0 : index
    %c0_146 = arith.constant 0 : index
    %c0_147 = arith.constant 0 : index
    %175 = vector.load %arg14[%c0_145, %c0_146, %c0_147] : memref<2x1x32xf32, #tpu.memory_space<vmem>>, vector<1x1x32xf32>
    %176 = vector.shape_cast %175 : vector<1x1x32xf32> to vector<1x32xf32>
    %c0_148 = arith.constant 0 : index
    %c0_149 = arith.constant 0 : index
    %c0_150 = arith.constant 0 : index
    %177 = vector.load %arg15[%c0_148, %c0_149, %c0_150] : memref<2x1x32xf32, #tpu.memory_space<vmem>>, vector<1x1x32xf32>
    %178 = vector.shape_cast %177 : vector<1x1x32xf32> to vector<1x32xf32>
    %cst_151 = arith.constant dense<0.000000e+00> : vector<8xf32>
    %179 = vector.multi_reduction <add>, %174, %cst_151 [1] : vector<8x32xf32> to vector<8xf32>
    %180 = vector.shape_cast %179 : vector<8xf32> to vector<8x1xf32>
    %cst_152 = arith.constant 3.200000e+01 : f32
    %181 = vector.broadcast %cst_152 : f32 to vector<8x1xf32>
    %182 = arith.divf %180, %181 : vector<8x1xf32>
    %183 = vector.broadcast %182 : vector<8x1xf32> to vector<8x32xf32>
    %184 = arith.subf %174, %183 : vector<8x32xf32>
    %185 = arith.mulf %184, %184 : vector<8x32xf32>
    %cst_153 = arith.constant dense<0.000000e+00> : vector<8xf32>
    %186 = vector.multi_reduction <add>, %185, %cst_153 [1] : vector<8x32xf32> to vector<8xf32>
    %187 = vector.shape_cast %186 : vector<8xf32> to vector<8x1xf32>
    %cst_154 = arith.constant 3.200000e+01 : f32
    %188 = vector.broadcast %cst_154 : f32 to vector<8x1xf32>
    %189 = arith.divf %187, %188 : vector<8x1xf32>
    %190 = vector.broadcast %182 : vector<8x1xf32> to vector<8x32xf32>
    %191 = arith.subf %174, %190 : vector<8x32xf32>
    %cst_155 = arith.constant 9.99999974E-6 : f32
    %192 = vector.broadcast %cst_155 : f32 to vector<8x1xf32>
    %193 = arith.addf %189, %192 : vector<8x1xf32>
    %194 = math.rsqrt %193 : vector<8x1xf32>
    %195 = vector.broadcast %194 : vector<8x1xf32> to vector<8x32xf32>
    %196 = arith.mulf %191, %195 : vector<8x32xf32>
    %197 = vector.broadcast %176 : vector<1x32xf32> to vector<8x32xf32>
    %198 = arith.mulf %196, %197 : vector<8x32xf32>
    %199 = vector.broadcast %178 : vector<1x32xf32> to vector<8x32xf32>
    %200 = arith.addf %198, %199 : vector<8x32xf32>
    %201 = arith.truncf %200 : vector<8x32xf32> to vector<8x32xbf16>
    %c0_156 = arith.constant 0 : index
    %c0_157 = arith.constant 0 : index
    %c0_158 = arith.constant 0 : index
    %202 = vector.load %arg10[%c0_156, %c0_157, %c0_158] : memref<2x32x128xbf16, #tpu.memory_space<vmem>>, vector<1x32x128xbf16>
    %203 = vector.shape_cast %202 : vector<1x32x128xbf16> to vector<32x128xbf16>
    %cst_159 = arith.constant dense<0.000000e+00> : vector<8x128xf32>
    %204 = tpu.matmul %201, %203, %cst_159 {dimension_numbers = #tpu.dot_dimension_numbers<[1], [0], [0], [1], [0, 0, 1, 1], [], []>} : vector<8x32xbf16>, vector<32x128xbf16>, vector<8x128xf32> -> vector<8x128xf32>
    %c0_160 = arith.constant 0 : index
    %c0_161 = arith.constant 0 : index
    %c0_162 = arith.constant 0 : index
    %205 = vector.load %arg11[%c0_160, %c0_161, %c0_162] : memref<2x1x128xf32, #tpu.memory_space<vmem>>, vector<1x1x128xf32>
    %206 = vector.shape_cast %205 : vector<1x1x128xf32> to vector<1x128xf32>
    %207 = vector.broadcast %206 : vector<1x128xf32> to vector<8x128xf32>
    %208 = arith.addf %204, %207 : vector<8x128xf32>
    %cst_163 = arith.constant 5.000000e-01 : f32
    %209 = vector.broadcast %cst_163 : f32 to vector<8x128xf32>
    %210 = arith.mulf %209, %208 : vector<8x128xf32>
    %cst_164 = arith.constant 4.471500e-02 : f32
    %211 = vector.broadcast %cst_164 : f32 to vector<8x128xf32>
    %212 = arith.mulf %211, %208 : vector<8x128xf32>
    %213 = arith.mulf %212, %208 : vector<8x128xf32>
    %214 = arith.mulf %213, %208 : vector<8x128xf32>
    %215 = arith.addf %208, %214 : vector<8x128xf32>
    %cst_165 = arith.constant 0.797884583 : f32
    %216 = vector.broadcast %cst_165 : f32 to vector<8x128xf32>
    %217 = arith.mulf %216, %215 : vector<8x128xf32>
    %218 = math.tanh %217 : vector<8x128xf32>
    %cst_166 = arith.constant 1.000000e+00 : f32
    %219 = vector.broadcast %cst_166 : f32 to vector<8x128xf32>
    %220 = arith.addf %219, %218 : vector<8x128xf32>
    %221 = arith.mulf %210, %220 : vector<8x128xf32>
    %222 = arith.truncf %221 : vector<8x128xf32> to vector<8x128xbf16>
    %c0_167 = arith.constant 0 : index
    %c0_168 = arith.constant 0 : index
    %c0_169 = arith.constant 0 : index
    %223 = vector.load %arg12[%c0_167, %c0_168, %c0_169] : memref<2x128x32xbf16, #tpu.memory_space<vmem>>, vector<1x128x32xbf16>
    %224 = vector.shape_cast %223 : vector<1x128x32xbf16> to vector<128x32xbf16>
    %cst_170 = arith.constant dense<0.000000e+00> : vector<8x32xf32>
    %225 = tpu.matmul %222, %224, %cst_170 {dimension_numbers = #tpu.dot_dimension_numbers<[1], [0], [0], [1], [0, 0, 1, 1], [], []>} : vector<8x128xbf16>, vector<128x32xbf16>, vector<8x32xf32> -> vector<8x32xf32>
    %c0_171 = arith.constant 0 : index
    %c0_172 = arith.constant 0 : index
    %c0_173 = arith.constant 0 : index
    %226 = vector.load %arg13[%c0_171, %c0_172, %c0_173] : memref<2x1x32xf32, #tpu.memory_space<vmem>>, vector<1x1x32xf32>
    %227 = vector.shape_cast %226 : vector<1x1x32xf32> to vector<1x32xf32>
    %228 = vector.broadcast %227 : vector<1x32xf32> to vector<8x32xf32>
    %229 = arith.addf %225, %228 : vector<8x32xf32>
    %230 = arith.addf %200, %229 : vector<8x32xf32>
    %c0_174 = arith.constant 0 : index
    %c0_175 = arith.constant 0 : index
    %c0_176 = arith.constant 0 : index
    %231 = vector.load %arg16[%c0_174, %c0_175, %c0_176] : memref<2x1x32xf32, #tpu.memory_space<vmem>>, vector<1x1x32xf32>
    %232 = vector.shape_cast %231 : vector<1x1x32xf32> to vector<1x32xf32>
    %c0_177 = arith.constant 0 : index
    %c0_178 = arith.constant 0 : index
    %c0_179 = arith.constant 0 : index
    %233 = vector.load %arg17[%c0_177, %c0_178, %c0_179] : memref<2x1x32xf32, #tpu.memory_space<vmem>>, vector<1x1x32xf32>
    %234 = vector.shape_cast %233 : vector<1x1x32xf32> to vector<1x32xf32>
    %cst_180 = arith.constant dense<0.000000e+00> : vector<8xf32>
    %235 = vector.multi_reduction <add>, %230, %cst_180 [1] : vector<8x32xf32> to vector<8xf32>
    %236 = vector.shape_cast %235 : vector<8xf32> to vector<8x1xf32>
    %cst_181 = arith.constant 3.200000e+01 : f32
    %237 = vector.broadcast %cst_181 : f32 to vector<8x1xf32>
    %238 = arith.divf %236, %237 : vector<8x1xf32>
    %239 = vector.broadcast %238 : vector<8x1xf32> to vector<8x32xf32>
    %240 = arith.subf %230, %239 : vector<8x32xf32>
    %241 = arith.mulf %240, %240 : vector<8x32xf32>
    %cst_182 = arith.constant dense<0.000000e+00> : vector<8xf32>
    %242 = vector.multi_reduction <add>, %241, %cst_182 [1] : vector<8x32xf32> to vector<8xf32>
    %243 = vector.shape_cast %242 : vector<8xf32> to vector<8x1xf32>
    %cst_183 = arith.constant 3.200000e+01 : f32
    %244 = vector.broadcast %cst_183 : f32 to vector<8x1xf32>
    %245 = arith.divf %243, %244 : vector<8x1xf32>
    %246 = vector.broadcast %238 : vector<8x1xf32> to vector<8x32xf32>
    %247 = arith.subf %230, %246 : vector<8x32xf32>
    %cst_184 = arith.constant 9.99999974E-6 : f32
    %248 = vector.broadcast %cst_184 : f32 to vector<8x1xf32>
    %249 = arith.addf %245, %248 : vector<8x1xf32>
    %250 = math.rsqrt %249 : vector<8x1xf32>
    %251 = vector.broadcast %250 : vector<8x1xf32> to vector<8x32xf32>
    %252 = arith.mulf %247, %251 : vector<8x32xf32>
    %253 = vector.broadcast %232 : vector<1x32xf32> to vector<8x32xf32>
    %254 = arith.mulf %252, %253 : vector<8x32xf32>
    %255 = vector.broadcast %234 : vector<1x32xf32> to vector<8x32xf32>
    %256 = arith.addf %254, %255 : vector<8x32xf32>
    %257 = arith.truncf %256 : vector<8x32xf32> to vector<8x32xbf16>
    %c1_185 = arith.constant 1 : index
    %c0_186 = arith.constant 0 : index
    %c0_187 = arith.constant 0 : index
    %c0_188 = arith.constant 0 : index
    %258 = vector.load %arg2[%c1_185, %c0_186, %c0_187, %c0_188] : memref<2x4x32x8xbf16, #tpu.memory_space<vmem>>, vector<1x1x32x8xbf16>
    %259 = vector.shape_cast %258 : vector<1x1x32x8xbf16> to vector<32x8xbf16>
    %cst_189 = arith.constant dense<0.000000e+00> : vector<8x8xf32>
    %260 = tpu.matmul %257, %259, %cst_189 {dimension_numbers = #tpu.dot_dimension_numbers<[1], [0], [0], [1], [0, 0, 1, 1], [], []>} : vector<8x32xbf16>, vector<32x8xbf16>, vector<8x8xf32> -> vector<8x8xf32>
    %c1_190 = arith.constant 1 : index
    %c0_191 = arith.constant 0 : index
    %c0_192 = arith.constant 0 : index
    %c0_193 = arith.constant 0 : index
    %261 = vector.load %arg5[%c1_190, %c0_191, %c0_192, %c0_193] : memref<2x4x1x8xf32, #tpu.memory_space<vmem>>, vector<1x1x1x8xf32>
    %262 = vector.shape_cast %261 : vector<1x1x1x8xf32> to vector<1x8xf32>
    %263 = vector.broadcast %262 : vector<1x8xf32> to vector<8x8xf32>
    %264 = arith.addf %260, %263 : vector<8x8xf32>
    %c1_194 = arith.constant 1 : index
    %c0_195 = arith.constant 0 : index
    %c0_196 = arith.constant 0 : index
    %c0_197 = arith.constant 0 : index
    %265 = vector.load %arg3[%c1_194, %c0_195, %c0_196, %c0_197] : memref<2x4x32x8xbf16, #tpu.memory_space<vmem>>, vector<1x1x32x8xbf16>
    %266 = vector.shape_cast %265 : vector<1x1x32x8xbf16> to vector<32x8xbf16>
    %cst_198 = arith.constant dense<0.000000e+00> : vector<8x8xf32>
    %267 = tpu.matmul %257, %266, %cst_198 {dimension_numbers = #tpu.dot_dimension_numbers<[1], [0], [0], [1], [0, 0, 1, 1], [], []>} : vector<8x32xbf16>, vector<32x8xbf16>, vector<8x8xf32> -> vector<8x8xf32>
    %c1_199 = arith.constant 1 : index
    %c0_200 = arith.constant 0 : index
    %c0_201 = arith.constant 0 : index
    %c0_202 = arith.constant 0 : index
    %268 = vector.load %arg6[%c1_199, %c0_200, %c0_201, %c0_202] : memref<2x4x1x8xf32, #tpu.memory_space<vmem>>, vector<1x1x1x8xf32>
    %269 = vector.shape_cast %268 : vector<1x1x1x8xf32> to vector<1x8xf32>
    %270 = vector.broadcast %269 : vector<1x8xf32> to vector<8x8xf32>
    %271 = arith.addf %267, %270 : vector<8x8xf32>
    %c1_203 = arith.constant 1 : index
    %c0_204 = arith.constant 0 : index
    %c0_205 = arith.constant 0 : index
    %c0_206 = arith.constant 0 : index
    %272 = vector.load %arg4[%c1_203, %c0_204, %c0_205, %c0_206] : memref<2x4x32x8xbf16, #tpu.memory_space<vmem>>, vector<1x1x32x8xbf16>
    %273 = vector.shape_cast %272 : vector<1x1x32x8xbf16> to vector<32x8xbf16>
    %cst_207 = arith.constant dense<0.000000e+00> : vector<8x8xf32>
    %274 = tpu.matmul %257, %273, %cst_207 {dimension_numbers = #tpu.dot_dimension_numbers<[1], [0], [0], [1], [0, 0, 1, 1], [], []>} : vector<8x32xbf16>, vector<32x8xbf16>, vector<8x8xf32> -> vector<8x8xf32>
    %c1_208 = arith.constant 1 : index
    %c0_209 = arith.constant 0 : index
    %c0_210 = arith.constant 0 : index
    %c0_211 = arith.constant 0 : index
    %275 = vector.load %arg7[%c1_208, %c0_209, %c0_210, %c0_211] : memref<2x4x1x8xf32, #tpu.memory_space<vmem>>, vector<1x1x1x8xf32>
    %276 = vector.shape_cast %275 : vector<1x1x1x8xf32> to vector<1x8xf32>
    %277 = vector.broadcast %276 : vector<1x8xf32> to vector<8x8xf32>
    %278 = arith.addf %274, %277 : vector<8x8xf32>
    %279 = arith.truncf %264 : vector<8x8xf32> to vector<8x8xbf16>
    %280 = arith.truncf %271 : vector<8x8xf32> to vector<8x8xbf16>
    %cst_212 = arith.constant dense<0.000000e+00> : vector<8x8xf32>
    %281 = tpu.matmul %279, %280, %cst_212 {dimension_numbers = #tpu.dot_dimension_numbers<[1], [1], [0], [0], [0, 0, 1, 0], [], []>} : vector<8x8xbf16>, vector<8x8xbf16>, vector<8x8xf32> -> vector<8x8xf32>
    %cst_213 = arith.constant dense<0xFF800000> : vector<8xf32>
    %282 = vector.multi_reduction <maximumf>, %281, %cst_213 [1] : vector<8x8xf32> to vector<8xf32>
    %283 = vector.shape_cast %282 : vector<8xf32> to vector<8x1xf32>
    %284 = vector.broadcast %283 : vector<8x1xf32> to vector<8x8xf32>
    %285 = arith.subf %281, %284 : vector<8x8xf32>
    %286 = math.exp %285 : vector<8x8xf32>
    %cst_214 = arith.constant dense<0.000000e+00> : vector<8xf32>
    %287 = vector.multi_reduction <add>, %286, %cst_214 [1] : vector<8x8xf32> to vector<8xf32>
    %288 = vector.shape_cast %287 : vector<8xf32> to vector<8x1xf32>
    %289 = arith.truncf %286 : vector<8x8xf32> to vector<8x8xbf16>
    %290 = arith.truncf %278 : vector<8x8xf32> to vector<8x8xbf16>
    %cst_215 = arith.constant dense<0.000000e+00> : vector<8x8xf32>
    %291 = tpu.matmul %289, %290, %cst_215 {dimension_numbers = #tpu.dot_dimension_numbers<[1], [0], [0], [1], [0, 0, 1, 1], [], []>} : vector<8x8xbf16>, vector<8x8xbf16>, vector<8x8xf32> -> vector<8x8xf32>
    %292 = tpu.reciprocal %288 {approx = true} : vector<8x1xf32> -> vector<8x1xf32>
    %293 = vector.broadcast %292 : vector<8x1xf32> to vector<8x8xf32>
    %294 = arith.mulf %291, %293 : vector<8x8xf32>
    %295 = arith.truncf %294 : vector<8x8xf32> to vector<8x8xbf16>
    %c1_216 = arith.constant 1 : index
    %c0_217 = arith.constant 0 : index
    %c0_218 = arith.constant 0 : index
    %c0_219 = arith.constant 0 : index
    %296 = vector.load %arg8[%c1_216, %c0_217, %c0_218, %c0_219] : memref<2x4x8x32xbf16, #tpu.memory_space<vmem>>, vector<1x1x8x32xbf16>
    %297 = vector.shape_cast %296 : vector<1x1x8x32xbf16> to vector<8x32xbf16>
    %cst_220 = arith.constant dense<0.000000e+00> : vector<8x32xf32>
    %298 = tpu.matmul %295, %297, %cst_220 {dimension_numbers = #tpu.dot_dimension_numbers<[1], [0], [0], [1], [0, 0, 1, 1], [], []>} : vector<8x8xbf16>, vector<8x32xbf16>, vector<8x32xf32> -> vector<8x32xf32>
    %c1_221 = arith.constant 1 : index
    %c1_222 = arith.constant 1 : index
    %c0_223 = arith.constant 0 : index
    %c0_224 = arith.constant 0 : index
    %299 = vector.load %arg2[%c1_221, %c1_222, %c0_223, %c0_224] : memref<2x4x32x8xbf16, #tpu.memory_space<vmem>>, vector<1x1x32x8xbf16>
    %300 = vector.shape_cast %299 : vector<1x1x32x8xbf16> to vector<32x8xbf16>
    %cst_225 = arith.constant dense<0.000000e+00> : vector<8x8xf32>
    %301 = tpu.matmul %257, %300, %cst_225 {dimension_numbers = #tpu.dot_dimension_numbers<[1], [0], [0], [1], [0, 0, 1, 1], [], []>} : vector<8x32xbf16>, vector<32x8xbf16>, vector<8x8xf32> -> vector<8x8xf32>
    %c1_226 = arith.constant 1 : index
    %c1_227 = arith.constant 1 : index
    %c0_228 = arith.constant 0 : index
    %c0_229 = arith.constant 0 : index
    %302 = vector.load %arg5[%c1_226, %c1_227, %c0_228, %c0_229] : memref<2x4x1x8xf32, #tpu.memory_space<vmem>>, vector<1x1x1x8xf32>
    %303 = vector.shape_cast %302 : vector<1x1x1x8xf32> to vector<1x8xf32>
    %304 = vector.broadcast %303 : vector<1x8xf32> to vector<8x8xf32>
    %305 = arith.addf %301, %304 : vector<8x8xf32>
    %c1_230 = arith.constant 1 : index
    %c1_231 = arith.constant 1 : index
    %c0_232 = arith.constant 0 : index
    %c0_233 = arith.constant 0 : index
    %306 = vector.load %arg3[%c1_230, %c1_231, %c0_232, %c0_233] : memref<2x4x32x8xbf16, #tpu.memory_space<vmem>>, vector<1x1x32x8xbf16>
    %307 = vector.shape_cast %306 : vector<1x1x32x8xbf16> to vector<32x8xbf16>
    %cst_234 = arith.constant dense<0.000000e+00> : vector<8x8xf32>
    %308 = tpu.matmul %257, %307, %cst_234 {dimension_numbers = #tpu.dot_dimension_numbers<[1], [0], [0], [1], [0, 0, 1, 1], [], []>} : vector<8x32xbf16>, vector<32x8xbf16>, vector<8x8xf32> -> vector<8x8xf32>
    %c1_235 = arith.constant 1 : index
    %c1_236 = arith.constant 1 : index
    %c0_237 = arith.constant 0 : index
    %c0_238 = arith.constant 0 : index
    %309 = vector.load %arg6[%c1_235, %c1_236, %c0_237, %c0_238] : memref<2x4x1x8xf32, #tpu.memory_space<vmem>>, vector<1x1x1x8xf32>
    %310 = vector.shape_cast %309 : vector<1x1x1x8xf32> to vector<1x8xf32>
    %311 = vector.broadcast %310 : vector<1x8xf32> to vector<8x8xf32>
    %312 = arith.addf %308, %311 : vector<8x8xf32>
    %c1_239 = arith.constant 1 : index
    %c1_240 = arith.constant 1 : index
    %c0_241 = arith.constant 0 : index
    %c0_242 = arith.constant 0 : index
    %313 = vector.load %arg4[%c1_239, %c1_240, %c0_241, %c0_242] : memref<2x4x32x8xbf16, #tpu.memory_space<vmem>>, vector<1x1x32x8xbf16>
    %314 = vector.shape_cast %313 : vector<1x1x32x8xbf16> to vector<32x8xbf16>
    %cst_243 = arith.constant dense<0.000000e+00> : vector<8x8xf32>
    %315 = tpu.matmul %257, %314, %cst_243 {dimension_numbers = #tpu.dot_dimension_numbers<[1], [0], [0], [1], [0, 0, 1, 1], [], []>} : vector<8x32xbf16>, vector<32x8xbf16>, vector<8x8xf32> -> vector<8x8xf32>
    %c1_244 = arith.constant 1 : index
    %c1_245 = arith.constant 1 : index
    %c0_246 = arith.constant 0 : index
    %c0_247 = arith.constant 0 : index
    %316 = vector.load %arg7[%c1_244, %c1_245, %c0_246, %c0_247] : memref<2x4x1x8xf32, #tpu.memory_space<vmem>>, vector<1x1x1x8xf32>
    %317 = vector.shape_cast %316 : vector<1x1x1x8xf32> to vector<1x8xf32>
    %318 = vector.broadcast %317 : vector<1x8xf32> to vector<8x8xf32>
    %319 = arith.addf %315, %318 : vector<8x8xf32>
    %320 = arith.truncf %305 : vector<8x8xf32> to vector<8x8xbf16>
    %321 = arith.truncf %312 : vector<8x8xf32> to vector<8x8xbf16>
    %cst_248 = arith.constant dense<0.000000e+00> : vector<8x8xf32>
    %322 = tpu.matmul %320, %321, %cst_248 {dimension_numbers = #tpu.dot_dimension_numbers<[1], [1], [0], [0], [0, 0, 1, 0], [], []>} : vector<8x8xbf16>, vector<8x8xbf16>, vector<8x8xf32> -> vector<8x8xf32>
    %cst_249 = arith.constant dense<0xFF800000> : vector<8xf32>
    %323 = vector.multi_reduction <maximumf>, %322, %cst_249 [1] : vector<8x8xf32> to vector<8xf32>
    %324 = vector.shape_cast %323 : vector<8xf32> to vector<8x1xf32>
    %325 = vector.broadcast %324 : vector<8x1xf32> to vector<8x8xf32>
    %326 = arith.subf %322, %325 : vector<8x8xf32>
    %327 = math.exp %326 : vector<8x8xf32>
    %cst_250 = arith.constant dense<0.000000e+00> : vector<8xf32>
    %328 = vector.multi_reduction <add>, %327, %cst_250 [1] : vector<8x8xf32> to vector<8xf32>
    %329 = vector.shape_cast %328 : vector<8xf32> to vector<8x1xf32>
    %330 = arith.truncf %327 : vector<8x8xf32> to vector<8x8xbf16>
    %331 = arith.truncf %319 : vector<8x8xf32> to vector<8x8xbf16>
    %cst_251 = arith.constant dense<0.000000e+00> : vector<8x8xf32>
    %332 = tpu.matmul %330, %331, %cst_251 {dimension_numbers = #tpu.dot_dimension_numbers<[1], [0], [0], [1], [0, 0, 1, 1], [], []>} : vector<8x8xbf16>, vector<8x8xbf16>, vector<8x8xf32> -> vector<8x8xf32>
    %333 = tpu.reciprocal %329 {approx = true} : vector<8x1xf32> -> vector<8x1xf32>
    %334 = vector.broadcast %333 : vector<8x1xf32> to vector<8x8xf32>
    %335 = arith.mulf %332, %334 : vector<8x8xf32>
    %336 = arith.truncf %335 : vector<8x8xf32> to vector<8x8xbf16>
    %c1_252 = arith.constant 1 : index
    %c1_253 = arith.constant 1 : index
    %c0_254 = arith.constant 0 : index
    %c0_255 = arith.constant 0 : index
    %337 = vector.load %arg8[%c1_252, %c1_253, %c0_254, %c0_255] : memref<2x4x8x32xbf16, #tpu.memory_space<vmem>>, vector<1x1x8x32xbf16>
    %338 = vector.shape_cast %337 : vector<1x1x8x32xbf16> to vector<8x32xbf16>
    %cst_256 = arith.constant dense<0.000000e+00> : vector<8x32xf32>
    %339 = tpu.matmul %336, %338, %cst_256 {dimension_numbers = #tpu.dot_dimension_numbers<[1], [0], [0], [1], [0, 0, 1, 1], [], []>} : vector<8x8xbf16>, vector<8x32xbf16>, vector<8x32xf32> -> vector<8x32xf32>
    %340 = arith.addf %298, %339 : vector<8x32xf32>
    %c1_257 = arith.constant 1 : index
    %c2_258 = arith.constant 2 : index
    %c0_259 = arith.constant 0 : index
    %c0_260 = arith.constant 0 : index
    %341 = vector.load %arg2[%c1_257, %c2_258, %c0_259, %c0_260] : memref<2x4x32x8xbf16, #tpu.memory_space<vmem>>, vector<1x1x32x8xbf16>
    %342 = vector.shape_cast %341 : vector<1x1x32x8xbf16> to vector<32x8xbf16>
    %cst_261 = arith.constant dense<0.000000e+00> : vector<8x8xf32>
    %343 = tpu.matmul %257, %342, %cst_261 {dimension_numbers = #tpu.dot_dimension_numbers<[1], [0], [0], [1], [0, 0, 1, 1], [], []>} : vector<8x32xbf16>, vector<32x8xbf16>, vector<8x8xf32> -> vector<8x8xf32>
    %c1_262 = arith.constant 1 : index
    %c2_263 = arith.constant 2 : index
    %c0_264 = arith.constant 0 : index
    %c0_265 = arith.constant 0 : index
    %344 = vector.load %arg5[%c1_262, %c2_263, %c0_264, %c0_265] : memref<2x4x1x8xf32, #tpu.memory_space<vmem>>, vector<1x1x1x8xf32>
    %345 = vector.shape_cast %344 : vector<1x1x1x8xf32> to vector<1x8xf32>
    %346 = vector.broadcast %345 : vector<1x8xf32> to vector<8x8xf32>
    %347 = arith.addf %343, %346 : vector<8x8xf32>
    %c1_266 = arith.constant 1 : index
    %c2_267 = arith.constant 2 : index
    %c0_268 = arith.constant 0 : index
    %c0_269 = arith.constant 0 : index
    %348 = vector.load %arg3[%c1_266, %c2_267, %c0_268, %c0_269] : memref<2x4x32x8xbf16, #tpu.memory_space<vmem>>, vector<1x1x32x8xbf16>
    %349 = vector.shape_cast %348 : vector<1x1x32x8xbf16> to vector<32x8xbf16>
    %cst_270 = arith.constant dense<0.000000e+00> : vector<8x8xf32>
    %350 = tpu.matmul %257, %349, %cst_270 {dimension_numbers = #tpu.dot_dimension_numbers<[1], [0], [0], [1], [0, 0, 1, 1], [], []>} : vector<8x32xbf16>, vector<32x8xbf16>, vector<8x8xf32> -> vector<8x8xf32>
    %c1_271 = arith.constant 1 : index
    %c2_272 = arith.constant 2 : index
    %c0_273 = arith.constant 0 : index
    %c0_274 = arith.constant 0 : index
    %351 = vector.load %arg6[%c1_271, %c2_272, %c0_273, %c0_274] : memref<2x4x1x8xf32, #tpu.memory_space<vmem>>, vector<1x1x1x8xf32>
    %352 = vector.shape_cast %351 : vector<1x1x1x8xf32> to vector<1x8xf32>
    %353 = vector.broadcast %352 : vector<1x8xf32> to vector<8x8xf32>
    %354 = arith.addf %350, %353 : vector<8x8xf32>
    %c1_275 = arith.constant 1 : index
    %c2_276 = arith.constant 2 : index
    %c0_277 = arith.constant 0 : index
    %c0_278 = arith.constant 0 : index
    %355 = vector.load %arg4[%c1_275, %c2_276, %c0_277, %c0_278] : memref<2x4x32x8xbf16, #tpu.memory_space<vmem>>, vector<1x1x32x8xbf16>
    %356 = vector.shape_cast %355 : vector<1x1x32x8xbf16> to vector<32x8xbf16>
    %cst_279 = arith.constant dense<0.000000e+00> : vector<8x8xf32>
    %357 = tpu.matmul %257, %356, %cst_279 {dimension_numbers = #tpu.dot_dimension_numbers<[1], [0], [0], [1], [0, 0, 1, 1], [], []>} : vector<8x32xbf16>, vector<32x8xbf16>, vector<8x8xf32> -> vector<8x8xf32>
    %c1_280 = arith.constant 1 : index
    %c2_281 = arith.constant 2 : index
    %c0_282 = arith.constant 0 : index
    %c0_283 = arith.constant 0 : index
    %358 = vector.load %arg7[%c1_280, %c2_281, %c0_282, %c0_283] : memref<2x4x1x8xf32, #tpu.memory_space<vmem>>, vector<1x1x1x8xf32>
    %359 = vector.shape_cast %358 : vector<1x1x1x8xf32> to vector<1x8xf32>
    %360 = vector.broadcast %359 : vector<1x8xf32> to vector<8x8xf32>
    %361 = arith.addf %357, %360 : vector<8x8xf32>
    %362 = arith.truncf %347 : vector<8x8xf32> to vector<8x8xbf16>
    %363 = arith.truncf %354 : vector<8x8xf32> to vector<8x8xbf16>
    %cst_284 = arith.constant dense<0.000000e+00> : vector<8x8xf32>
    %364 = tpu.matmul %362, %363, %cst_284 {dimension_numbers = #tpu.dot_dimension_numbers<[1], [1], [0], [0], [0, 0, 1, 0], [], []>} : vector<8x8xbf16>, vector<8x8xbf16>, vector<8x8xf32> -> vector<8x8xf32>
    %cst_285 = arith.constant dense<0xFF800000> : vector<8xf32>
    %365 = vector.multi_reduction <maximumf>, %364, %cst_285 [1] : vector<8x8xf32> to vector<8xf32>
    %366 = vector.shape_cast %365 : vector<8xf32> to vector<8x1xf32>
    %367 = vector.broadcast %366 : vector<8x1xf32> to vector<8x8xf32>
    %368 = arith.subf %364, %367 : vector<8x8xf32>
    %369 = math.exp %368 : vector<8x8xf32>
    %cst_286 = arith.constant dense<0.000000e+00> : vector<8xf32>
    %370 = vector.multi_reduction <add>, %369, %cst_286 [1] : vector<8x8xf32> to vector<8xf32>
    %371 = vector.shape_cast %370 : vector<8xf32> to vector<8x1xf32>
    %372 = arith.truncf %369 : vector<8x8xf32> to vector<8x8xbf16>
    %373 = arith.truncf %361 : vector<8x8xf32> to vector<8x8xbf16>
    %cst_287 = arith.constant dense<0.000000e+00> : vector<8x8xf32>
    %374 = tpu.matmul %372, %373, %cst_287 {dimension_numbers = #tpu.dot_dimension_numbers<[1], [0], [0], [1], [0, 0, 1, 1], [], []>} : vector<8x8xbf16>, vector<8x8xbf16>, vector<8x8xf32> -> vector<8x8xf32>
    %375 = tpu.reciprocal %371 {approx = true} : vector<8x1xf32> -> vector<8x1xf32>
    %376 = vector.broadcast %375 : vector<8x1xf32> to vector<8x8xf32>
    %377 = arith.mulf %374, %376 : vector<8x8xf32>
    %378 = arith.truncf %377 : vector<8x8xf32> to vector<8x8xbf16>
    %c1_288 = arith.constant 1 : index
    %c2_289 = arith.constant 2 : index
    %c0_290 = arith.constant 0 : index
    %c0_291 = arith.constant 0 : index
    %379 = vector.load %arg8[%c1_288, %c2_289, %c0_290, %c0_291] : memref<2x4x8x32xbf16, #tpu.memory_space<vmem>>, vector<1x1x8x32xbf16>
    %380 = vector.shape_cast %379 : vector<1x1x8x32xbf16> to vector<8x32xbf16>
    %cst_292 = arith.constant dense<0.000000e+00> : vector<8x32xf32>
    %381 = tpu.matmul %378, %380, %cst_292 {dimension_numbers = #tpu.dot_dimension_numbers<[1], [0], [0], [1], [0, 0, 1, 1], [], []>} : vector<8x8xbf16>, vector<8x32xbf16>, vector<8x32xf32> -> vector<8x32xf32>
    %382 = arith.addf %340, %381 : vector<8x32xf32>
    %c1_293 = arith.constant 1 : index
    %c3_294 = arith.constant 3 : index
    %c0_295 = arith.constant 0 : index
    %c0_296 = arith.constant 0 : index
    %383 = vector.load %arg2[%c1_293, %c3_294, %c0_295, %c0_296] : memref<2x4x32x8xbf16, #tpu.memory_space<vmem>>, vector<1x1x32x8xbf16>
    %384 = vector.shape_cast %383 : vector<1x1x32x8xbf16> to vector<32x8xbf16>
    %cst_297 = arith.constant dense<0.000000e+00> : vector<8x8xf32>
    %385 = tpu.matmul %257, %384, %cst_297 {dimension_numbers = #tpu.dot_dimension_numbers<[1], [0], [0], [1], [0, 0, 1, 1], [], []>} : vector<8x32xbf16>, vector<32x8xbf16>, vector<8x8xf32> -> vector<8x8xf32>
    %c1_298 = arith.constant 1 : index
    %c3_299 = arith.constant 3 : index
    %c0_300 = arith.constant 0 : index
    %c0_301 = arith.constant 0 : index
    %386 = vector.load %arg5[%c1_298, %c3_299, %c0_300, %c0_301] : memref<2x4x1x8xf32, #tpu.memory_space<vmem>>, vector<1x1x1x8xf32>
    %387 = vector.shape_cast %386 : vector<1x1x1x8xf32> to vector<1x8xf32>
    %388 = vector.broadcast %387 : vector<1x8xf32> to vector<8x8xf32>
    %389 = arith.addf %385, %388 : vector<8x8xf32>
    %c1_302 = arith.constant 1 : index
    %c3_303 = arith.constant 3 : index
    %c0_304 = arith.constant 0 : index
    %c0_305 = arith.constant 0 : index
    %390 = vector.load %arg3[%c1_302, %c3_303, %c0_304, %c0_305] : memref<2x4x32x8xbf16, #tpu.memory_space<vmem>>, vector<1x1x32x8xbf16>
    %391 = vector.shape_cast %390 : vector<1x1x32x8xbf16> to vector<32x8xbf16>
    %cst_306 = arith.constant dense<0.000000e+00> : vector<8x8xf32>
    %392 = tpu.matmul %257, %391, %cst_306 {dimension_numbers = #tpu.dot_dimension_numbers<[1], [0], [0], [1], [0, 0, 1, 1], [], []>} : vector<8x32xbf16>, vector<32x8xbf16>, vector<8x8xf32> -> vector<8x8xf32>
    %c1_307 = arith.constant 1 : index
    %c3_308 = arith.constant 3 : index
    %c0_309 = arith.constant 0 : index
    %c0_310 = arith.constant 0 : index
    %393 = vector.load %arg6[%c1_307, %c3_308, %c0_309, %c0_310] : memref<2x4x1x8xf32, #tpu.memory_space<vmem>>, vector<1x1x1x8xf32>
    %394 = vector.shape_cast %393 : vector<1x1x1x8xf32> to vector<1x8xf32>
    %395 = vector.broadcast %394 : vector<1x8xf32> to vector<8x8xf32>
    %396 = arith.addf %392, %395 : vector<8x8xf32>
    %c1_311 = arith.constant 1 : index
    %c3_312 = arith.constant 3 : index
    %c0_313 = arith.constant 0 : index
    %c0_314 = arith.constant 0 : index
    %397 = vector.load %arg4[%c1_311, %c3_312, %c0_313, %c0_314] : memref<2x4x32x8xbf16, #tpu.memory_space<vmem>>, vector<1x1x32x8xbf16>
    %398 = vector.shape_cast %397 : vector<1x1x32x8xbf16> to vector<32x8xbf16>
    %cst_315 = arith.constant dense<0.000000e+00> : vector<8x8xf32>
    %399 = tpu.matmul %257, %398, %cst_315 {dimension_numbers = #tpu.dot_dimension_numbers<[1], [0], [0], [1], [0, 0, 1, 1], [], []>} : vector<8x32xbf16>, vector<32x8xbf16>, vector<8x8xf32> -> vector<8x8xf32>
    %c1_316 = arith.constant 1 : index
    %c3_317 = arith.constant 3 : index
    %c0_318 = arith.constant 0 : index
    %c0_319 = arith.constant 0 : index
    %400 = vector.load %arg7[%c1_316, %c3_317, %c0_318, %c0_319] : memref<2x4x1x8xf32, #tpu.memory_space<vmem>>, vector<1x1x1x8xf32>
    %401 = vector.shape_cast %400 : vector<1x1x1x8xf32> to vector<1x8xf32>
    %402 = vector.broadcast %401 : vector<1x8xf32> to vector<8x8xf32>
    %403 = arith.addf %399, %402 : vector<8x8xf32>
    %404 = arith.truncf %389 : vector<8x8xf32> to vector<8x8xbf16>
    %405 = arith.truncf %396 : vector<8x8xf32> to vector<8x8xbf16>
    %cst_320 = arith.constant dense<0.000000e+00> : vector<8x8xf32>
    %406 = tpu.matmul %404, %405, %cst_320 {dimension_numbers = #tpu.dot_dimension_numbers<[1], [1], [0], [0], [0, 0, 1, 0], [], []>} : vector<8x8xbf16>, vector<8x8xbf16>, vector<8x8xf32> -> vector<8x8xf32>
    %cst_321 = arith.constant dense<0xFF800000> : vector<8xf32>
    %407 = vector.multi_reduction <maximumf>, %406, %cst_321 [1] : vector<8x8xf32> to vector<8xf32>
    %408 = vector.shape_cast %407 : vector<8xf32> to vector<8x1xf32>
    %409 = vector.broadcast %408 : vector<8x1xf32> to vector<8x8xf32>
    %410 = arith.subf %406, %409 : vector<8x8xf32>
    %411 = math.exp %410 : vector<8x8xf32>
    %cst_322 = arith.constant dense<0.000000e+00> : vector<8xf32>
    %412 = vector.multi_reduction <add>, %411, %cst_322 [1] : vector<8x8xf32> to vector<8xf32>
    %413 = vector.shape_cast %412 : vector<8xf32> to vector<8x1xf32>
    %414 = arith.truncf %411 : vector<8x8xf32> to vector<8x8xbf16>
    %415 = arith.truncf %403 : vector<8x8xf32> to vector<8x8xbf16>
    %cst_323 = arith.constant dense<0.000000e+00> : vector<8x8xf32>
    %416 = tpu.matmul %414, %415, %cst_323 {dimension_numbers = #tpu.dot_dimension_numbers<[1], [0], [0], [1], [0, 0, 1, 1], [], []>} : vector<8x8xbf16>, vector<8x8xbf16>, vector<8x8xf32> -> vector<8x8xf32>
    %417 = tpu.reciprocal %413 {approx = true} : vector<8x1xf32> -> vector<8x1xf32>
    %418 = vector.broadcast %417 : vector<8x1xf32> to vector<8x8xf32>
    %419 = arith.mulf %416, %418 : vector<8x8xf32>
    %420 = arith.truncf %419 : vector<8x8xf32> to vector<8x8xbf16>
    %c1_324 = arith.constant 1 : index
    %c3_325 = arith.constant 3 : index
    %c0_326 = arith.constant 0 : index
    %c0_327 = arith.constant 0 : index
    %421 = vector.load %arg8[%c1_324, %c3_325, %c0_326, %c0_327] : memref<2x4x8x32xbf16, #tpu.memory_space<vmem>>, vector<1x1x8x32xbf16>
    %422 = vector.shape_cast %421 : vector<1x1x8x32xbf16> to vector<8x32xbf16>
    %cst_328 = arith.constant dense<0.000000e+00> : vector<8x32xf32>
    %423 = tpu.matmul %420, %422, %cst_328 {dimension_numbers = #tpu.dot_dimension_numbers<[1], [0], [0], [1], [0, 0, 1, 1], [], []>} : vector<8x8xbf16>, vector<8x32xbf16>, vector<8x32xf32> -> vector<8x32xf32>
    %424 = arith.addf %382, %423 : vector<8x32xf32>
    %c1_329 = arith.constant 1 : index
    %c0_330 = arith.constant 0 : index
    %c0_331 = arith.constant 0 : index
    %425 = vector.load %arg9[%c1_329, %c0_330, %c0_331] : memref<2x1x32xf32, #tpu.memory_space<vmem>>, vector<1x1x32xf32>
    %426 = vector.shape_cast %425 : vector<1x1x32xf32> to vector<1x32xf32>
    %427 = vector.broadcast %426 : vector<1x32xf32> to vector<8x32xf32>
    %428 = arith.addf %424, %427 : vector<8x32xf32>
    %429 = arith.addf %256, %428 : vector<8x32xf32>
    %c1_332 = arith.constant 1 : index
    %c0_333 = arith.constant 0 : index
    %c0_334 = arith.constant 0 : index
    %430 = vector.load %arg14[%c1_332, %c0_333, %c0_334] : memref<2x1x32xf32, #tpu.memory_space<vmem>>, vector<1x1x32xf32>
    %431 = vector.shape_cast %430 : vector<1x1x32xf32> to vector<1x32xf32>
    %c1_335 = arith.constant 1 : index
    %c0_336 = arith.constant 0 : index
    %c0_337 = arith.constant 0 : index
    %432 = vector.load %arg15[%c1_335, %c0_336, %c0_337] : memref<2x1x32xf32, #tpu.memory_space<vmem>>, vector<1x1x32xf32>
    %433 = vector.shape_cast %432 : vector<1x1x32xf32> to vector<1x32xf32>
    %cst_338 = arith.constant dense<0.000000e+00> : vector<8xf32>
    %434 = vector.multi_reduction <add>, %429, %cst_338 [1] : vector<8x32xf32> to vector<8xf32>
    %435 = vector.shape_cast %434 : vector<8xf32> to vector<8x1xf32>
    %cst_339 = arith.constant 3.200000e+01 : f32
    %436 = vector.broadcast %cst_339 : f32 to vector<8x1xf32>
    %437 = arith.divf %435, %436 : vector<8x1xf32>
    %438 = vector.broadcast %437 : vector<8x1xf32> to vector<8x32xf32>
    %439 = arith.subf %429, %438 : vector<8x32xf32>
    %440 = arith.mulf %439, %439 : vector<8x32xf32>
    %cst_340 = arith.constant dense<0.000000e+00> : vector<8xf32>
    %441 = vector.multi_reduction <add>, %440, %cst_340 [1] : vector<8x32xf32> to vector<8xf32>
    %442 = vector.shape_cast %441 : vector<8xf32> to vector<8x1xf32>
    %cst_341 = arith.constant 3.200000e+01 : f32
    %443 = vector.broadcast %cst_341 : f32 to vector<8x1xf32>
    %444 = arith.divf %442, %443 : vector<8x1xf32>
    %445 = vector.broadcast %437 : vector<8x1xf32> to vector<8x32xf32>
    %446 = arith.subf %429, %445 : vector<8x32xf32>
    %cst_342 = arith.constant 9.99999974E-6 : f32
    %447 = vector.broadcast %cst_342 : f32 to vector<8x1xf32>
    %448 = arith.addf %444, %447 : vector<8x1xf32>
    %449 = math.rsqrt %448 : vector<8x1xf32>
    %450 = vector.broadcast %449 : vector<8x1xf32> to vector<8x32xf32>
    %451 = arith.mulf %446, %450 : vector<8x32xf32>
    %452 = vector.broadcast %431 : vector<1x32xf32> to vector<8x32xf32>
    %453 = arith.mulf %451, %452 : vector<8x32xf32>
    %454 = vector.broadcast %433 : vector<1x32xf32> to vector<8x32xf32>
    %455 = arith.addf %453, %454 : vector<8x32xf32>
    %456 = arith.truncf %455 : vector<8x32xf32> to vector<8x32xbf16>
    %c1_343 = arith.constant 1 : index
    %c0_344 = arith.constant 0 : index
    %c0_345 = arith.constant 0 : index
    %457 = vector.load %arg10[%c1_343, %c0_344, %c0_345] : memref<2x32x128xbf16, #tpu.memory_space<vmem>>, vector<1x32x128xbf16>
    %458 = vector.shape_cast %457 : vector<1x32x128xbf16> to vector<32x128xbf16>
    %cst_346 = arith.constant dense<0.000000e+00> : vector<8x128xf32>
    %459 = tpu.matmul %456, %458, %cst_346 {dimension_numbers = #tpu.dot_dimension_numbers<[1], [0], [0], [1], [0, 0, 1, 1], [], []>} : vector<8x32xbf16>, vector<32x128xbf16>, vector<8x128xf32> -> vector<8x128xf32>
    %c1_347 = arith.constant 1 : index
    %c0_348 = arith.constant 0 : index
    %c0_349 = arith.constant 0 : index
    %460 = vector.load %arg11[%c1_347, %c0_348, %c0_349] : memref<2x1x128xf32, #tpu.memory_space<vmem>>, vector<1x1x128xf32>
    %461 = vector.shape_cast %460 : vector<1x1x128xf32> to vector<1x128xf32>
    %462 = vector.broadcast %461 : vector<1x128xf32> to vector<8x128xf32>
    %463 = arith.addf %459, %462 : vector<8x128xf32>
    %cst_350 = arith.constant 5.000000e-01 : f32
    %464 = vector.broadcast %cst_350 : f32 to vector<8x128xf32>
    %465 = arith.mulf %464, %463 : vector<8x128xf32>
    %cst_351 = arith.constant 4.471500e-02 : f32
    %466 = vector.broadcast %cst_351 : f32 to vector<8x128xf32>
    %467 = arith.mulf %466, %463 : vector<8x128xf32>
    %468 = arith.mulf %467, %463 : vector<8x128xf32>
    %469 = arith.mulf %468, %463 : vector<8x128xf32>
    %470 = arith.addf %463, %469 : vector<8x128xf32>
    %cst_352 = arith.constant 0.797884583 : f32
    %471 = vector.broadcast %cst_352 : f32 to vector<8x128xf32>
    %472 = arith.mulf %471, %470 : vector<8x128xf32>
    %473 = math.tanh %472 : vector<8x128xf32>
    %cst_353 = arith.constant 1.000000e+00 : f32
    %474 = vector.broadcast %cst_353 : f32 to vector<8x128xf32>
    %475 = arith.addf %474, %473 : vector<8x128xf32>
    %476 = arith.mulf %465, %475 : vector<8x128xf32>
    %477 = arith.truncf %476 : vector<8x128xf32> to vector<8x128xbf16>
    %c1_354 = arith.constant 1 : index
    %c0_355 = arith.constant 0 : index
    %c0_356 = arith.constant 0 : index
    %478 = vector.load %arg12[%c1_354, %c0_355, %c0_356] : memref<2x128x32xbf16, #tpu.memory_space<vmem>>, vector<1x128x32xbf16>
    %479 = vector.shape_cast %478 : vector<1x128x32xbf16> to vector<128x32xbf16>
    %cst_357 = arith.constant dense<0.000000e+00> : vector<8x32xf32>
    %480 = tpu.matmul %477, %479, %cst_357 {dimension_numbers = #tpu.dot_dimension_numbers<[1], [0], [0], [1], [0, 0, 1, 1], [], []>} : vector<8x128xbf16>, vector<128x32xbf16>, vector<8x32xf32> -> vector<8x32xf32>
    %c1_358 = arith.constant 1 : index
    %c0_359 = arith.constant 0 : index
    %c0_360 = arith.constant 0 : index
    %481 = vector.load %arg13[%c1_358, %c0_359, %c0_360] : memref<2x1x32xf32, #tpu.memory_space<vmem>>, vector<1x1x32xf32>
    %482 = vector.shape_cast %481 : vector<1x1x32xf32> to vector<1x32xf32>
    %483 = vector.broadcast %482 : vector<1x32xf32> to vector<8x32xf32>
    %484 = arith.addf %480, %483 : vector<8x32xf32>
    %485 = arith.addf %455, %484 : vector<8x32xf32>
    %c1_361 = arith.constant 1 : index
    %c0_362 = arith.constant 0 : index
    %c0_363 = arith.constant 0 : index
    %486 = vector.load %arg16[%c1_361, %c0_362, %c0_363] : memref<2x1x32xf32, #tpu.memory_space<vmem>>, vector<1x1x32xf32>
    %487 = vector.shape_cast %486 : vector<1x1x32xf32> to vector<1x32xf32>
    %c1_364 = arith.constant 1 : index
    %c0_365 = arith.constant 0 : index
    %c0_366 = arith.constant 0 : index
    %488 = vector.load %arg17[%c1_364, %c0_365, %c0_366] : memref<2x1x32xf32, #tpu.memory_space<vmem>>, vector<1x1x32xf32>
    %489 = vector.shape_cast %488 : vector<1x1x32xf32> to vector<1x32xf32>
    %cst_367 = arith.constant dense<0.000000e+00> : vector<8xf32>
    %490 = vector.multi_reduction <add>, %485, %cst_367 [1] : vector<8x32xf32> to vector<8xf32>
    %491 = vector.shape_cast %490 : vector<8xf32> to vector<8x1xf32>
    %cst_368 = arith.constant 3.200000e+01 : f32
    %492 = vector.broadcast %cst_368 : f32 to vector<8x1xf32>
    %493 = arith.divf %491, %492 : vector<8x1xf32>
    %494 = vector.broadcast %493 : vector<8x1xf32> to vector<8x32xf32>
    %495 = arith.subf %485, %494 : vector<8x32xf32>
    %496 = arith.mulf %495, %495 : vector<8x32xf32>
    %cst_369 = arith.constant dense<0.000000e+00> : vector<8xf32>
    %497 = vector.multi_reduction <add>, %496, %cst_369 [1] : vector<8x32xf32> to vector<8xf32>
    %498 = vector.shape_cast %497 : vector<8xf32> to vector<8x1xf32>
    %cst_370 = arith.constant 3.200000e+01 : f32
    %499 = vector.broadcast %cst_370 : f32 to vector<8x1xf32>
    %500 = arith.divf %498, %499 : vector<8x1xf32>
    %501 = vector.broadcast %493 : vector<8x1xf32> to vector<8x32xf32>
    %502 = arith.subf %485, %501 : vector<8x32xf32>
    %cst_371 = arith.constant 9.99999974E-6 : f32
    %503 = vector.broadcast %cst_371 : f32 to vector<8x1xf32>
    %504 = arith.addf %500, %503 : vector<8x1xf32>
    %505 = math.rsqrt %504 : vector<8x1xf32>
    %506 = vector.broadcast %505 : vector<8x1xf32> to vector<8x32xf32>
    %507 = arith.mulf %502, %506 : vector<8x32xf32>
    %508 = vector.broadcast %487 : vector<1x32xf32> to vector<8x32xf32>
    %509 = arith.mulf %507, %508 : vector<8x32xf32>
    %510 = vector.broadcast %489 : vector<1x32xf32> to vector<8x32xf32>
    %511 = arith.addf %509, %510 : vector<8x32xf32>
    %512 = arith.truncf %511 : vector<8x32xf32> to vector<8x32xbf16>
    %c0_372 = arith.constant 0 : index
    %c0_373 = arith.constant 0 : index
    %513 = vector.load %arg18[%c0_372, %c0_373] : memref<32x128xbf16, #tpu.memory_space<vmem>>, vector<32x128xbf16>
    %cst_374 = arith.constant dense<0.000000e+00> : vector<8x128xf32>
    %514 = tpu.matmul %512, %513, %cst_374 {dimension_numbers = #tpu.dot_dimension_numbers<[1], [0], [0], [1], [0, 0, 1, 1], [], []>} : vector<8x32xbf16>, vector<32x128xbf16>, vector<8x128xf32> -> vector<8x128xf32>
    %c0_375 = arith.constant 0 : index
    %c0_376 = arith.constant 0 : index
    %515 = vector.load %arg19[%c0_375, %c0_376] : memref<1x128xf32, #tpu.memory_space<vmem>>, vector<1x128xf32>
    %516 = vector.broadcast %515 : vector<1x128xf32> to vector<8x128xf32>
    %517 = arith.addf %514, %516 : vector<8x128xf32>
    %c0_377 = arith.constant 0 : index
    %c0_378 = arith.constant 0 : index
    %c0_379 = arith.constant 0 : index
    %518 = vector.load %arg20[%c0_377, %c0_378, %c0_379] : memref<1x8x128xf32, #tpu.memory_space<vmem>>, vector<1x8x128xf32>
    %519 = vector.shape_cast %518 : vector<1x8x128xf32> to vector<8x128xf32>
    %520 = vector.shape_cast %517 : vector<8x128xf32> to vector<1x8x128xf32>
    tpu.vector_store %arg20[%c0_377, %c0_378, %c0_379], %520 {strides = array<i32>} : memref<1x8x128xf32, #tpu.memory_space<vmem>>, vector<1x8x128xf32>,
    return
  }
  func.func @transform_0(%arg0: i32) -> (i32, i32, i32) {
    %c0_i32 = arith.constant 0 : i32
    %c0_i32_0 = arith.constant 0 : i32
    %c0_i32_1 = arith.constant 0 : i32
    return %arg0, %c0_i32, %c0_i32_0 : i32, i32, i32
  }
  func.func @transform_1(%arg0: i32) -> (i32, i32, i32, i32) {
    %c0_i32 = arith.constant 0 : i32
    %c0_i32_0 = arith.constant 0 : i32
    %c0_i32_1 = arith.constant 0 : i32
    %c0_i32_2 = arith.constant 0 : i32
    %c0_i32_3 = arith.constant 0 : i32
    return %c0_i32, %c0_i32_0, %c0_i32_1, %c0_i32_2 : i32, i32, i32, i32
  }
  func.func @transform_2(%arg0: i32) -> (i32, i32, i32, i32) {
    %c0_i32 = arith.constant 0 : i32
    %c0_i32_0 = arith.constant 0 : i32
    %c0_i32_1 = arith.constant 0 : i32
    %c0_i32_2 = arith.constant 0 : i32
    %c0_i32_3 = arith.constant 0 : i32
    return %c0_i32, %c0_i32_0, %c0_i32_1, %c0_i32_2 : i32, i32, i32, i32
  }
  func.func @transform_3(%arg0: i32) -> (i32, i32, i32, i32) {
    %c0_i32 = arith.constant 0 : i32
    %c0_i32_0 = arith.constant 0 : i32
    %c0_i32_1 = arith.constant 0 : i32
    %c0_i32_2 = arith.constant 0 : i32
    %c0_i32_3 = arith.constant 0 : i32
    return %c0_i32, %c0_i32_0, %c0_i32_1, %c0_i32_2 : i32, i32, i32, i32
  }
  func.func @transform_4(%arg0: i32) -> (i32, i32, i32, i32) {
    %c0_i32 = arith.constant 0 : i32
    %c0_i32_0 = arith.constant 0 : i32
    %c0_i32_1 = arith.constant 0 : i32
    %c0_i32_2 = arith.constant 0 : i32
    %c0_i32_3 = arith.constant 0 : i32
    return %c0_i32, %c0_i32_0, %c0_i32_1, %c0_i32_2 : i32, i32, i32, i32
  }
  func.func @transform_5(%arg0: i32) -> (i32, i32, i32, i32) {
    %c0_i32 = arith.constant 0 : i32
    %c0_i32_0 = arith.constant 0 : i32
    %c0_i32_1 = arith.constant 0 : i32
    %c0_i32_2 = arith.constant 0 : i32
    %c0_i32_3 = arith.constant 0 : i32
    return %c0_i32, %c0_i32_0, %c0_i32_1, %c0_i32_2 : i32, i32, i32, i32
  }
  func.func @transform_6(%arg0: i32) -> (i32, i32, i32, i32) {
    %c0_i32 = arith.constant 0 : i32
    %c0_i32_0 = arith.constant 0 : i32
    %c0_i32_1 = arith.constant 0 : i32
    %c0_i32_2 = arith.constant 0 : i32
    %c0_i32_3 = arith.constant 0 : i32
    return %c0_i32, %c0_i32_0, %c0_i32_1, %c0_i32_2 : i32, i32, i32, i32
  }
  func.func @transform_7(%arg0: i32) -> (i32, i32, i32, i32) {
    %c0_i32 = arith.constant 0 : i32
    %c0_i32_0 = arith.constant 0 : i32
    %c0_i32_1 = arith.constant 0 : i32
    %c0_i32_2 = arith.constant 0 : i32
    %c0_i32_3 = arith.constant 0 : i32
    return %c0_i32, %c0_i32_0, %c0_i32_1, %c0_i32_2 : i32, i32, i32, i32
  }
  func.func @transform_8(%arg0: i32) -> (i32, i32, i32) {
    %c0_i32 = arith.constant 0 : i32
    %c0_i32_0 = arith.constant 0 : i32
    %c0_i32_1 = arith.constant 0 : i32
    %c0_i32_2 = arith.constant 0 : i32
    return %c0_i32, %c0_i32_0, %c0_i32_1 : i32, i32, i32
  }
  func.func @transform_9(%arg0: i32) -> (i32, i32, i32) {
    %c0_i32 = arith.constant 0 : i32
    %c0_i32_0 = arith.constant 0 : i32
    %c0_i32_1 = arith.constant 0 : i32
    %c0_i32_2 = arith.constant 0 : i32
    return %c0_i32, %c0_i32_0, %c0_i32_1 : i32, i32, i32
  }
  func.func @transform_10(%arg0: i32) -> (i32, i32, i32) {
    %c0_i32 = arith.constant 0 : i32
    %c0_i32_0 = arith.constant 0 : i32
    %c0_i32_1 = arith.constant 0 : i32
    %c0_i32_2 = arith.constant 0 : i32
    return %c0_i32, %c0_i32_0, %c0_i32_1 : i32, i32, i32
  }
  func.func @transform_11(%arg0: i32) -> (i32, i32, i32) {
    %c0_i32 = arith.constant 0 : i32
    %c0_i32_0 = arith.constant 0 : i32
    %c0_i32_1 = arith.constant 0 : i32
    %c0_i32_2 = arith.constant 0 : i32
    return %c0_i32, %c0_i32_0, %c0_i32_1 : i32, i32, i32
  }
  func.func @transform_12(%arg0: i32) -> (i32, i32, i32) {
    %c0_i32 = arith.constant 0 : i32
    %c0_i32_0 = arith.constant 0 : i32
    %c0_i32_1 = arith.constant 0 : i32
    %c0_i32_2 = arith.constant 0 : i32
    return %c0_i32, %c0_i32_0, %c0_i32_1 : i32, i32, i32
  }
  func.func @transform_13(%arg0: i32) -> (i32, i32, i32) {
    %c0_i32 = arith.constant 0 : i32
    %c0_i32_0 = arith.constant 0 : i32
    %c0_i32_1 = arith.constant 0 : i32
    %c0_i32_2 = arith.constant 0 : i32
    return %c0_i32, %c0_i32_0, %c0_i32_1 : i32, i32, i32
  }
  func.func @transform_14(%arg0: i32) -> (i32, i32, i32) {
    %c0_i32 = arith.constant 0 : i32
    %c0_i32_0 = arith.constant 0 : i32
    %c0_i32_1 = arith.constant 0 : i32
    %c0_i32_2 = arith.constant 0 : i32
    return %c0_i32, %c0_i32_0, %c0_i32_1 : i32, i32, i32
  }
  func.func @transform_15(%arg0: i32) -> (i32, i32, i32) {
    %c0_i32 = arith.constant 0 : i32
    %c0_i32_0 = arith.constant 0 : i32
    %c0_i32_1 = arith.constant 0 : i32
    %c0_i32_2 = arith.constant 0 : i32
    return %c0_i32, %c0_i32_0, %c0_i32_1 : i32, i32, i32
  }
  func.func @transform_16(%arg0: i32) -> (i32, i32, i32) {
    %c0_i32 = arith.constant 0 : i32
    %c0_i32_0 = arith.constant 0 : i32
    %c0_i32_1 = arith.constant 0 : i32
    %c0_i32_2 = arith.constant 0 : i32
    return %c0_i32, %c0_i32_0, %c0_i32_1 : i32, i32, i32
  }
  func.func @transform_17(%arg0: i32) -> (i32, i32) {
    %c0_i32 = arith.constant 0 : i32
    %c0_i32_0 = arith.constant 0 : i32
    %c0_i32_1 = arith.constant 0 : i32
    return %c0_i32, %c0_i32_0 : i32, i32
  }
  func.func @transform_18(%arg0: i32) -> (i32, i32) {
    %c0_i32 = arith.constant 0 : i32
    %c0_i32_0 = arith.constant 0 : i32
    %c0_i32_1 = arith.constant 0 : i32
    return %c0_i32, %c0_i32_0 : i32, i32
  }
  func.func @transform_19(%arg0: i32) -> (i32, i32, i32) {
    %c0_i32 = arith.constant 0 : i32
    %c0_i32_0 = arith.constant 0 : i32
    %c0_i32_1 = arith.constant 0 : i32
    return %arg0, %c0_i32, %c0_i32_0 : i32, i32, i32
  }
}

</mosaic_0001>

<bundles_post_ra>
// kernel: tpu_custom_call.1
= control target key start
LH: loop header
LB: loop body
LE: loop exit
PB: predicated region body
PF: predicated region fallthrough
CT: control target
= control target key end

     0   :  { %s6051_s0 = inlined_call_operand.vmem [shape: f32[2,8,32], index: 0, kind: input, shape index: {}]   ;;  %s6052_s1 = inlined_call_operand.vmem [shape: bf16[2,4,32,8], index: 1, kind: input, shape index: {}]   ;;  %s6053_s2 = inlined_call_operand.vmem [shape: bf16[2,4,32,8], index: 2, kind: input, shape index: {}]   ;;  %s6054_s3 = inlined_call_operand.vmem [shape: bf16[2,4,32,8], index: 3, kind: input, shape index: {}]   ;;  %s6055_s4 = inlined_call_operand.vmem [shape: f32[2,4,1,8], index: 4, kind: input, shape index: {}]   ;;  %s6056_s5 = inlined_call_operand.vmem [shape: f32[2,4,1,8], index: 5, kind: input, shape index: {}]   ;;  %s6057_s6 = inlined_call_operand.vmem [shape: f32[2,4,1,8], index: 6, kind: input, shape index: {}]   ;;  %s6058_s7 = inlined_call_operand.vmem [shape: bf16[2,4,8,32], index: 7, kind: input, shape index: {}]   ;;  %s6059_s8 = inlined_call_operand.vmem [shape: f32[2,1,32], index: 8, kind: input, shape index: {}]   ;;  %s6060_s9 = inlined_call_operand.vmem [shape: bf16[2,32,128], index: 9, kind: input, shape index: {}]   ;;  %s6061_s10 = inlined_call_operand.vmem [shape: f32[2,1,128], index: 10, kind: input, shape index: {}]   ;;  %s6062_s11 = inlined_call_operand.vmem [shape: bf16[2,128,32], index: 11, kind: input, shape index: {}]   ;;  %s6063_s12 = inlined_call_operand.vmem [shape: f32[2,1,32], index: 12, kind: input, shape index: {}]   ;;  %s6064_s13 = inlined_call_operand.vmem [shape: f32[2,1,32], index: 13, kind: input, shape index: {}]   ;;  %s6065_s14 = inlined_call_operand.vmem [shape: f32[2,1,32], index: 14, kind: input, shape index: {}]   ;;  %s6066_s15 = inlined_call_operand.vmem [shape: f32[2,1,32], index: 15, kind: input, shape index: {}]   ;;  %s6067_s16 = inlined_call_operand.vmem [shape: f32[2,1,32], index: 16, kind: input, shape index: {}]   ;;  %s6068_s17 = inlined_call_operand.vmem [shape: bf16[32,128], index: 17, kind: input, shape index: {}]   ;;  %s6069_s18 = inlined_call_operand.vmem [shape: f32[1,128], index: 18, kind: input, shape index: {}]   ;;  %s6070_s19 = inlined_call_operand.hbm [shape: f32[2,8,128], index: 19, kind: output, shape index: {}]  }
   0x1   :  { %6082 = sst [smem:[#allocation11_spill]] %s6051_s0 }
   0x2   :  { %6083 = sst [smem:[#allocation12_spill]] %s6052_s1 }
   0x3   :  { %6084 = sst [smem:[#allocation13_spill]] %s6053_s2 }
   0x4   :  { %6085 = sst [smem:[#allocation14_spill]] %s6054_s3 }
   0x5   :  { %6086 = sst [smem:[#allocation15_spill]] %s6070_s19 }
   0x6   :  { %24 = vsyncpa [#allocation3], 0 }
   0x7   :  { %26 = vsyncpa [#allocation3 + $0x1], 0  ;;  %s5257_s0 = smov 0   ;;  %s5259_s30 = smov 0  }
   0x8   :  { %s5261_s20 = smov 0   ;;  %s5263_s21 = smov 0  }
   0x9 LB: > { %6087 = sst [smem:[#allocation5_spill]] %s5140_s0  ;;  %s5278_s1 = sadd.s32 4294967295, %s5152_s21   ;;  %s5152_s21 = sphi %s5263_s21, %s6105_s21   ;;  %s5148_s20 = sphi %s5261_s20, %s6107_s20   ;;  %s5144_s30 = sphi %s5259_s30, %s6109_s30   ;;  %s5140_s0 = sphi %s5257_s0, %s6108_s0  }
   0xa   : > { %6088 = sst [smem:[#allocation6_spill]] %s5148_s20  ;;  %s4079_s22 = sadd.s32 4294967294, %s5152_s21  }
   0xb   : > { %6089 = sst [smem:[#allocation7_spill]] %s5152_s21  ;;  %s5282_s2 = sadd.s32 1, %s5152_s21  }
   0xc   : > { %6090 = sst [smem:[#allocation8_spill]] %s5282_s2  ;;  %s443_s23 = sadd.s32 1, %s5148_s20 }
   0xd   : > { %s440_s24 = ssub.s32 %s5152_s21, %s5282_s2  ;;  %p453_p0 = scmp.ne.s32.totalorder %s5148_s20, %s5144_s30 }
   0xe   : > { %p441_p1 = scmp.eq.s32.totalorder %s440_s24, 0  ;;  %p454_p2 = scmp.eq.s32.totalorder %s5278_s1, 1 }
   0xf   : > { %p459_p3 = scmp.ne.s32.totalorder %s5144_s30, %s5140_s0  ;;  %p460_p4 = scmp.eq.s32.totalorder %s4079_s22, 1 }
  0x10   : > { %s5293_s25 = scalar_select %p441_p1, %s5148_s20, %s443_s23  }
  0x11   : > { %p5295_p5 = por %p454_p2, %p453_p0  ;;  %p5299_p6 = por %p460_p4, %p459_p3 }
  0x12   : > { %6091 = sst [smem:[#allocation9_spill]] %s5293_s25  ;;  %p4082_p7 = scmp.ge.s32.totalorder %s5152_s21, 1 }
  0x13   : > { %s6093_s26 = scalar_select %p5299_p6, 1, 0 }
  0x14   : > { %p539_p8 = scmp.lt.s32.totalorder %s5152_s21, 3 }
  0x15   : > { %6094 = sst [smem:[#allocation10_spill]] %s6093_s26 }
  0x16   : > { %p540_p9 = pnand %p4082_p7, %p539_p8 }
  0x17   : > { %s6095_s29 = sld [smem:[#allocation12_spill]] (!%p540_p9)  ;;  %v5154_v1 = vmov (!%p540_p9), 0.0   ;;  %vm5155_vm0 = vmmov (!%p540_p9), 0   ;;  %p594_p10 = scmp.lt.s32.totalorder (!%p540_p9), %s5278_s1, 1  ;;  %vm624_vm1 = vcmask (!%p540_p9), 261120   ;;  %vm796_vm2 = vcmask (!%p540_p9), 64512  }
  0x18   : > { %543 = sbr.rel (%p540_p9) target bundleno = 8988 (0x231c), region = 96  ;;  %4535 = vmatprep.subr.bf16.mxu1 (!%p540_p9), %v5154_v1  ;;  %4551 = vmatprep.subr.bf16.mxu0 (!%p540_p9), %v5154_v1  ;;  %s6096_s20 = sld [smem:[#allocation13_spill]] (!%p540_p9)  ;;  %v4089_v13 = vld [vmem:[%s6056_s5] ss:$0 sm:$0xff] (!%p540_p9)  ;;  %vm857_vm3 = vcmask (!%p540_p9), 1043456  }
  0x19   : > { %4539 = vmatprep.mubr.msk.bf16.mxu1 (!%p540_p9), %vm5155_vm0, %v5154_v1  ;;  %4555 = vmatprep.mubr.msk.bf16.mxu0 (!%p540_p9), %vm5155_vm0, %v5154_v1  ;;  %s6098_s23 = sld [smem:[#allocation11_spill]] (!%p540_p9)  ;;  %v4085_v20 = vld [vmem:[%s6055_s4] ss:$0 sm:$0xff] (!%p540_p9)  ;;  %v4113_v57 = vld [vmem:[%s6056_s5 + $0x1] ss:$0 sm:$0xff] (!%p540_p9)  ;;  %s6101_s26 = sld [smem:[#allocation15_spill]] (!%p540_p9) }
  0x1a   : > { %v4093_v29 = vld [vmem:[%s6057_s6] ss:$0 sm:$0xff] (!%p540_p9)  ;;  %v4104_v62 = vld [vmem:[%s6055_s4 + $0x1] ss:$0 sm:$0xff] (!%p540_p9) }
  0x1d   : > { %v4976_v0 = vld [vmem:[%s6095_s29] sm:$0xff] (!%p540_p9)   ;;  %v4977_v2 = vld [vmem:[%s6095_s29 + $0x8] sm:$0xff] (!%p540_p9)   ;;  %v4984_v37 = vld [vmem:[%s6095_s29 + $0x10] sm:$0xff] (!%p540_p9)  }
  0x1e   : > { %4536 = vmatpush3.bf16.msra.mxu1 (!%p540_p9), %v4976_v0  ;;  %s6097_s2 = smov (!%p540_p9), %s6096_s20  ;;  %v4978_v3 = vld [vmem:[%s6096_s20] sm:$0xff] (!%p540_p9)   ;;  %s6099_s20 = sld [smem:[#allocation14_spill]] (!%p540_p9)  ;;  %v4985_v38 = vld [vmem:[%s6095_s29 + $0x18] sm:$0xff] (!%p540_p9)  }
  0x1f   : > { %4537 = vmatprep.subr.bf16.mxu1 %v5154_v1  ;;  %s595_s24 = scalar_select %p594_p10, %s5278_s1, 1  ;;  %v4979_v6 = vld [vmem:[%s6097_s2 + $0x8] sm:$0xff]   ;;  %v4982_v43 = vld [vmem:[%s6097_s2 + $0x10] sm:$0xff]   ;;  %v4983_v46 = vld [vmem:[%s6097_s2 + $0x18] sm:$0xff]  }
  0x21   : > { %s4084_s27 = sshll.u32 %s595_s24, 3  ;;  %s591_s24 = sand.u32 1, %s5144_s30  }
  0x22   : > { %4538 = vmatpush3.bf16.msra.mxu1 %v4977_v2  ;;  %s597_s0 = scalar_lea.vmem %s6098_s23, %s4084_s27  ;;  %s4083_s27 = sshll.u32 %s591_s24, 3 }
  0x23   : > { %4543 = vmatprep.subr.bf16.mxu1 %v5154_v1  ;;  %v5327_v4 = vld [vmem:[%s597_s0] sm:$0xff]  ;;  %s4385_s23 = sshll.u32 %s5278_s1, 7  ;;  %s593_s19 = scalar_lea.vmem [#allocation2], %s4083_s27 }
  0x24   : > { %v5331_v5 = vpack.c.bf16 %v5327_v4, %v5327_v4  ;;  %s6100_s25 = smov %s6099_s20  ;;  %v4980_v7 = vld [vmem:[%s6099_s20] sm:$0xff]   ;;  %s4020_s0 = sshll.u32 %s593_s19, 4  ;;  %s6011_s0 = int_to_ptr.vmem [resolvable:$true] %s4020_s0 }
  0x25   : > { %4552 = vmatpush3.bf16.msra.mxu0 %v4980_v7  ;;  %v4981_v8 = vld [vmem:[%s6100_s25 + $0x8] sm:$0xff]   ;;  %v4986_v51 = vld [vmem:[%s6100_s25 + $0x10] sm:$0xff]   ;;  %v4987_v52 = vld [vmem:[%s6100_s25 + $0x18] sm:$0xff]   ;;  %s4007_s28 = scalar_lea.sflag [#allocation3], %s591_s24  ;;  %s5090_s1 = scalar_lea.vmem %s6011_s0, 128 }
  0x26   : > { %4540 = vmatmul.mubr.msk.bf16.vlgmr.msra.gmra.mrb[0].mxu1 %vm624_vm1, %v5331_v5  ;;  %4553 = vmatprep.subr.bf16.mxu0 %v5154_v1  ;;  %p5091_p11 = scmp.ne.s32.totalorder %s6011_s0, %s5090_s1  ;;  %s5156_s27 = smov [#allocation2]  }
  0x27   : > { %4544 = vmatpush3.bf16.msra.mxu1 %v4978_v3  ;;  %4547 = vmatprep.mubr.msk.bf16.mxu1 %vm5155_vm0, %v5154_v1  ;;  %s5094_s22 = sshll.u32 %s5156_s27, 4  ;;  %s5095_s22 = int_to_ptr.vmem [resolvable:$false] %s5094_s22 }
  0x28   : > { %4545 = vmatprep.subr.bf16.mxu1 %v5154_v1  ;;  %p5092_p12 = pnand %p5091_p11, %p5295_p5  ;;  %s5096_s20 = scalar_lea.vmem %s5095_s22, 256 }
  0x29   : > { %4554 = vmatpush3.bf16.msra.mxu0 %v4981_v8  ;;  %p5097_p0 = scmp.lt.s32.totalorder %s6011_s0, %s5095_s22  ;;  %p5098_p1 = scmp.lt.s32.totalorder %s5096_s20, %s5090_s1 }
  0x2a   : > { %4565 = vmatprep.subr.bf16.mxu0 %v5154_v1  ;;  %p5093_p13 = pneg %p5092_p12 }
  0x2b   : > { %4546 = vmatpush3.bf16.msra.mxu1 %v4979_v6  ;;  %p5099_p2 = por %p5098_p1, %p5097_p0 }
  0x2c   : > { %4559 = vmatprep.subr.bf16.mxu1 %v5154_v1  ;;  %4556 = vmatmul.mubr.msk.bf16.vlgmr.msra.gmra.mrb[0].mxu0 %vm624_vm1, %v5331_v5 }
  0x2d   : > { %4567 = vmatprep.mubr.msk.bf16.mxu0 %vm5155_vm0, %v5154_v1  ;;  %p5100_p3 = pnand %p5099_p2, %p5093_p13 }
  0x2e   : > { %4548 = vmatmul.mubr.msk.bf16.vlgmr.msra.gmra.mrb[4].mxu1 %vm624_vm1, %v5331_v5 }
  0x2f   : > { %4561 = vmatprep.mubr.msk.bf16.mxu1 %vm5155_vm0, %v5154_v1 }
  0xf9   : > { %v662_v9 = vpop.f32.mrb[0].mxu1 }
  0xfa   : > { %v4541_v10 = vpop.f32.mrb[1].mxu1  ;;  %v663_v22 = vadd.f32 %v4085_v20, %v662_v9 }
  0xfb   : > { %v665_v11 = vpop.f32.mrb[2].mxu1 }
  0xfc   : > { %v4542_v12 = vpop.f32.mrb[3].mxu1  ;;  %v794_v23 = vpack.c.bf16 %v663_v22, %v663_v22 }
  0xfd   : > { %v4122_v12 = vld [vmem:[%s6057_s6 + $0x1] ss:$0 sm:$0xff] }
  0xff   : > { %v788_v30 = vpop.f32.mrb[0].mxu0 }
 0x100   : > { %v789_v31 = vadd.f32 %v4093_v29, %v788_v30  ;;  %v4557_v32 = vpop.f32.mrb[1].mxu0 }
 0x101   : > { %v725_v14 = vpop.f32.mrb[4].mxu1  ;;  %v791_v33 = vpop.f32.mrb[2].mxu0  ;;  %v4988_v32 = vld [vmem:[%s6097_s2 + $0x20] sm:$0xff]  }
 0x102   : > { %v726_v15 = vadd.f32 %v4089_v13, %v725_v14  ;;  %v4549_v16 = vpop.f32.mrb[5].mxu1  ;;  %v853_v34 = vpack.c.bf16 %v789_v31, %v789_v31  ;;  %v4558_v35 = vpop.f32.mrb[3].mxu0  ;;  %v4128_v33 = vld [vmem:[%s6058_s7 + $0x4] sm:$0xf] }
 0x103   : > { %v728_v17 = vpop.f32.mrb[6].mxu1  ;;  %v4989_v35 = vld [vmem:[%s6097_s2 + $0x28] sm:$0xff]  }
 0x104   : > { %v795_v18 = vpack.c.bf16 %v726_v15, %v726_v15  ;;  %v4550_v19 = vpop.f32.mrb[7].mxu1  ;;  %v859_v36 = vsel %vm857_vm3, %v853_v34, 0  ;;  %v1214_v34 = vsel %vm857_vm3, %v4128_v33, 0  ;;  %v4997_v33 = vld [vmem:[%s6095_s29 + $0x38] sm:$0xff]  }
 0x105   : > { %4566 = vmatpush3.bf16.msra.mxu0 %v859_v36 }
 0x106   : > { %v801_v21 = vsel %vm796_vm2, %v795_v18, 0  ;;  %4579 = vmatprep.subr.bf16.mxu0 %v5154_v1 }
 0x107   : > { %4560 = vmatpush3.bf16.xpose.msra.mxu1 %v801_v21 }
 0x108   : > { %4571 = vmatprep.subr.bf16.mxu1 %v5154_v1 }
 0x10e   : > { %4562 = vmatmul.mubr.msk.bf16.vlgmr.msra.gmra.mrb[8].mxu1 %vm796_vm2, %v794_v23 }
 0x10f   : > { %4575 = vmatprep.mubr.msk.bf16.mxu1 %vm5155_vm0, %v5154_v1  ;;  %4572 = vmatpush3.bf16.msra.mxu1 %v4984_v37 }
 0x110   : > { %4573 = vmatprep.subr.bf16.mxu1 %v5154_v1 }
 0x113   : > { %4574 = vmatpush3.bf16.msra.mxu1 %v4985_v38 }
 0x114   : > { %4587 = vmatprep.subr.bf16.mxu1 %v5154_v1 }
 0x116   : > { %4576 = vmatmul.mubr.msk.bf16.vlgmr.msra.gmra.mrb[12].mxu1 %vm624_vm1, %v5331_v5 }
 0x117   : > { %4591 = vmatprep.mubr.msk.bf16.mxu1 %vm5155_vm0, %v5154_v1  ;;  %4588 = vmatpush3.bf16.msra.mxu1 %v4986_v51 }
 0x118   : > { %4589 = vmatprep.subr.bf16.mxu1 %v5154_v1 }
 0x11b   : > { %4590 = vmatpush3.bf16.msra.mxu1 %v4987_v52 }
 0x11c   : > { %4601 = vmatprep.subr.bf16.mxu1 %v5154_v1 }
 0x11e   : > { %4592 = vmatmul.mubr.msk.bf16.vlgmr.msra.gmra.mrb[16].mxu1 %vm624_vm1, %v5331_v5 }
 0x11f   : > { %4603 = vmatprep.mubr.msk.bf16.mxu1 %vm5155_vm0, %v5154_v1 }
 0x1e1   : > { %v837_v24 = vpop.f32.mrb[8].mxu1 }
 0x1e2   : > { %v4563_v25 = vpop.f32.mrb[9].mxu1  ;;  %v843_v26 = vsel %vm796_vm2, %v837_v24, -inf }
 0x1e3   : > { %844 = vmax.xlane.f32.xlu0 %v843_v26  ;;  %v840_v27 = vpop.f32.mrb[10].mxu1 }
 0x1e4   : > { %v4564_v28 = vpop.f32.mrb[11].mxu1 }
 0x1e9   : > { %v964_v47 = vpop.f32.mrb[12].mxu1 }
 0x1ea   : > { %v4577_v48 = vpop.f32.mrb[13].mxu1  ;;  %v965_v3 = vadd.f32 %v4104_v62, %v964_v47 }
 0x1eb   : > { %v967_v49 = vpop.f32.mrb[14].mxu1 }
 0x1ec   : > { %v4578_v50 = vpop.f32.mrb[15].mxu1  ;;  %v1100_v6 = vpack.c.bf16 %v965_v3, %v965_v3 }
 0x1ed   : > { %v4145_v50 = vld [vmem:[%s6056_s5 + $0x2] ss:$0 sm:$0xff] }
 0x1f1   : > { %v1094_v13 = vpop.f32.mrb[16].mxu1 }
 0x1f2   : > { %v1095_v14 = vadd.f32 %v4122_v12, %v1094_v13  ;;  %v4593_v15 = vpop.f32.mrb[17].mxu1 }
 0x1f3   : > { %v1097_v16 = vpop.f32.mrb[18].mxu1 }
 0x1f4   : > { %v1158_v17 = vpack.c.bf16 %v1095_v14, %v1095_v14  ;;  %v4594_v18 = vpop.f32.mrb[19].mxu1  ;;  %v4154_v16 = vld [vmem:[%s6057_s6 + $0x2] ss:$0 sm:$0xff] }
 0x1f6   : > { %v1163_v19 = vsel %vm857_vm3, %v1158_v17, 0 }
 0x1f7   : > { %4602 = vmatpush3.bf16.msra.mxu1 %v1163_v19 }
 0x1f8   : > { %4613 = vmatprep.subr.bf16.mxu1 %v5154_v1 }
 0x270   : > { %v845_v39 = vpop.xlane.xlu0 %844 }
 0x271   : > { %v846_v40 = vsub.f32 %v837_v24, %v845_v39  ;;  %v904_v24 = vld [vmem:[%s6058_s7] sm:$0xf] }
 0x272   : > { %v1260_v28 = vsel %vm857_vm3, %v904_v24, 0 }
 0x273   : > { %v847_v41 = vmul.f32 1.442695, %v846_v40 }
 0x275   : > { %5046 = vpow2.f32 %v847_v41 }
 0x27f   : > { %v5047_v42 = vpop.eup %5046 }
 0x280   : > { %v849_v44 = vsel %vm796_vm2, %v5047_v42, 0.0  ;;  %v852_v45 = vpack.c.bf16 %v5047_v42, %v5047_v42  ;;  %v4990_v42 = vld [vmem:[%s6095_s29 + $0x20] sm:$0xff]  }
 0x281   : > { %850 = vadd.xlane.f32.xlu1 %v849_v44 }
 0x282   : > { %4568 = vmatmul.mubr.msk.bf16.vlgmr.msra.gmra.mrb[4].mxu0 %vm796_vm2, %v852_v45  ;;  %v4991_v45 = vld [vmem:[%s6095_s29 + $0x28] sm:$0xff]  }
 0x283   : > { %4580 = vmatpush3.bf16.msra.mxu0 %v4982_v43  ;;  %4583 = vmatprep.mubr.msk.bf16.mxu0 %vm5155_vm0, %v5154_v1 }
 0x284   : > { %4581 = vmatprep.subr.bf16.mxu0 %v5154_v1 }
 0x287   : > { %4582 = vmatpush3.bf16.msra.mxu0 %v4983_v46 }
 0x288   : > { %4595 = vmatprep.subr.bf16.mxu0 %v5154_v1 }
 0x28a   : > { %4584 = vmatmul.mubr.msk.bf16.vlgmr.msra.gmra.mrb[8].mxu0 %vm624_vm1, %v5331_v5 }
 0x28b   : > { %4597 = vmatprep.mubr.msk.bf16.mxu0 %vm5155_vm0, %v5154_v1 }
 0x30e   : > { %v851_v23 = vpop.xlane.xlu1 %850 }
 0x355   : > { %v895_v53 = vpop.f32.mrb[4].mxu0 }
 0x356   : > { %v4569_v54 = vpop.f32.mrb[5].mxu0 }
 0x357   : > { %v898_v55 = vpop.f32.mrb[6].mxu0 }
 0x358   : > { %v4570_v56 = vpop.f32.mrb[7].mxu0 }
 0x35d   : > { %v1029_v58 = vpop.f32.mrb[8].mxu0 }
 0x35e   : > { %v1030_v59 = vadd.f32 %v4113_v57, %v1029_v58  ;;  %v4585_v60 = vpop.f32.mrb[9].mxu0  ;;  %v4992_v58 = vld [vmem:[%s6100_s25 + $0x20] sm:$0xff]  }
 0x35f   : > { %v1032_v61 = vpop.f32.mrb[10].mxu0 }
 0x360   : > { %v1101_v63 = vpack.c.bf16 %v1030_v59, %v1030_v59  ;;  %v4586_v0 = vpop.f32.mrb[11].mxu0  ;;  %v4993_v59 = vld [vmem:[%s6100_s25 + $0x28] sm:$0xff]  }
 0x362   : > { %v1106_v2 = vsel %vm796_vm2, %v1101_v63, 0 }
 0x363   : > { %4596 = vmatpush3.bf16.xpose.msra.mxu0 %v1106_v2  ;;  %v4136_v2 = vld [vmem:[%s6055_s4 + $0x2] ss:$0 sm:$0xff] }
 0x364   : > { %4607 = vmatprep.subr.bf16.mxu0 %v5154_v1 }
 0x36a   : > { %4598 = vmatmul.mubr.msk.bf16.vlgmr.msra.gmra.mrb[12].mxu0 %vm796_vm2, %v1100_v6 }
 0x36b   : > { %4609 = vmatprep.mubr.msk.bf16.mxu0 %vm5155_vm0, %v5154_v1  ;;  %4608 = vmatpush3.bf16.msra.mxu0 %v1214_v34 }
 0x36c   : > { %4619 = vmatprep.subr.bf16.mxu0 %v5154_v1 }
 0x43d   : > { %v1142_v7 = vpop.f32.mrb[12].mxu0 }
 0x43e   : > { %v4599_v8 = vpop.f32.mrb[13].mxu0  ;;  %v1148_v9 = vsel %vm796_vm2, %v1142_v7, -inf }
 0x43f   : > { %1149 = vmax.xlane.f32.xlu0 %v1148_v9  ;;  %v1145_v10 = vpop.f32.mrb[14].mxu0 }
 0x440   : > { %v4600_v11 = vpop.f32.mrb[15].mxu0 }
 0x4cc   : > { %v1150_v20 = vpop.xlane.xlu0 %1149 }
 0x4cd   : > { %v1151_v21 = vsub.f32 %v1142_v7, %v1150_v20 }
 0x4cf   : > { %v1152_v22 = vmul.f32 1.442695, %v1151_v21 }
 0x4d1   : > { %5048 = vpow2.f32 %v1152_v22 }
 0x4d2   : > { %5050 = vrcp.f32 %v851_v23 }
 0x4db   : > { %v5049_v25 = vpop.eup %5048 }
 0x4dc   : > { %v1154_v26 = vsel %vm796_vm2, %v5049_v25, 0.0  ;;  %v1157_v27 = vpack.c.bf16 %v5049_v25, %v5049_v25  ;;  %v5051_v29 = vpop.eup %5050 }
 0x4dd   : > { %1155 = vadd.xlane.f32.xlu1 %v1154_v26  ;;  %v902_v30 = vmul.f32 %v5051_v29, %v895_v53 }
 0x4de   : > { %4604 = vmatmul.mubr.msk.bf16.vlgmr.msra.gmra.mrb[20].mxu1 %vm796_vm2, %v1157_v27 }
 0x4df   : > { %4614 = vmatpush3.bf16.msra.mxu1 %v1260_v28  ;;  %4615 = vmatprep.mubr.msk.bf16.mxu1 %vm5155_vm0, %v5154_v1  ;;  %v903_v31 = vpack.c.bf16 %v902_v30, %v902_v30  ;;  %v4160_v30 = vld [vmem:[%s6058_s7 + $0x8] sm:$0xf] }
 0x4e0   : > { %4627 = vmatprep.subr.bf16.mxu1 %v5154_v1 }
 0x4e6   : > { %4616 = vmatmul.mubr.msk.bf16.vlgmr.msra.gmra.mrb[24].mxu1 %vm796_vm2, %v903_v31  ;;  %v1611_v31 = vsel %vm857_vm3, %v4160_v30, 0 }
 0x4e7   : > { %4631 = vmatprep.mubr.msk.bf16.mxu1 %vm5155_vm0, %v5154_v1  ;;  %4628 = vmatpush3.bf16.msra.mxu1 %v4988_v32  ;;  %v4996_v32 = vld [vmem:[%s6095_s29 + $0x30] sm:$0xff]  }
 0x4e8   : > { %4629 = vmatprep.subr.bf16.mxu1 %v5154_v1 }
 0x4eb   : > { %4630 = vmatpush3.bf16.msra.mxu1 %v4989_v35 }
 0x4ec   : > { %4643 = vmatprep.subr.bf16.mxu1 %v5154_v1 }
 0x4ee   : > { %4632 = vmatmul.mubr.msk.bf16.vlgmr.msra.gmra.mrb[28].mxu1 %vm624_vm1, %v5331_v5 }
 0x4ef   : > { %4645 = vmatprep.mubr.msk.bf16.mxu1 %vm5155_vm0, %v5154_v1 }
 0x56a   : > { %v1156_v36 = vpop.xlane.xlu1 %1155 }
 0x56b   : > { %5052 = vrcp.f32 %v1156_v36 }
 0x575   : > { %v5053_v37 = vpop.eup %5052 }
 0x5b1   : > { %v1199_v38 = vpop.f32.mrb[20].mxu1 }
 0x5b2   : > { %v1206_v39 = vmul.f32 %v5053_v37, %v1199_v38  ;;  %v4605_v40 = vpop.f32.mrb[21].mxu1 }
 0x5b3   : > { %v1202_v41 = vpop.f32.mrb[22].mxu1  ;;  %v4994_v40 = vld [vmem:[%s6097_s2 + $0x30] sm:$0xff]  }
 0x5b4   : > { %v1207_v43 = vpack.c.bf16 %v1206_v39, %v1206_v39  ;;  %v4606_v44 = vpop.f32.mrb[23].mxu1 }
 0x5b6   : > { %4610 = vmatmul.mubr.msk.bf16.vlgmr.msra.gmra.mrb[16].mxu0 %vm796_vm2, %v1207_v43  ;;  %v4995_v43 = vld [vmem:[%s6097_s2 + $0x38] sm:$0xff]  }
 0x5b7   : > { %4620 = vmatpush3.bf16.msra.mxu0 %v4990_v42  ;;  %4623 = vmatprep.mubr.msk.bf16.mxu0 %vm5155_vm0, %v5154_v1 }
 0x5b8   : > { %4621 = vmatprep.subr.bf16.mxu0 %v5154_v1 }
 0x5b9   : > { %v1296_v46 = vpop.f32.mrb[24].mxu1 }
 0x5ba   : > { %v4617_v47 = vpop.f32.mrb[25].mxu1 }
 0x5bb   : > { %v1299_v48 = vpop.f32.mrb[26].mxu1  ;;  %4622 = vmatpush3.bf16.msra.mxu0 %v4991_v45 }
 0x5bc   : > { %v4618_v49 = vpop.f32.mrb[27].mxu1  ;;  %4635 = vmatprep.subr.bf16.mxu0 %v5154_v1  ;;  %v4998_v48 = vld [vmem:[%s6100_s25 + $0x30] sm:$0xff]  }
 0x5bd   : > { %v4999_v49 = vld [vmem:[%s6100_s25 + $0x38] sm:$0xff]  }
 0x5be   : > { %4624 = vmatmul.mubr.msk.bf16.vlgmr.msra.gmra.mrb[20].mxu0 %vm624_vm1, %v5331_v5 }
 0x5bf   : > { %4639 = vmatprep.mubr.msk.bf16.mxu0 %vm5155_vm0, %v5154_v1  ;;  %4636 = vmatpush3.bf16.msra.mxu0 %v4992_v58 }
 0x5c0   : > { %4637 = vmatprep.subr.bf16.mxu0 %v5154_v1 }
 0x5c1   : > { %v1426_v51 = vpop.f32.mrb[28].mxu1 }
 0x5c2   : > { %v1427_v52 = vadd.f32 %v4145_v50, %v1426_v51  ;;  %v4633_v53 = vpop.f32.mrb[29].mxu1 }
 0x5c3   : > { %v1429_v54 = vpop.f32.mrb[30].mxu1  ;;  %4638 = vmatpush3.bf16.msra.mxu0 %v4993_v59 }
 0x5c4   : > { %v1498_v55 = vpack.c.bf16 %v1427_v52, %v1427_v52  ;;  %v4634_v56 = vpop.f32.mrb[31].mxu1  ;;  %4649 = vmatprep.subr.bf16.mxu0 %v5154_v1 }
 0x5c6   : > { %v1503_v57 = vsel %vm796_vm2, %v1498_v55, 0  ;;  %4640 = vmatmul.mubr.msk.bf16.vlgmr.msra.gmra.mrb[24].mxu0 %vm624_vm1, %v5331_v5  ;;  %v4176_v55 = vld [vmem:[%s6056_s5 + $0x3] ss:$0 sm:$0xff] }
 0x5c7   : > { %4644 = vmatpush3.bf16.xpose.msra.mxu1 %v1503_v57  ;;  %4651 = vmatprep.mubr.msk.bf16.mxu0 %vm5155_vm0, %v5154_v1 }
 0x5c8   : > { %4655 = vmatprep.subr.bf16.mxu1 %v5154_v1 }
 0x689   : > { %v1250_v60 = vpop.f32.mrb[16].mxu0 }
 0x68a   : > { %v5493_v61 = vadd.f32 %v1296_v46, %v1250_v60  ;;  %v4611_v62 = vpop.f32.mrb[17].mxu0 }
 0x68b   : > { %v1253_v63 = vpop.f32.mrb[18].mxu0 }
 0x68c   : > { %v4612_v0 = vpop.f32.mrb[19].mxu0 }
 0x691   : > { %v1361_v3 = vpop.f32.mrb[20].mxu0 }
 0x692   : > { %v1362_v6 = vadd.f32 %v4136_v2, %v1361_v3  ;;  %v4625_v7 = vpop.f32.mrb[21].mxu0 }
 0x693   : > { %v1364_v8 = vpop.f32.mrb[22].mxu0 }
 0x694   : > { %v1497_v9 = vpack.c.bf16 %v1362_v6, %v1362_v6  ;;  %v4626_v10 = vpop.f32.mrb[23].mxu0 }
 0x696   : > { %4646 = vmatmul.mubr.msk.bf16.vlgmr.msra.gmra.mrb[32].mxu1 %vm796_vm2, %v1497_v9  ;;  %v4185_v9 = vld [vmem:[%s6057_s6 + $0x3] ss:$0 sm:$0xff] }
 0x697   : > { %4657 = vmatprep.mubr.msk.bf16.mxu1 %vm5155_vm0, %v5154_v1  ;;  %4656 = vmatpush3.bf16.msra.mxu1 %v1611_v31 }
 0x698   : > { %4669 = vmatprep.subr.bf16.mxu1 %v5154_v1 }
 0x699   : > { %v1491_v17 = vpop.f32.mrb[24].mxu0 }
 0x69a   : > { %v1492_v18 = vadd.f32 %v4154_v16, %v1491_v17  ;;  %v4641_v19 = vpop.f32.mrb[25].mxu0 }
 0x69b   : > { %v1494_v20 = vpop.f32.mrb[26].mxu0 }
 0x69c   : > { %v1555_v21 = vpack.c.bf16 %v1492_v18, %v1492_v18  ;;  %v4642_v22 = vpop.f32.mrb[27].mxu0 }
 0x69e   : > { %v1560_v23 = vsel %vm857_vm3, %v1555_v21, 0 }
 0x69f   : > { %4650 = vmatpush3.bf16.msra.mxu0 %v1560_v23  ;;  %v4191_v23 = vld [vmem:[%s6058_s7 + $0xc] sm:$0xf] }
 0x6a0   : > { %4661 = vmatprep.subr.bf16.mxu0 %v5154_v1 }
 0x769   : > { %v1539_v11 = vpop.f32.mrb[32].mxu1 }
 0x76a   : > { %v4647_v12 = vpop.f32.mrb[33].mxu1  ;;  %v1545_v13 = vsel %vm796_vm2, %v1539_v11, -inf }
 0x76b   : > { %1546 = vmax.xlane.f32.xlu0 %v1545_v13  ;;  %v1542_v14 = vpop.f32.mrb[34].mxu1 }
 0x76c   : > { %v4648_v15 = vpop.f32.mrb[35].mxu1 }
 0x7f8   : > { %v1547_v24 = vpop.xlane.xlu0 %1546 }
 0x7f9   : > { %v1548_v25 = vsub.f32 %v1539_v11, %v1547_v24  ;;  %v1963_v24 = vsel %vm857_vm3, %v4191_v23, 0 }
 0x7fb   : > { %v1549_v26 = vmul.f32 1.442695, %v1548_v25 }
 0x7fd   : > { %5054 = vpow2.f32 %v1549_v26 }
 0x807   : > { %v5055_v27 = vpop.eup %5054 }
 0x808   : > { %v1551_v28 = vsel %vm796_vm2, %v5055_v27, 0.0  ;;  %v1554_v29 = vpack.c.bf16 %v5055_v27, %v5055_v27 }
 0x809   : > { %1552 = vadd.xlane.f32.xlu1 %v1551_v28 }
 0x80a   : > { %4652 = vmatmul.mubr.msk.bf16.vlgmr.msra.gmra.mrb[28].mxu0 %vm796_vm2, %v1554_v29 }
 0x80b   : > { %4665 = vmatprep.mubr.msk.bf16.mxu0 %vm5155_vm0, %v5154_v1  ;;  %4662 = vmatpush3.bf16.msra.mxu0 %v4996_v32 }
 0x80c   : > { %4663 = vmatprep.subr.bf16.mxu0 %v5154_v1 }
 0x80f   : > { %4664 = vmatpush3.bf16.msra.mxu0 %v4997_v33 }
 0x810   : > { %4677 = vmatprep.subr.bf16.mxu0 %v5154_v1 }
 0x812   : > { %4666 = vmatmul.mubr.msk.bf16.vlgmr.msra.gmra.mrb[32].mxu0 %vm624_vm1, %v5331_v5 }
 0x813   : > { %4681 = vmatprep.mubr.msk.bf16.mxu0 %vm5155_vm0, %v5154_v1  ;;  %4678 = vmatpush3.bf16.msra.mxu0 %v4998_v48  ;;  %v5002_v48 = vld [vmem:[%s6062_s11] sm:$0xff]  }
 0x814   : > { %4679 = vmatprep.subr.bf16.mxu0 %v5154_v1 }
 0x817   : > { %4680 = vmatpush3.bf16.msra.mxu0 %v4999_v49 }
 0x818   : > { %4691 = vmatprep.subr.bf16.mxu0 %v5154_v1 }
 0x81a   : > { %4682 = vmatmul.mubr.msk.bf16.vlgmr.msra.gmra.mrb[36].mxu0 %vm624_vm1, %v5331_v5 }
 0x81b   : > { %4693 = vmatprep.mubr.msk.bf16.mxu0 %vm5155_vm0, %v5154_v1 }
 0x896   : > { %v1553_v34 = vpop.xlane.xlu1 %1552 }
 0x897   : > { %5056 = vrcp.f32 %v1553_v34  ;;  %v4193_v34 = vld [vmem:[%s6059_s8] ss:$0 sm:$0xff] }
 0x8a1   : > { %v5057_v35 = vpop.eup %5056 }
 0x8dd   : > { %v1596_v36 = vpop.f32.mrb[28].mxu0 }
 0x8de   : > { %v1603_v37 = vmul.f32 %v5057_v35, %v1596_v36  ;;  %v4653_v38 = vpop.f32.mrb[29].mxu0 }
 0x8df   : > { %v1599_v39 = vpop.f32.mrb[30].mxu0 }
 0x8e0   : > { %v1604_v41 = vpack.c.bf16 %v1603_v37, %v1603_v37  ;;  %v4654_v42 = vpop.f32.mrb[31].mxu0 }
 0x8e2   : > { %4658 = vmatmul.mubr.msk.bf16.vlgmr.msra.gmra.mrb[36].mxu1 %vm796_vm2, %v1604_v41 }
 0x8e3   : > { %4670 = vmatpush3.bf16.msra.mxu1 %v4994_v40  ;;  %4673 = vmatprep.mubr.msk.bf16.mxu1 %vm5155_vm0, %v5154_v1 }
 0x8e4   : > { %4671 = vmatprep.subr.bf16.mxu1 %v5154_v1 }
 0x8e5   : > { %v1713_v44 = vpop.f32.mrb[32].mxu0 }
 0x8e6   : > { %v4667_v45 = vpop.f32.mrb[33].mxu0 }
 0x8e7   : > { %4672 = vmatpush3.bf16.msra.mxu1 %v4995_v43  ;;  %v1716_v46 = vpop.f32.mrb[34].mxu0 }
 0x8e8   : > { %4685 = vmatprep.subr.bf16.mxu1 %v5154_v1  ;;  %v4668_v47 = vpop.f32.mrb[35].mxu0 }
 0x8e9   : > { %v5000_v47 = vld [vmem:[%s6060_s9] sm:$0xff]  }
 0x8ea   : > { %4674 = vmatmul.mubr.msk.bf16.vlgmr.msra.gmra.mrb[40].mxu1 %vm624_vm1, %v5331_v5  ;;  %v4167_v5 = vld [vmem:[%s6055_s4 + $0x3] ss:$0 sm:$0xff] }
 0x8eb   : > { %4687 = vmatprep.mubr.msk.bf16.mxu1 %vm5155_vm0, %v5154_v1 }
 0x8ed   : > { %v1843_v10 = vpop.f32.mrb[36].mxu0 }
 0x8ee   : > { %v1844_v11 = vadd.f32 %v4185_v9, %v1843_v10  ;;  %v4683_v12 = vpop.f32.mrb[37].mxu0 }
 0x8ef   : > { %v1846_v13 = vpop.f32.mrb[38].mxu0 }
 0x8f0   : > { %v1907_v14 = vpack.c.bf16 %v1844_v11, %v1844_v11  ;;  %v4684_v15 = vpop.f32.mrb[39].mxu0 }
 0x8f2   : > { %v1912_v16 = vsel %vm857_vm3, %v1907_v14, 0 }
 0x8f3   : > { %4692 = vmatpush3.bf16.msra.mxu0 %v1912_v16 }
 0x8f4   : > { %4703 = vmatprep.subr.bf16.mxu0 %v5154_v1 }
 0x9b5   : > { %v1647_v50 = vpop.f32.mrb[36].mxu1 }
 0x9b6   : > { %v1653_v51 = vadd.f32 %v1647_v50, %v5493_v61  ;;  %v4659_v52 = vpop.f32.mrb[37].mxu1  ;;  %v1714_v61 = vadd.f32 %v4167_v5, %v1713_v44  ;;  %v5004_v5 = vld [vmem:[%s6062_s11 + $0x10] sm:$0xff]  }
 0x9b7   : > { %v1650_v53 = vpop.f32.mrb[38].mxu1 }
 0x9b8   : > { %v4660_v54 = vpop.f32.mrb[39].mxu1  ;;  %v1849_v0 = vpack.c.bf16 %v1714_v61, %v1714_v61  ;;  %v4194_v53 = vld [vmem:[%s6064_s13] ss:$0 sm:$0xff]  ;;  %v5008_v61 = vld [vmem:[%s6062_s11 + $0x30] sm:$0xff]  }
 0x9bd   : > { %v1778_v56 = vpop.f32.mrb[40].mxu1 }
 0x9be   : > { %v1779_v57 = vadd.f32 %v4176_v55, %v1778_v56  ;;  %v4675_v58 = vpop.f32.mrb[41].mxu1  ;;  %v4195_v55 = vld [vmem:[%s6065_s14] ss:$0 sm:$0xff] }
 0x9bf   : > { %v1781_v59 = vpop.f32.mrb[42].mxu1 }
 0x9c0   : > { %v1850_v60 = vpack.c.bf16 %v1779_v57, %v1779_v57  ;;  %v4676_v62 = vpop.f32.mrb[43].mxu1  ;;  %v5003_v59 = vld [vmem:[%s6062_s11 + $0x8] sm:$0xff]  }
 0x9c1   : > { %v5006_v62 = vld [vmem:[%s6062_s11 + $0x20] sm:$0xff]  }
 0x9c2   : > { %v1855_v63 = vsel %vm796_vm2, %v1850_v60, 0  ;;  %v5005_v60 = vld [vmem:[%s6062_s11 + $0x18] sm:$0xff]  }
 0x9c3   : > { %4686 = vmatpush3.bf16.xpose.msra.mxu1 %v1855_v63  ;;  %v5007_v63 = vld [vmem:[%s6062_s11 + $0x28] sm:$0xff]  }
 0x9c4   : > { %4697 = vmatprep.subr.bf16.mxu1 %v5154_v1 }
 0x9ca   : > { %4688 = vmatmul.mubr.msk.bf16.vlgmr.msra.gmra.mrb[44].mxu1 %vm796_vm2, %v1849_v0  ;;  %v5009_v0 = vld [vmem:[%s6062_s11 + $0x38] sm:$0xff]  }
 0x9cb   : > { %4699 = vmatprep.mubr.msk.bf16.mxu1 %vm5155_vm0, %v5154_v1  ;;  %4698 = vmatpush3.bf16.msra.mxu1 %v1963_v24 }
 0x9cc   : > { %4711 = vmatprep.subr.bf16.mxu1 %v5154_v1 }
 0xa9d   : > { %v1891_v2 = vpop.f32.mrb[44].mxu1 }
 0xa9e   : > { %v4689_v3 = vpop.f32.mrb[45].mxu1  ;;  %v1897_v6 = vsel %vm796_vm2, %v1891_v2, -inf }
 0xa9f   : > { %1898 = vmax.xlane.f32.xlu0 %v1897_v6  ;;  %v1894_v7 = vpop.f32.mrb[46].mxu1 }
 0xaa0   : > { %v4690_v8 = vpop.f32.mrb[47].mxu1 }
 0xb2c   : > { %v1899_v17 = vpop.xlane.xlu0 %1898 }
 0xb2d   : > { %v1900_v18 = vsub.f32 %v1891_v2, %v1899_v17  ;;  %v4196_v2 = vld [vmem:[%s6061_s10] ss:$0 sm:$0xff] }
 0xb2f   : > { %v1901_v19 = vmul.f32 1.442695, %v1900_v18 }
 0xb31   : > { %5058 = vpow2.f32 %v1901_v19 }
 0xb3b   : > { %v5059_v20 = vpop.eup %5058 }
 0xb3c   : > { %v1903_v21 = vsel %vm796_vm2, %v5059_v20, 0.0  ;;  %v1906_v22 = vpack.c.bf16 %v5059_v20, %v5059_v20  ;;  %v4200_v20 = vld [vmem:[%s6063_s12] ss:$0 sm:$0xff] }
 0xb3d   : > { %1904 = vadd.xlane.f32.xlu1 %v1903_v21 }
 0xb3e   : > { %4694 = vmatmul.mubr.msk.bf16.vlgmr.msra.gmra.mrb[40].mxu0 %vm796_vm2, %v1906_v22 }
 0xb3f   : > { %4707 = vmatprep.mubr.msk.bf16.mxu0 %vm5155_vm0, %v5154_v1  ;;  %4704 = vmatpush3.bf16.msra.mxu0 %v5000_v47  ;;  %v5014_v47 = vld [vmem:[%s6100_s25 + $0x40] sm:$0xff]  }
 0xb40   : > { %4705 = vmatprep.subr.bf16.mxu0 %v5154_v1 }
 0xbca   : > { %v1905_v25 = vpop.xlane.xlu1 %1904 }
 0xbcb   : > { %5060 = vrcp.f32 %v1905_v25 }
 0xbd5   : > { %v5061_v26 = vpop.eup %5060 }
 0xc11   : > { %v1948_v27 = vpop.f32.mrb[40].mxu0 }
 0xc12   : > { %v1955_v28 = vmul.f32 %v5061_v26, %v1948_v27  ;;  %v4695_v29 = vpop.f32.mrb[41].mxu0 }
 0xc13   : > { %v1951_v30 = vpop.f32.mrb[42].mxu0 }
 0xc14   : > { %v1956_v31 = vpack.c.bf16 %v1955_v28, %v1955_v28  ;;  %v4696_v32 = vpop.f32.mrb[43].mxu0 }
 0xc16   : > { %4700 = vmatmul.mubr.msk.bf16.vlgmr.msra.gmra.mrb[48].mxu1 %vm796_vm2, %v1956_v31 }
 0xc17   : > { %4727 = vmatprep.mubr.msk.bf16.mxu1 %vm5155_vm0, %v5154_v1  ;;  %4712 = vmatpush3.bf16.msra.mxu1 %v5002_v48 }
 0xc18   : > { %4713 = vmatprep.subr.bf16.mxu1 %v5154_v1 }
 0xc1b   : > { %4714 = vmatpush3.bf16.msra.mxu1 %v5003_v59  ;;  %v4216_v59 = vld [vmem:[%s6055_s4 + $0x4] ss:$0 sm:$0xff] }
 0xc1c   : > { %4715 = vmatprep.subr.bf16.mxu1 %v5154_v1 }
 0xc1f   : > { %4716 = vmatpush3.bf16.msra.mxu1 %v5004_v5 }
 0xc20   : > { %4717 = vmatprep.subr.bf16.mxu1 %v5154_v1 }
 0xc23   : > { %4718 = vmatpush3.bf16.msra.mxu1 %v5005_v60  ;;  %v4234_v60 = vld [vmem:[%s6057_s6 + $0x4] ss:$0 sm:$0xff] }
 0xc24   : > { %4719 = vmatprep.subr.bf16.mxu1 %v5154_v1 }
 0xc27   : > { %4720 = vmatpush3.bf16.msra.mxu1 %v5006_v62 }
 0xc28   : > { %4721 = vmatprep.subr.bf16.mxu1 %v5154_v1 }
 0xc2b   : > { %4722 = vmatpush3.bf16.msra.mxu1 %v5007_v63 }
 0xc2c   : > { %4723 = vmatprep.subr.bf16.mxu1 %v5154_v1 }
 0xc2f   : > { %4724 = vmatpush3.bf16.msra.mxu1 %v5008_v61 }
 0xc30   : > { %4725 = vmatprep.subr.bf16.mxu1 %v5154_v1 }
 0xc33   : > { %4726 = vmatpush3.bf16.msra.mxu1 %v5009_v0 }
 0xc34   : > { %4761 = vmatprep.subr.bf16.mxu1 %v5154_v1 }
 0xce9   : > { %v1999_v33 = vpop.f32.mrb[48].mxu1 }
 0xcea   : > { %v2005_v35 = vadd.f32 %v1999_v33, %v1653_v51  ;;  %v4701_v36 = vpop.f32.mrb[49].mxu1  ;;  %v5010_v33 = vld [vmem:[%s6095_s29 + $0x40] sm:$0xff]  }
 0xceb   : > { %v2002_v37 = vpop.f32.mrb[50].mxu1 }
 0xcec   : > { %v2013_v38 = vadd.f32 %v4193_v34, %v2005_v35  ;;  %v4702_v39 = vpop.f32.mrb[51].mxu1  ;;  %v5011_v34 = vld [vmem:[%s6095_s29 + $0x48] sm:$0xff]  }
 0xced   : > { %v4209_v39 = vld [vmem:[%s6066_s15] ss:$0 sm:$0xff] }
 0xcee   : > { %v2014_v40 = vadd.f32 %v2013_v38, %v5327_v4  ;;  %v5001_v4 = vld [vmem:[%s6060_s9 + $0x8] sm:$0xff]  }
 0xcef   : > { %4706 = vmatpush3.bf16.msra.mxu0 %v5001_v4  ;;  %v5015_v4 = vld [vmem:[%s6100_s25 + $0x48] sm:$0xff]  }
 0xcf0   : > { %v2017_v41 = vsel %vm624_vm1, %v2014_v40, 0.0  ;;  %4731 = vmatprep.subr.bf16.mxu0 %v5154_v1 }
 0xcf1   : > { %2018 = vadd.xlane.f32.xlu0 %v2017_v41  ;;  %v4210_v41 = vld [vmem:[%s6067_s16] ss:$0 sm:$0xff] }
 0xd7e   : > { %v2019_v42 = vpop.xlane.xlu0 %2018 }
 0xd7f   : > { %v2021_v43 = vmul.f32 0.03125, %v2019_v42 }
 0xd81   : > { %v2022_v44 = vsub.f32 %v2014_v40, %v2021_v43 }
 0xd83   : > { %v2023_v45 = vmul.f32 %v2022_v44, %v2022_v44 }
 0xd85   : > { %v2024_v46 = vsel %vm624_vm1, %v2023_v45, 0.0 }
 0xd86   : > { %2025 = vadd.xlane.f32.xlu1 %v2024_v46  ;;  %v5013_v46 = vld [vmem:[%s6097_s2 + $0x48] sm:$0xff]  }
 0xe13   : > { %v2026_v49 = vpop.xlane.xlu1 %2025 }
 0xe14   : > { %v2027_v50 = vmul.f32 0.03125, %v2026_v49 }
 0xe16   : > { %v2028_v51 = vadd.f32 1e-05, %v2027_v50 }
 0xe18   : > { %5062 = vrsqrt.f32 %v2028_v51 }
 0xe22   : > { %v5063_v52 = vpop.eup %5062 }
 0xe23   : > { %v2030_v54 = vmul.f32 %v5063_v52, %v2022_v44  ;;  %v5012_v44 = vld [vmem:[%s6097_s2 + $0x40] sm:$0xff]  }
 0xe24   : > { %v4225_v52 = vld [vmem:[%s6056_s5 + $0x4] ss:$0 sm:$0xff] }
 0xe25   : > { %v2037_v56 = vmul.f32 %v4194_v53, %v2030_v54 }
 0xe27   : > { %v2044_v57 = vadd.f32 %v4195_v55, %v2037_v56 }
 0xe29   : > { %v2045_v58 = vpack.c.bf16 %v2044_v57, %v2044_v57 }
 0xe2b   : > { %4708 = vmatmul.mubr.msk.bf16.vlgmr.msra.gmra.mrb[44].mxu0 %vm624_vm1, %v2045_v58 }
 0xe2c   : > { %4735 = vmatprep.mubr.msk.bf16.mxu0 %vm5155_vm0, %v5154_v1  ;;  %4732 = vmatpush3.bf16.msra.mxu0 %v5010_v33 }
 0xe2d   : > { %4733 = vmatprep.subr.bf16.mxu0 %v5154_v1 }
 0xe30   : > { %4734 = vmatpush3.bf16.msra.mxu0 %v5011_v34  ;;  %v5020_v34 = vld [vmem:[%s6097_s2 + $0x50] sm:$0xff]  }
 0xe31   : > { %4739 = vmatprep.subr.bf16.mxu0 %v5154_v1 }
 0xefe   : > { %v2106_v3 = vpop.f32.mrb[44].mxu0 }
 0xeff   : > { %v2107_v6 = vadd.f32 %v4196_v2, %v2106_v3  ;;  %v4709_v7 = vpop.f32.mrb[45].mxu0  ;;  %v5016_v3 = vld [vmem:[%s6095_s29 + $0x50] sm:$0xff]  }
 0xf00   : > { %v2109_v8 = vpop.f32.mrb[46].mxu0 }
 0xf01   : > { %v2113_v9 = vmul.f32 0.044715, %v2107_v6  ;;  %v4710_v10 = vpop.f32.mrb[47].mxu0  ;;  %v2112_v16 = vmul.f32 0.5, %v2107_v6 }
 0xf02   : > { %v5017_v10 = vld [vmem:[%s6095_s29 + $0x58] sm:$0xff]  }
 0xf03   : > { %v2114_v11 = vmul.f32 %v2113_v9, %v2107_v6 }
 0xf05   : > { %v2115_v12 = vmul.f32 %v2114_v11, %v2107_v6  ;;  %v5018_v11 = vld [vmem:[%s6100_s25 + $0x50] sm:$0xff]  }
 0xf07   : > { %v2116_v13 = vadd.f32 %v2115_v12, %v2107_v6  ;;  %v5019_v12 = vld [vmem:[%s6100_s25 + $0x58] sm:$0xff]  }
 0xf09   : > { %v2117_v14 = vmul.f32 0.7978846, %v2116_v13 }
 0xf0b   : > { %5064 = vtanh.f32 %v2117_v14 }
 0xf15   : > { %v5065_v15 = vpop.eup %5064 }
 0xf16   : > { %v2119_v17 = vadd.f32 1.0, %v5065_v15 }
 0xf18   : > { %v2120_v18 = vmul.f32 %v2119_v17, %v2112_v16 }
 0xf1a   : > { %v2121_v19 = vpack.c.bf16 %v2120_v18, %v2120_v18 }
 0xf1c   : > { %4728 = vmatmul.mubr.bf16.vlgmr.msra.gmra.mrb[52].mxu1 %v2121_v19 }
 0xf1d   : > { %4763 = vmatprep.mubr.msk.bf16.mxu1 %vm5155_vm0, %v5154_v1 }
 0xfef   : > { %v2227_v21 = vpop.f32.mrb[52].mxu1 }
 0xff0   : > { %v2228_v22 = vadd.f32 %v4200_v20, %v2227_v21  ;;  %v4729_v23 = vpop.f32.mrb[53].mxu1 }
 0xff1   : > { %v2230_v24 = vpop.f32.mrb[54].mxu1 }
 0xff2   : > { %v4730_v25 = vpop.f32.mrb[55].mxu1  ;;  %v2233_v26 = vadd.f32 %v2228_v22, %v2044_v57  ;;  %v4264_v22 = vld [vmem:[%s6057_s6 + $0x5] ss:$0 sm:$0xff] }
 0xff4   : > { %v2236_v27 = vsel %vm624_vm1, %v2233_v26, 0.0 }
 0xff5   : > { %2237 = vadd.xlane.f32.xlu0 %v2236_v27 }
0x1082   : > { %v2238_v28 = vpop.xlane.xlu0 %2237 }
0x1083   : > { %v2239_v29 = vmul.f32 0.03125, %v2238_v28 }
0x1085   : > { %v2240_v30 = vsub.f32 %v2233_v26, %v2239_v29 }
0x1087   : > { %v2241_v31 = vmul.f32 %v2240_v30, %v2240_v30 }
0x1089   : > { %v2242_v32 = vsel %vm624_vm1, %v2241_v31, 0.0 }
0x108a   : > { %2243 = vadd.xlane.f32.xlu1 %v2242_v32 }
0x1117   : > { %v2244_v35 = vpop.xlane.xlu1 %2243 }
0x1118   : > { %v2245_v36 = vmul.f32 0.03125, %v2244_v35 }
0x111a   : > { %v2246_v37 = vadd.f32 1e-05, %v2245_v36 }
0x111c   : > { %5066 = vrsqrt.f32 %v2246_v37  ;;  %v5021_v37 = vld [vmem:[%s6097_s2 + $0x58] sm:$0xff]  }
0x1126   : > { %v5067_v38 = vpop.eup %5066 }
0x1127   : > { %v2248_v40 = vmul.f32 %v5067_v38, %v2240_v30 }
0x1129   : > { %v2255_v42 = vmul.f32 %v4209_v39, %v2248_v40 }
0x112b   : > { %v5664_v43 = vadd.f32 %v4210_v41, %v2255_v42  ;;  %v4255_v42 = vld [vmem:[%s6056_s5 + $0x5] ss:$0 sm:$0xff] }
0x112d   : > { %v5671_v45 = vpack.c.bf16 %v5664_v43, %v5664_v43 }
0x112f   : > { %4736 = vmatmul.mubr.msk.bf16.vlgmr.msra.gmra.mrb[48].mxu0 %vm624_vm1, %v5671_v45 }
0x1130   : > { %4740 = vmatpush3.bf16.msra.mxu0 %v5012_v44  ;;  %4743 = vmatprep.mubr.msk.bf16.mxu0 %vm5155_vm0, %v5154_v1 }
0x1131   : > { %4741 = vmatprep.subr.bf16.mxu0 %v5154_v1 }
0x1134   : > { %4742 = vmatpush3.bf16.msra.mxu0 %v5013_v46 }
0x1135   : > { %4747 = vmatprep.subr.bf16.mxu0 %v5154_v1 }
0x1137   : > { %4744 = vmatmul.mubr.msk.bf16.vlgmr.msra.gmra.mrb[52].mxu0 %vm624_vm1, %v5671_v45 }
0x1138   : > { %4748 = vmatpush3.bf16.msra.mxu0 %v5014_v47  ;;  %4751 = vmatprep.mubr.msk.bf16.mxu0 %vm5155_vm0, %v5154_v1 }
0x1139   : > { %4749 = vmatprep.subr.bf16.mxu0 %v5154_v1 }
0x113c   : > { %4750 = vmatpush3.bf16.msra.mxu0 %v5015_v4 }
0x113d   : > { %4755 = vmatprep.subr.bf16.mxu0 %v5154_v1 }
0x113f   : > { %4752 = vmatmul.mubr.msk.bf16.vlgmr.msra.gmra.mrb[56].mxu0 %vm624_vm1, %v5671_v45 }
0x1140   : > { %4757 = vmatprep.mubr.msk.bf16.mxu0 %vm5155_vm0, %v5154_v1 }
0x1202   : > { %v2326_v48 = vpop.f32.mrb[48].mxu0 }
0x1203   : > { %v4737_v49 = vpop.f32.mrb[49].mxu0  ;;  %v2327_v62 = vadd.f32 %v4216_v59, %v2326_v48 }
0x1204   : > { %v2329_v50 = vpop.f32.mrb[50].mxu0 }
0x1205   : > { %v4738_v51 = vpop.f32.mrb[51].mxu0  ;;  %v2462_v6 = vpack.c.bf16 %v2327_v62, %v2327_v62  ;;  %v4246_v50 = vld [vmem:[%s6055_s4 + $0x5] ss:$0 sm:$0xff] }
0x120a   : > { %v2391_v53 = vpop.f32.mrb[52].mxu0 }
0x120b   : > { %v2392_v54 = vadd.f32 %v4225_v52, %v2391_v53  ;;  %v4745_v55 = vpop.f32.mrb[53].mxu0 }
0x120c   : > { %v2394_v56 = vpop.f32.mrb[54].mxu0 }
0x120d   : > { %v2463_v57 = vpack.c.bf16 %v2392_v54, %v2392_v54  ;;  %v4746_v58 = vpop.f32.mrb[55].mxu0 }
0x120f   : > { %v2468_v5 = vsel %vm796_vm2, %v2463_v57, 0 }
0x1210   : > { %4756 = vmatpush3.bf16.xpose.msra.mxu0 %v2468_v5 }
0x1211   : > { %4767 = vmatprep.subr.bf16.mxu0 %v5154_v1 }
0x1212   : > { %v2456_v63 = vpop.f32.mrb[56].mxu0 }
0x1213   : > { %v2457_v61 = vadd.f32 %v4234_v60, %v2456_v63  ;;  %v4753_v0 = vpop.f32.mrb[57].mxu0  ;;  %v4240_v63 = vld [vmem:[%s6058_s7 + $0x10] sm:$0xf] }
0x1214   : > { %v2459_v2 = vpop.f32.mrb[58].mxu0 }
0x1215   : > { %v2520_v7 = vpack.c.bf16 %v2457_v61, %v2457_v61  ;;  %v4754_v8 = vpop.f32.mrb[59].mxu0 }
0x1216   : > { %v5022_v8 = vld [vmem:[%s6097_s2 + $0x60] sm:$0xff]  }
0x1217   : > { %v2525_v9 = vsel %vm857_vm3, %v2520_v7, 0  ;;  %4758 = vmatmul.mubr.msk.bf16.vlgmr.msra.gmra.mrb[60].mxu0 %vm796_vm2, %v2462_v6 }
0x1218   : > { %4762 = vmatpush3.bf16.msra.mxu1 %v2525_v9  ;;  %4768 = vmatpush3.bf16.msra.mxu0 %v5016_v3  ;;  %v2927_v3 = vsel %vm857_vm3, %v4240_v63, 0 }
0x1219   : > { %4769 = vmatprep.subr.bf16.mxu0 %v5154_v1  ;;  %4771 = vmatprep.mubr.msk.bf16.mxu0 %vm5155_vm0, %v5154_v1 }
0x121a   : > { %4775 = vmatprep.subr.bf16.mxu1 %v5154_v1 }
0x121c   : > { %4770 = vmatpush3.bf16.msra.mxu0 %v5017_v10  ;;  %v5023_v10 = vld [vmem:[%s6097_s2 + $0x68] sm:$0xff]  }
0x121d   : > { %4783 = vmatprep.subr.bf16.mxu0 %v5154_v1 }
0x121f   : > { %4772 = vmatmul.mubr.msk.bf16.vlgmr.msra.gmra.mrb[64].mxu0 %vm624_vm1, %v5671_v45 }
0x1220   : > { %4784 = vmatpush3.bf16.msra.mxu0 %v5018_v11  ;;  %4787 = vmatprep.mubr.msk.bf16.mxu0 %vm5155_vm0, %v5154_v1  ;;  %v4270_v11 = vld [vmem:[%s6058_s7 + $0x14] sm:$0xf] }
0x1221   : > { %4785 = vmatprep.subr.bf16.mxu0 %v5154_v1 }
0x1224   : > { %4786 = vmatpush3.bf16.msra.mxu0 %v5019_v12  ;;  %v2881_v12 = vsel %vm857_vm3, %v4270_v11, 0  ;;  %v4302_v11 = vld [vmem:[%s6058_s7 + $0x18] sm:$0xf] }
0x1225   : > { %4797 = vmatprep.subr.bf16.mxu0 %v5154_v1 }
0x1227   : > { %4788 = vmatmul.mubr.msk.bf16.vlgmr.msra.gmra.mrb[68].mxu0 %vm624_vm1, %v5671_v45 }
0x1228   : > { %4799 = vmatprep.mubr.msk.bf16.mxu0 %vm5155_vm0, %v5154_v1 }
0x12ea   : > { %v2504_v13 = vpop.f32.mrb[60].mxu0 }
0x12eb   : > { %v4759_v14 = vpop.f32.mrb[61].mxu0  ;;  %v2510_v15 = vsel %vm796_vm2, %v2504_v13, -inf }
0x12ec   : > { %2511 = vmax.xlane.f32.xlu0 %v2510_v15  ;;  %v2507_v16 = vpop.f32.mrb[62].mxu0 }
0x12ed   : > { %v4760_v17 = vpop.f32.mrb[63].mxu0 }
0x12f2   : > { %v2631_v18 = vpop.f32.mrb[64].mxu0 }
0x12f3   : > { %v4773_v19 = vpop.f32.mrb[65].mxu0  ;;  %v2632_v52 = vadd.f32 %v4246_v50, %v2631_v18  ;;  %v4296_v50 = vld [vmem:[%s6057_s6 + $0x6] ss:$0 sm:$0xff] }
0x12f4   : > { %v2634_v20 = vpop.f32.mrb[66].mxu0  ;;  %v5024_v19 = vld [vmem:[%s6095_s29 + $0x60] sm:$0xff]  }
0x12f5   : > { %v4774_v21 = vpop.f32.mrb[67].mxu0  ;;  %v2767_v53 = vpack.c.bf16 %v2632_v52, %v2632_v52 }
0x12fa   : > { %v2761_v23 = vpop.f32.mrb[68].mxu0 }
0x12fb   : > { %v2762_v24 = vadd.f32 %v4264_v22, %v2761_v23  ;;  %v4789_v25 = vpop.f32.mrb[69].mxu0  ;;  %v5025_v22 = vld [vmem:[%s6095_s29 + $0x68] sm:$0xff]  }
0x12fc   : > { %v2764_v26 = vpop.f32.mrb[70].mxu0 }
0x12fd   : > { %v2825_v27 = vpack.c.bf16 %v2762_v24, %v2762_v24  ;;  %v4790_v28 = vpop.f32.mrb[71].mxu0  ;;  %v5026_v26 = vld [vmem:[%s6100_s25 + $0x60] sm:$0xff]  }
0x12fe   : > { %v4287_v28 = vld [vmem:[%s6056_s5 + $0x6] ss:$0 sm:$0xff] }
0x12ff   : > { %v2830_v29 = vsel %vm857_vm3, %v2825_v27, 0 }
0x1300   : > { %4798 = vmatpush3.bf16.msra.mxu0 %v2830_v29  ;;  %v5027_v29 = vld [vmem:[%s6100_s25 + $0x68] sm:$0xff]  }
0x1301   : > { %4809 = vmatprep.subr.bf16.mxu0 %v5154_v1 }
0x1379   : > { %v2512_v30 = vpop.xlane.xlu0 %2511 }
0x137a   : > { %v2513_v31 = vsub.f32 %v2504_v13, %v2512_v30 }
0x137c   : > { %v2514_v32 = vmul.f32 1.442695, %v2513_v31 }
0x137e   : > { %5068 = vpow2.f32 %v2514_v32 }
0x1388   : > { %v5069_v33 = vpop.eup %5068 }
0x1389   : > { %v2516_v35 = vsel %vm796_vm2, %v5069_v33, 0.0  ;;  %v2519_v36 = vpack.c.bf16 %v5069_v33, %v5069_v33 }
0x138a   : > { %2517 = vadd.xlane.f32.xlu0 %v2516_v35 }
0x138b   : > { %4764 = vmatmul.mubr.msk.bf16.vlgmr.msra.gmra.mrb[56].mxu1 %vm796_vm2, %v2519_v36 }
0x138c   : > { %4776 = vmatpush3.bf16.msra.mxu1 %v5020_v34  ;;  %4779 = vmatprep.mubr.msk.bf16.mxu1 %vm5155_vm0, %v5154_v1 }
0x138d   : > { %4777 = vmatprep.subr.bf16.mxu1 %v5154_v1 }
0x1390   : > { %4778 = vmatpush3.bf16.msra.mxu1 %v5021_v37 }
0x1391   : > { %4791 = vmatprep.subr.bf16.mxu1 %v5154_v1 }
0x1393   : > { %4780 = vmatmul.mubr.msk.bf16.vlgmr.msra.gmra.mrb[60].mxu1 %vm624_vm1, %v5671_v45 }
0x1394   : > { %4793 = vmatprep.mubr.msk.bf16.mxu1 %vm5155_vm0, %v5154_v1 }
0x1417   : > { %v2518_v62 = vpop.xlane.xlu0 %2517 }
0x145e   : > { %v2561_v38 = vpop.f32.mrb[56].mxu1 }
0x145f   : > { %v4765_v39 = vpop.f32.mrb[57].mxu1 }
0x1460   : > { %v2564_v40 = vpop.f32.mrb[58].mxu1 }
0x1461   : > { %v4766_v41 = vpop.f32.mrb[59].mxu1 }
0x1466   : > { %v2696_v44 = vpop.f32.mrb[60].mxu1 }
0x1467   : > { %v2697_v46 = vadd.f32 %v4255_v42, %v2696_v44  ;;  %v4781_v47 = vpop.f32.mrb[61].mxu1  ;;  %v4278_v42 = vld [vmem:[%s6055_s4 + $0x6] ss:$0 sm:$0xff] }
0x1468   : > { %v2699_v4 = vpop.f32.mrb[62].mxu1 }
0x1469   : > { %v2768_v48 = vpack.c.bf16 %v2697_v46, %v2697_v46  ;;  %v4782_v49 = vpop.f32.mrb[63].mxu1 }
0x146b   : > { %v2773_v51 = vsel %vm796_vm2, %v2768_v48, 0 }
0x146c   : > { %4792 = vmatpush3.bf16.xpose.msra.mxu1 %v2773_v51 }
0x146d   : > { %4803 = vmatprep.subr.bf16.mxu1 %v5154_v1 }
0x1473   : > { %4794 = vmatmul.mubr.msk.bf16.vlgmr.msra.gmra.mrb[64].mxu1 %vm796_vm2, %v2767_v53 }
0x1474   : > { %4805 = vmatprep.mubr.msk.bf16.mxu1 %vm5155_vm0, %v5154_v1  ;;  %4804 = vmatpush3.bf16.msra.mxu1 %v2881_v12  ;;  %v3278_v12 = vsel %vm857_vm3, %v4302_v11, 0  ;;  %v4336_v11 = vld [vmem:[%s6059_s8 + $0x1] ss:$0 sm:$0xff] }
0x1475   : > { %4815 = vmatprep.subr.bf16.mxu1 %v5154_v1 }
0x1546   : > { %v2809_v54 = vpop.f32.mrb[64].mxu1 }
0x1547   : > { %v4795_v55 = vpop.f32.mrb[65].mxu1  ;;  %v2815_v56 = vsel %vm796_vm2, %v2809_v54, -inf }
0x1548   : > { %2816 = vmax.xlane.f32.xlu1 %v2815_v56  ;;  %v2812_v57 = vpop.f32.mrb[66].mxu1 }
0x1549   : > { %v4796_v58 = vpop.f32.mrb[67].mxu1 }
0x15d5   : > { %v2817_v59 = vpop.xlane.xlu1 %2816 }
0x15d6   : > { %v2818_v5 = vsub.f32 %v2809_v54, %v2817_v59 }
0x15d8   : > { %v2819_v60 = vmul.f32 1.442695, %v2818_v5 }
0x15da   : > { %5070 = vpow2.f32 %v2819_v60 }
0x15db   : > { %5072 = vrcp.f32 %v2518_v62 }
0x15e4   : > { %v5071_v61 = vpop.eup %5070 }
0x15e5   : > { %v2821_v0 = vsel %vm796_vm2, %v5071_v61, 0.0  ;;  %v2824_v2 = vpack.c.bf16 %v5071_v61, %v5071_v61  ;;  %v5073_v6 = vpop.eup %5072 }
0x15e6   : > { %2822 = vadd.xlane.f32.xlu1 %v2821_v0  ;;  %v2568_v7 = vmul.f32 %v5073_v6, %v2561_v38 }
0x15e7   : > { %4800 = vmatmul.mubr.msk.bf16.vlgmr.msra.gmra.mrb[72].mxu0 %vm796_vm2, %v2824_v2 }
0x15e8   : > { %4810 = vmatpush3.bf16.msra.mxu0 %v2927_v3  ;;  %4811 = vmatprep.mubr.msk.bf16.mxu0 %vm5155_vm0, %v5154_v1  ;;  %v2569_v9 = vpack.c.bf16 %v2568_v7, %v2568_v7  ;;  %v5028_v3 = vld [vmem:[%s6095_s29 + $0x70] sm:$0xff]  }
0x15e9   : > { %4823 = vmatprep.subr.bf16.mxu0 %v5154_v1 }
0x15ef   : > { %4812 = vmatmul.mubr.msk.bf16.vlgmr.msra.gmra.mrb[76].mxu0 %vm796_vm2, %v2569_v9  ;;  %v5030_v9 = vld [vmem:[%s6100_s25 + $0x70] sm:$0xff]  }
0x15f0   : > { %4824 = vmatpush3.bf16.msra.mxu0 %v5022_v8  ;;  %4827 = vmatprep.mubr.msk.bf16.mxu0 %vm5155_vm0, %v5154_v1  ;;  %v5029_v8 = vld [vmem:[%s6095_s29 + $0x78] sm:$0xff]  }
0x15f1   : > { %4825 = vmatprep.subr.bf16.mxu0 %v5154_v1 }
0x15f4   : > { %4826 = vmatpush3.bf16.msra.mxu0 %v5023_v10  ;;  %v5031_v10 = vld [vmem:[%s6100_s25 + $0x78] sm:$0xff]  }
0x15f5   : > { %4839 = vmatprep.subr.bf16.mxu0 %v5154_v1 }
0x15f7   : > { %4828 = vmatmul.mubr.msk.bf16.vlgmr.msra.gmra.mrb[80].mxu0 %vm624_vm1, %v5671_v45 }
0x15f8   : > { %4841 = vmatprep.mubr.msk.bf16.mxu0 %vm5155_vm0, %v5154_v1 }
0x1673   : > { %v2823_v13 = vpop.xlane.xlu1 %2822 }
0x1674   : > { %5074 = vrcp.f32 %v2823_v13 }
0x167e   : > { %v5075_v14 = vpop.eup %5074 }
0x16ba   : > { %v2866_v15 = vpop.f32.mrb[72].mxu0 }
0x16bb   : > { %v2873_v16 = vmul.f32 %v5075_v14, %v2866_v15  ;;  %v4801_v17 = vpop.f32.mrb[73].mxu0 }
0x16bc   : > { %v2869_v18 = vpop.f32.mrb[74].mxu0 }
0x16bd   : > { %v2874_v20 = vpack.c.bf16 %v2873_v16, %v2873_v16  ;;  %v4802_v21 = vpop.f32.mrb[75].mxu0 }
0x16bf   : > { %4806 = vmatmul.mubr.msk.bf16.vlgmr.msra.gmra.mrb[68].mxu1 %vm796_vm2, %v2874_v20 }
0x16c0   : > { %4816 = vmatpush3.bf16.msra.mxu1 %v5024_v19  ;;  %4819 = vmatprep.mubr.msk.bf16.mxu1 %vm5155_vm0, %v5154_v1  ;;  %v5032_v19 = vld [vmem:[%s6097_s2 + $0x70] sm:$0xff]  }
0x16c1   : > { %4817 = vmatprep.subr.bf16.mxu1 %v5154_v1 }
0x16c2   : > { %v2963_v23 = vpop.f32.mrb[76].mxu0 }
0x16c3   : > { %v4813_v24 = vpop.f32.mrb[77].mxu0 }
0x16c4   : > { %v2966_v25 = vpop.f32.mrb[78].mxu0  ;;  %4818 = vmatpush3.bf16.msra.mxu1 %v5025_v22  ;;  %v5033_v22 = vld [vmem:[%s6097_s2 + $0x78] sm:$0xff]   ;;  %s6009_s2 = scalar_lea.hbm %s6101_s26, %s4385_s23 }
0x16c5   : > { %v4814_v27 = vpop.f32.mrb[79].mxu0  ;;  %4831 = vmatprep.subr.bf16.mxu1 %v5154_v1 }
0x16c6   : > { %v4327_v27 = vld [vmem:[%s6057_s6 + $0x7] ss:$0 sm:$0xff] }
0x16c7   : > { %4820 = vmatmul.mubr.msk.bf16.vlgmr.msra.gmra.mrb[72].mxu1 %vm624_vm1, %v5671_v45 }
0x16c8   : > { %4832 = vmatpush3.bf16.msra.mxu1 %v5026_v26  ;;  %4835 = vmatprep.mubr.msk.bf16.mxu1 %vm5155_vm0, %v5154_v1 }
0x16c9   : > { %4833 = vmatprep.subr.bf16.mxu1 %v5154_v1 }
0x16ca   : > { %v3093_v30 = vpop.f32.mrb[80].mxu0 }
0x16cb   : > { %v3094_v31 = vadd.f32 %v4287_v28, %v3093_v30  ;;  %v4829_v32 = vpop.f32.mrb[81].mxu0 }
0x16cc   : > { %v3096_v33 = vpop.f32.mrb[82].mxu0  ;;  %4834 = vmatpush3.bf16.msra.mxu1 %v5027_v29 }
0x16cd   : > { %v3165_v34 = vpack.c.bf16 %v3094_v31, %v3094_v31  ;;  %v4830_v35 = vpop.f32.mrb[83].mxu0  ;;  %4845 = vmatprep.subr.bf16.mxu1 %v5154_v1 }
0x16cf   : > { %v3170_v36 = vsel %vm796_vm2, %v3165_v34, 0  ;;  %4836 = vmatmul.mubr.msk.bf16.vlgmr.msra.gmra.mrb[76].mxu1 %vm624_vm1, %v5671_v45 }
0x16d0   : > { %4840 = vmatpush3.bf16.xpose.msra.mxu0 %v3170_v36  ;;  %4847 = vmatprep.mubr.msk.bf16.mxu1 %vm5155_vm0, %v5154_v1 }
0x16d1   : > { %4851 = vmatprep.subr.bf16.mxu0 %v5154_v1 }
0x1792   : > { %v2917_v37 = vpop.f32.mrb[68].mxu1 }
0x1793   : > { %v5833_v38 = vadd.f32 %v2963_v23, %v2917_v37  ;;  %v4807_v39 = vpop.f32.mrb[69].mxu1 }
0x1794   : > { %v2920_v40 = vpop.f32.mrb[70].mxu1 }
0x1795   : > { %v4808_v41 = vpop.f32.mrb[71].mxu1  ;;  %v4318_v40 = vld [vmem:[%s6056_s5 + $0x7] ss:$0 sm:$0xff] }
0x179a   : > { %v3028_v44 = vpop.f32.mrb[72].mxu1 }
0x179b   : > { %v3029_v46 = vadd.f32 %v4278_v42, %v3028_v44  ;;  %v4821_v47 = vpop.f32.mrb[73].mxu1 }
0x179c   : > { %v3031_v4 = vpop.f32.mrb[74].mxu1 }
0x179d   : > { %v3164_v48 = vpack.c.bf16 %v3029_v46, %v3029_v46  ;;  %v4822_v49 = vpop.f32.mrb[75].mxu1 }
0x179f   : > { %4842 = vmatmul.mubr.msk.bf16.vlgmr.msra.gmra.mrb[84].mxu0 %vm796_vm2, %v3164_v48  ;;  %v4309_v48 = vld [vmem:[%s6055_s4 + $0x7] ss:$0 sm:$0xff] }
0x17a0   : > { %4853 = vmatprep.mubr.msk.bf16.mxu0 %vm5155_vm0, %v5154_v1  ;;  %4852 = vmatpush3.bf16.msra.mxu0 %v3278_v12 }
0x17a1   : > { %4865 = vmatprep.subr.bf16.mxu0 %v5154_v1 }
0x17a2   : > { %v3158_v51 = vpop.f32.mrb[76].mxu1 }
0x17a3   : > { %v3159_v52 = vadd.f32 %v4296_v50, %v3158_v51  ;;  %v4837_v53 = vpop.f32.mrb[77].mxu1 }
0x17a4   : > { %v3161_v54 = vpop.f32.mrb[78].mxu1 }
0x17a5   : > { %v3222_v55 = vpack.c.bf16 %v3159_v52, %v3159_v52  ;;  %v4838_v56 = vpop.f32.mrb[79].mxu1 }
0x17a7   : > { %v3227_v57 = vsel %vm857_vm3, %v3222_v55, 0 }
0x17a8   : > { %4846 = vmatpush3.bf16.msra.mxu1 %v3227_v57 }
0x17a9   : > { %4857 = vmatprep.subr.bf16.mxu1 %v5154_v1 }
0x1872   : > { %v3206_v58 = vpop.f32.mrb[84].mxu0 }
0x1873   : > { %v4843_v59 = vpop.f32.mrb[85].mxu0  ;;  %v3212_v5 = vsel %vm796_vm2, %v3206_v58, -inf }
0x1874   : > { %3213 = vmax.xlane.f32.xlu0 %v3212_v5  ;;  %v3209_v60 = vpop.f32.mrb[86].mxu0 }
0x1875   : > { %v4844_v62 = vpop.f32.mrb[87].mxu0 }
0x1876   : > { %v4333_v62 = vld [vmem:[%s6058_s7 + $0x1c] sm:$0xf] }
0x1901   : > { %v3214_v63 = vpop.xlane.xlu0 %3213 }
0x1902   : > { %v3215_v61 = vsub.f32 %v3206_v58, %v3214_v63  ;;  %v3630_v63 = vsel %vm857_vm3, %v4333_v62, 0 }
0x1904   : > { %v3216_v0 = vmul.f32 1.442695, %v3215_v61 }
0x1906   : > { %5076 = vpow2.f32 %v3216_v0 }
0x1910   : > { %v5077_v2 = vpop.eup %5076 }
0x1911   : > { %v3218_v6 = vsel %vm796_vm2, %v5077_v2, 0.0  ;;  %v3221_v7 = vpack.c.bf16 %v5077_v2, %v5077_v2 }
0x1912   : > { %3219 = vadd.xlane.f32.xlu1 %v3218_v6 }
0x1913   : > { %4848 = vmatmul.mubr.msk.bf16.vlgmr.msra.gmra.mrb[80].mxu1 %vm796_vm2, %v3221_v7 }
0x1914   : > { %4858 = vmatpush3.bf16.msra.mxu1 %v5028_v3  ;;  %4861 = vmatprep.mubr.msk.bf16.mxu1 %vm5155_vm0, %v5154_v1 }
0x1915   : > { %4859 = vmatprep.subr.bf16.mxu1 %v5154_v1 }
0x1918   : > { %4860 = vmatpush3.bf16.msra.mxu1 %v5029_v8 }
0x1919   : > { %4873 = vmatprep.subr.bf16.mxu1 %v5154_v1 }
0x191b   : > { %4862 = vmatmul.mubr.msk.bf16.vlgmr.msra.gmra.mrb[84].mxu1 %vm624_vm1, %v5671_v45 }
0x191c   : > { %4874 = vmatpush3.bf16.msra.mxu1 %v5030_v9  ;;  %4877 = vmatprep.mubr.msk.bf16.mxu1 %vm5155_vm0, %v5154_v1 }
0x191d   : > { %4875 = vmatprep.subr.bf16.mxu1 %v5154_v1 }
0x1920   : > { %4876 = vmatpush3.bf16.msra.mxu1 %v5031_v10 }
0x1921   : > { %4887 = vmatprep.subr.bf16.mxu1 %v5154_v1 }
0x1923   : > { %4878 = vmatmul.mubr.msk.bf16.vlgmr.msra.gmra.mrb[88].mxu1 %vm624_vm1, %v5671_v45 }
0x1924   : > { %4889 = vmatprep.mubr.msk.bf16.mxu1 %vm5155_vm0, %v5154_v1 }
0x199f   : > { %v3220_v13 = vpop.xlane.xlu1 %3219 }
0x19a0   : > { %5078 = vrcp.f32 %v3220_v13 }
0x19aa   : > { %v5079_v14 = vpop.eup %5078 }
0x19e6   : > { %v3263_v15 = vpop.f32.mrb[80].mxu1 }
0x19e7   : > { %v3270_v16 = vmul.f32 %v5079_v14, %v3263_v15  ;;  %v4849_v17 = vpop.f32.mrb[81].mxu1 }
0x19e8   : > { %v3266_v18 = vpop.f32.mrb[82].mxu1 }
0x19e9   : > { %v3271_v20 = vpack.c.bf16 %v3270_v16, %v3270_v16  ;;  %v4850_v21 = vpop.f32.mrb[83].mxu1 }
0x19eb   : > { %4854 = vmatmul.mubr.msk.bf16.vlgmr.msra.gmra.mrb[88].mxu0 %vm796_vm2, %v3271_v20 }
0x19ec   : > { %4866 = vmatpush3.bf16.msra.mxu0 %v5032_v19  ;;  %4869 = vmatprep.mubr.msk.bf16.mxu0 %vm5155_vm0, %v5154_v1 }
0x19ed   : > { %4867 = vmatprep.subr.bf16.mxu0 %v5154_v1 }
0x19ee   : > { %v3380_v23 = vpop.f32.mrb[84].mxu1 }
0x19ef   : > { %v4863_v24 = vpop.f32.mrb[85].mxu1 }
0x19f0   : > { %v3383_v25 = vpop.f32.mrb[86].mxu1  ;;  %4868 = vmatpush3.bf16.msra.mxu0 %v5033_v22  ;;  %v5034_v24 = vld [vmem:[%s6060_s9 + $0x10] sm:$0xff]  }
0x19f1   : > { %v4864_v26 = vpop.f32.mrb[87].mxu1  ;;  %4881 = vmatprep.subr.bf16.mxu0 %v5154_v1  ;;  %v5036_v25 = vld [vmem:[%s6062_s11 + $0x40] sm:$0xff]  }
0x19f3   : > { %4870 = vmatmul.mubr.msk.bf16.vlgmr.msra.gmra.mrb[92].mxu0 %vm624_vm1, %v5671_v45 }
0x19f4   : > { %4883 = vmatprep.mubr.msk.bf16.mxu0 %vm5155_vm0, %v5154_v1 }
0x19f6   : > { %v3510_v28 = vpop.f32.mrb[88].mxu1 }
0x19f7   : > { %v3511_v29 = vadd.f32 %v4327_v27, %v3510_v28  ;;  %v4879_v30 = vpop.f32.mrb[89].mxu1 }
0x19f8   : > { %v3513_v31 = vpop.f32.mrb[90].mxu1  ;;  %v4339_v30 = vld [vmem:[%s6064_s13 + $0x1] ss:$0 sm:$0xff] }
0x19f9   : > { %v3574_v32 = vpack.c.bf16 %v3511_v29, %v3511_v29  ;;  %v4880_v33 = vpop.f32.mrb[91].mxu1 }
0x19fb   : > { %v3579_v34 = vsel %vm857_vm3, %v3574_v32, 0  ;;  %v4340_v32 = vld [vmem:[%s6065_s14 + $0x1] ss:$0 sm:$0xff] }
0x19fc   : > { %4888 = vmatpush3.bf16.msra.mxu1 %v3579_v34 }
0x19fd   : > { %4899 = vmatprep.subr.bf16.mxu1 %v5154_v1 }
0x1abe   : > { %v3314_v35 = vpop.f32.mrb[88].mxu0 }
0x1abf   : > { %v3320_v45 = vadd.f32 %v3314_v35, %v5833_v38  ;;  %v4855_v36 = vpop.f32.mrb[89].mxu0  ;;  %v3381_v38 = vadd.f32 %v4309_v48, %v3380_v23 }
0x1ac0   : > { %v3317_v37 = vpop.f32.mrb[90].mxu0  ;;  %v5038_v36 = vld [vmem:[%s6062_s11 + $0x50] sm:$0xff]  }
0x1ac1   : > { %v4856_v39 = vpop.f32.mrb[91].mxu0  ;;  %v3516_v50 = vpack.c.bf16 %v3381_v38, %v3381_v38  ;;  %v5039_v37 = vld [vmem:[%s6062_s11 + $0x58] sm:$0xff]  }
0x1ac2   : > { %v5040_v39 = vld [vmem:[%s6062_s11 + $0x60] sm:$0xff]  }
0x1ac6   : > { %v3445_v41 = vpop.f32.mrb[92].mxu0 }
0x1ac7   : > { %v3446_v42 = vadd.f32 %v4318_v40, %v3445_v41  ;;  %v4871_v44 = vpop.f32.mrb[93].mxu0  ;;  %v5041_v40 = vld [vmem:[%s6062_s11 + $0x68] sm:$0xff]   ;;  %v5042_v41 = vld [vmem:[%s6062_s11 + $0x70] sm:$0xff]  }
0x1ac8   : > { %v3448_v46 = vpop.f32.mrb[94].mxu0  ;;  %v4346_v44 = vld [vmem:[%s6061_s10 + $0x1] ss:$0 sm:$0xff] }
0x1ac9   : > { %v3517_v47 = vpack.c.bf16 %v3446_v42, %v3446_v42  ;;  %v4872_v4 = vpop.f32.mrb[95].mxu0  ;;  %v5043_v42 = vld [vmem:[%s6062_s11 + $0x78] sm:$0xff]  }
0x1acb   : > { %v3522_v49 = vsel %vm796_vm2, %v3517_v47, 0 }
0x1acc   : > { %4882 = vmatpush3.bf16.xpose.msra.mxu0 %v3522_v49 }
0x1acd   : > { %4893 = vmatprep.subr.bf16.mxu0 %v5154_v1 }
0x1ad3   : > { %4884 = vmatmul.mubr.msk.bf16.vlgmr.msra.gmra.mrb[96].mxu0 %vm796_vm2, %v3516_v50 }
0x1ad4   : > { %4895 = vmatprep.mubr.msk.bf16.mxu0 %vm5155_vm0, %v5154_v1  ;;  %4894 = vmatpush3.bf16.msra.mxu0 %v3630_v63 }
0x1ad5   : > { %4907 = vmatprep.subr.bf16.mxu0 %v5154_v1 }
0x1ba6   : > { %v3558_v51 = vpop.f32.mrb[96].mxu0 }
0x1ba7   : > { %v4885_v52 = vpop.f32.mrb[97].mxu0  ;;  %v3564_v53 = vsel %vm796_vm2, %v3558_v51, -inf }
0x1ba8   : > { %3565 = vmax.xlane.f32.xlu0 %v3564_v53  ;;  %v3561_v54 = vpop.f32.mrb[98].mxu0 }
0x1ba9   : > { %v4886_v55 = vpop.f32.mrb[99].mxu0 }
0x1c35   : > { %v3566_v56 = vpop.xlane.xlu0 %3565 }
0x1c36   : > { %v3567_v57 = vsub.f32 %v3558_v51, %v3566_v56 }
0x1c38   : > { %v3568_v58 = vmul.f32 1.442695, %v3567_v57 }
0x1c3a   : > { %5080 = vpow2.f32 %v3568_v58 }
0x1c44   : > { %v5081_v59 = vpop.eup %5080 }
0x1c45   : > { %v3570_v5 = vsel %vm796_vm2, %v5081_v59, 0.0  ;;  %v3573_v60 = vpack.c.bf16 %v5081_v59, %v5081_v59  ;;  %v4367_v59 = vld [vmem:[%s6063_s12 + $0x1] ss:$0 sm:$0xff] }
0x1c46   : > { %3571 = vadd.xlane.f32.xlu1 %v3570_v5 }
0x1c47   : > { %4890 = vmatmul.mubr.msk.bf16.vlgmr.msra.gmra.mrb[92].mxu1 %vm796_vm2, %v3573_v60 }
0x1c48   : > { %4903 = vmatprep.mubr.msk.bf16.mxu1 %vm5155_vm0, %v5154_v1  ;;  %4900 = vmatpush3.bf16.msra.mxu1 %v5034_v24 }
0x1c49   : > { %4901 = vmatprep.subr.bf16.mxu1 %v5154_v1 }
0x1cd3   : > { %v3572_v61 = vpop.xlane.xlu1 %3571 }
0x1cd4   : > { %5082 = vrcp.f32 %v3572_v61 }
0x1cde   : > { %v5083_v0 = vpop.eup %5082 }
0x1d1a   : > { %v3615_v2 = vpop.f32.mrb[92].mxu1 }
0x1d1b   : > { %v3622_v3 = vmul.f32 %v5083_v0, %v3615_v2  ;;  %v4891_v6 = vpop.f32.mrb[93].mxu1 }
0x1d1c   : > { %v3618_v7 = vpop.f32.mrb[94].mxu1 }
0x1d1d   : > { %v3623_v8 = vpack.c.bf16 %v3622_v3, %v3622_v3  ;;  %v4892_v9 = vpop.f32.mrb[95].mxu1 }
0x1d1f   : > { %4896 = vmatmul.mubr.msk.bf16.vlgmr.msra.gmra.mrb[100].mxu0 %vm796_vm2, %v3623_v8 }
0x1d20   : > { %4923 = vmatprep.mubr.msk.bf16.mxu0 %vm5155_vm0, %v5154_v1  ;;  %4908 = vmatpush3.bf16.msra.mxu0 %v5036_v25 }
0x1d21   : > { %4909 = vmatprep.subr.bf16.mxu0 %v5154_v1 }
0x1df2   : > { %v3666_v10 = vpop.f32.mrb[100].mxu0 }
0x1df3   : > { %v3672_v12 = vadd.f32 %v3666_v10, %v3320_v45  ;;  %v4897_v13 = vpop.f32.mrb[101].mxu0  ;;  %v5037_v45 = vld [vmem:[%s6062_s11 + $0x48] sm:$0xff]   ;;  %v5044_v10 = vld [vmem:[%s6068_s17] sm:$0xff]  }
0x1df4   : > { %v3669_v14 = vpop.f32.mrb[102].mxu0  ;;  %4910 = vmatpush3.bf16.msra.mxu0 %v5037_v45 }
0x1df5   : > { %v3681_v15 = vadd.f32 %v4336_v11, %v3672_v12  ;;  %v4898_v16 = vpop.f32.mrb[103].mxu0  ;;  %4911 = vmatprep.subr.bf16.mxu0 %v5154_v1  ;;  %v5045_v11 = vld [vmem:[%s6068_s17 + $0x8] sm:$0xff]  }
0x1df6   : > { %v4378_v16 = vld [vmem:[%s6066_s15 + $0x1] ss:$0 sm:$0xff] }
0x1df7   : > { %v3682_v17 = vadd.f32 %v3681_v15, %v5664_v43  ;;  %v5035_v43 = vld [vmem:[%s6060_s9 + $0x18] sm:$0xff]  }
0x1df8   : > { %4902 = vmatpush3.bf16.msra.mxu1 %v5035_v43  ;;  %4912 = vmatpush3.bf16.msra.mxu0 %v5038_v36 }
0x1df9   : > { %v3687_v18 = vsel %vm624_vm1, %v3682_v17, 0.0  ;;  %4927 = vmatprep.subr.bf16.mxu1 %v5154_v1  ;;  %4913 = vmatprep.subr.bf16.mxu0 %v5154_v1 }
0x1dfa   : > { %3688 = vadd.xlane.f32.xlu0 %v3687_v18 }
0x1dfc   : > { %4914 = vmatpush3.bf16.msra.mxu0 %v5039_v37 }
0x1dfd   : > { %4915 = vmatprep.subr.bf16.mxu0 %v5154_v1 }
0x1e00   : > { %4916 = vmatpush3.bf16.msra.mxu0 %v5040_v39 }
0x1e01   : > { %4917 = vmatprep.subr.bf16.mxu0 %v5154_v1 }
0x1e04   : > { %4918 = vmatpush3.bf16.msra.mxu0 %v5041_v40 }
0x1e05   : > { %4919 = vmatprep.subr.bf16.mxu0 %v5154_v1 }
0x1e08   : > { %4920 = vmatpush3.bf16.msra.mxu0 %v5042_v41 }
0x1e09   : > { %4921 = vmatprep.subr.bf16.mxu0 %v5154_v1 }
0x1e0c   : > { %4922 = vmatpush3.bf16.msra.mxu0 %v5043_v42 }
0x1e87   : > { %v3689_v19 = vpop.xlane.xlu0 %3688 }
0x1e88   : > { %v3690_v20 = vmul.f32 0.03125, %v3689_v19 }
0x1e8a   : > { %v3691_v21 = vsub.f32 %v3682_v17, %v3690_v20 }
0x1e8c   : > { %v3692_v22 = vmul.f32 %v3691_v21, %v3691_v21 }
0x1e8e   : > { %v3693_v23 = vsel %vm624_vm1, %v3692_v22, 0.0 }
0x1e8f   : > { %3694 = vadd.xlane.f32.xlu1 %v3693_v23 }
0x1f1c   : > { %v3695_v26 = vpop.xlane.xlu1 %3694 }
0x1f1d   : > { %v3696_v27 = vmul.f32 0.03125, %v3695_v26 }
0x1f1f   : > { %v3697_v28 = vadd.f32 1e-05, %v3696_v27 }
0x1f21   : > { %5084 = vrsqrt.f32 %v3697_v28 }
0x1f2b   : > { %v5085_v29 = vpop.eup %5084 }
0x1f2c   : > { %v3699_v31 = vmul.f32 %v5085_v29, %v3691_v21  ;;  %v4380_v21 = vld [vmem:[%s6069_s18] ss:$0 sm:$0xff] }
0x1f2e   : > { %v3706_v33 = vmul.f32 %v4339_v30, %v3699_v31 }
0x1f30   : > { %v3713_v34 = vadd.f32 %v4340_v32, %v3706_v33 }
0x1f32   : > { %v3714_v35 = vpack.c.bf16 %v3713_v34, %v3713_v34 }
0x1f34   : > { %4904 = vmatmul.mubr.msk.bf16.vlgmr.msra.gmra.mrb[96].mxu1 %vm624_vm1, %v3714_v35 }
0x1f35   : > { %4931 = vmatprep.mubr.msk.bf16.mxu1 %vm5155_vm0, %v5154_v1  ;;  %4928 = vmatpush3.bf16.msra.mxu1 %v5044_v10 }
0x1f36   : > { %4929 = vmatprep.subr.bf16.mxu1 %v5154_v1  ;;  %v4379_v1 = vld [vmem:[%s6067_s16 + $0x1] ss:$0 sm:$0xff] }
0x1f39   : > { %4930 = vmatpush3.bf16.msra.mxu1 %v5045_v11 }
0x2007   : > { %v3777_v46 = vpop.f32.mrb[96].mxu1 }
0x2008   : > { %v3778_v47 = vadd.f32 %v4346_v44, %v3777_v46  ;;  %v4905_v4 = vpop.f32.mrb[97].mxu1 }
0x2009   : > { %v3780_v48 = vpop.f32.mrb[98].mxu1 }
0x200a   : > { %v3784_v49 = vmul.f32 0.044715, %v3778_v47  ;;  %v4906_v38 = vpop.f32.mrb[99].mxu1  ;;  %v3783_v55 = vmul.f32 0.5, %v3778_v47 }
0x200c   : > { %v3785_v50 = vmul.f32 %v3784_v49, %v3778_v47 }
0x200e   : > { %v3786_v51 = vmul.f32 %v3785_v50, %v3778_v47 }
0x2010   : > { %v3787_v52 = vadd.f32 %v3786_v51, %v3778_v47 }
0x2012   : > { %v3788_v53 = vmul.f32 0.7978846, %v3787_v52 }
0x2014   : > { %5086 = vtanh.f32 %v3788_v53 }
0x201e   : > { %v5087_v54 = vpop.eup %5086 }
0x201f   : > { %v3790_v56 = vadd.f32 1.0, %v5087_v54 }
0x2021   : > { %v3791_v57 = vmul.f32 %v3790_v56, %v3783_v55 }
0x2023   : > { %v3792_v58 = vpack.c.bf16 %v3791_v57, %v3791_v57 }
0x2025   : > { %4924 = vmatmul.mubr.bf16.vlgmr.msra.gmra.mrb[104].mxu0 %v3792_v58 }
0x20f8   : > { %v3900_v5 = vpop.f32.mrb[104].mxu0 }
0x20f9   : > { %v3901_v60 = vadd.f32 %v4367_v59, %v3900_v5  ;;  %v4925_v62 = vpop.f32.mrb[105].mxu0 }
0x20fa   : > { %v3903_v63 = vpop.f32.mrb[106].mxu0 }
0x20fb   : > { %v4926_v61 = vpop.f32.mrb[107].mxu0  ;;  %v3906_v0 = vadd.f32 %v3901_v60, %v3713_v34 }
0x20fd   : > { %v3911_v2 = vsel %vm624_vm1, %v3906_v0, 0.0 }
0x20fe   : > { %3912 = vadd.xlane.f32.xlu0 %v3911_v2 }
0x218b   : > { %v3913_v3 = vpop.xlane.xlu0 %3912 }
0x218c   : > { %v3914_v6 = vmul.f32 0.03125, %v3913_v3 }
0x218e   : > { %v3915_v7 = vsub.f32 %v3906_v0, %v3914_v6 }
0x2190   : > { %v3916_v8 = vmul.f32 %v3915_v7, %v3915_v7 }
0x2192   : > { %v3917_v9 = vsel %vm624_vm1, %v3916_v8, 0.0 }
0x2193   : > { %3918 = vadd.xlane.f32.xlu1 %v3917_v9 }
0x2220   : > { %v3919_v12 = vpop.xlane.xlu1 %3918 }
0x2221   : > { %v3920_v13 = vmul.f32 0.03125, %v3919_v12 }
0x2223   : > { %v3921_v14 = vadd.f32 1e-05, %v3920_v13 }
0x2225   : > { %5088 = vrsqrt.f32 %v3921_v14 }
0x222f   : > { %v5089_v15 = vpop.eup %5088 }
0x2230   : > { %v3923_v17 = vmul.f32 %v5089_v15, %v3915_v7 }
0x2232   : > { %v3930_v18 = vmul.f32 %v4378_v16, %v3923_v17 }
0x2234   : > { %v3937_v19 = vadd.f32 %v4379_v1, %v3930_v18 }
0x2236   : > { %v3938_v20 = vpack.c.bf16 %v3937_v19, %v3937_v19 }
0x2238   : > { %4932 = vmatmul.mubr.msk.bf16.vlgmr.msra.gmra.mrb[100].mxu1 %vm624_vm1, %v3938_v20 }
0x230b   : > { %v3999_v22 = vpop.f32.mrb[100].mxu1 }
0x230c   : > { %v4000_v23 = vadd.f32 %v4380_v21, %v3999_v22  ;;  %v4933_v24 = vpop.f32.mrb[101].mxu1 }
0x230d   : > { %v4002_v43 = vpop.f32.mrb[102].mxu1 }
0x230e   : > { %4005 = vst [vmem:[%s593_s19] sm:$0xff] %v4000_v23  ;;  %v4934_v25 = vpop.f32.mrb[103].mxu1 }
0x230f   : > { %5103 = shalt.err (!%p5100_p3)
}
0x2310   : > { %s5104_s24 = scalar_lea.hbm %s6009_s2, 128  ;;  %s5108_s21 = scalar_lea.hbm %s6101_s26, 256 }
0x2311   : > { %p5105_p4 = scmp.ne.s32.totalorder %s6009_s2, %s5104_s24  ;;  %p5109_p9 = scmp.lt.u32.totalorder %s6009_s2, %s6101_s26 }
0x2312   : > { %p5110_p10 = scmp.lt.u32.totalorder %s5108_s21, %s5104_s24  ;;  %p5112_p12 = scmp.lt.u32.totalorder %s5104_s24, %s6009_s2 }
0x2313   : > { %p5106_p7 = pnand %p5105_p4, %p5295_p5 }
0x2314   : > { %p5111_p11 = por %p5110_p10, %p5109_p9 }
0x2315   : > { %p5107_p8 = pneg %p5106_p7 }
0x2316   : > { %p5113_p13 = por %p5112_p12, %p5111_p11 }
0x2318   : > { %p5114_p0 = pnand %p5113_p13, %p5107_p8 }
0x231a   : > { %5117 = shalt.err (!%p5114_p0)
}
0x231b   : > { %4935 = dma.vmem_to_hbm [thread:$0]  (%p5295_p5), %s6011_s0, 128, %s6009_s2, %s4007_s28  }
0x231c PF: > { %s6102_s1 = sld [smem:[#allocation7_spill]]  ;;  %s6103_s20 = sld [smem:[#allocation5_spill]] }
0x2322   : > { %p4941_p1 = scmp.ge.s32.totalorder %s6102_s1, 2  ;;  %s4032_s19 = sand.u32 1, %s6103_s20  }
0x2323   : > { %s4033_s27 = scalar_lea.sflag [#allocation3], %s4032_s19 }
0x2324   : > { %p4938_p2 = pnand %p4941_p1, %p5299_p6 }
0x2326   : > { %5135 = dma.done.wait (!%p4938_p2), %s4033_s27, 128  }
0x2327   : > { %5137 = vsyncadd (!%p4938_p2), %s4033_s27, 4294967168  ;;  %s6105_s21 = sld [smem:[#allocation8_spill]]  ;;  %s6106_s24 = sld [smem:[#allocation6_spill]] }
0x2328   : > { %s6107_s20 = sld [smem:[#allocation9_spill]]  ;;  %s6108_s0 = smov %s5144_s30 }
0x232d   : > { %p29_p3 = scmp.ge.s32.totalorder %s6105_s21, 4   ;;  %s6109_s30 = smov %s6106_s24 }
0x232f   :  { %31 = sbr.rel (!%p29_p3) target bundleno = 9 (0x9), region = 189 }
0x2336   :  { %4038 = vsyncpa [#allocation3], 1 }
0x2337   :  { %4040 = vsyncpa [#allocation3 + $0x1], 1 }

</bundles_post_ra>
